<compile_context>
chip_gen: v7x
topology: tpu7x:2x2x1
jax: 0.10.0
libtpu: 0.0.40
codegen_flags: <defaults>
</compile_context>

<pallas_src>
import numpy as np
import jax
import jax.numpy as jnp
from jax.experimental import pallas as pl
from jax.experimental.pallas import tpu as pltpu

# ---------------- config (small shapes consistent with the module) ----------
B = 8                       # batch
LAT = (2, 2, 2)             # latent_dim
CS = (4, 4, 4, 32)          # cs ; only cs[1], cs[2], cs[3] are used
CS1, CS2, CS3 = CS[1], CS[2], CS[3]
FS2 = 8                     # fs[2] = data_dims[0] // 4
K, STRIDE, PAD = 4, 2, 1
H0 = FS2                    # 8   (spatial after affd0_1 reshape)
H1 = H0 * STRIDE            # 16  (after convd0_2)
H2 = H1 * STRIDE            # 32  (after convd0_3)
S1 = H1 * H1                # per-channel spatial size after deconv 1 (256)
EPS = 1e-3                  # BatchNorm eps (2nd positional arg in the module)

# packed-parameter row indices
_GLAT, _BELAT = 0, 1                                             # vec96  (2, 96)
_W22, _W23, _W11A, _W11B, _W12, _W13 = range(6)                  # sqw    (6, 32, 32)
_G22, _BE22, _B23, _G11, _BE11, _G12, _BE12, _B13 = range(8)     # vec32  (8, 32)
_G01, _BE01 = 0, 1                                               # vec256 (2, 256)
_GC2, _BEC2, _BC3 = range(3)                                     # vec1024(3, 1024)


# ---------------- in-kernel helpers ------------------------------------------
def _relu(x):
    return jnp.maximum(x, 0.0)


def _bn1d(x, g, b):
    # training-mode BatchNorm1d: batch mean, biased batch variance.
    # Single pass: sum & sum-of-squares together, var = E[x^2] - mu^2 (f32).
    inv_n = 1.0 / float(x.shape[0])
    mu = jnp.sum(x, axis=0, keepdims=True) * inv_n
    ex2 = jnp.sum(x * x, axis=0, keepdims=True) * inv_n
    var = jnp.maximum(ex2 - mu * mu, 0.0)
    return g * (x - mu) * jax.lax.rsqrt(var + EPS) + b


def _row(ref, i):
    return ref[pl.ds(i, 1), :]            # (1, width) row of a packed table


def _dot(a, b):
    return jnp.dot(a, b, preferred_element_type=jnp.float32)


# ---------------- the Pallas kernel ------------------------------------------
def decoder_kernel(hcat_ref, wlat_ref, vec96_ref, sqw_ref, vec32_ref,
                   w01_ref, vec256_ref, vec1024_ref,
                   wc2_hbm, wc3_hbm,
                   out_ref,
                   wc2_vmem, wc3_vmem, sems):
    # Kick off the big deconv-weight copies immediately; the serial ladder
    # chain below runs while they are in flight.
    cp2 = pltpu.make_async_copy(wc2_hbm, wc2_vmem, sems.at[0])
    cp3 = pltpu.make_async_copy(wc3_hbm, wc3_vmem, sems.at[1])
    cp2.start()
    cp3.start()

    # ---- fused latent projections (affd2_1 / affl1_3 / affl0_3) ------------
    # One (B,6)@(6,96) block-diagonal matmul + one BN1d(96); per-feature batch
    # statistics make this exactly equivalent to the three separate BN1d(32).
    # (Pre-BN linear biases cancel under batch-stat BN -> dropped.)
    xcat = _dot(hcat_ref[...], wlat_ref[...])                       # (B, 96)
    xcat = _relu(_bn1d(xcat, _row(vec96_ref, _GLAT), _row(vec96_ref, _BELAT)))
    x2 = xcat[:, 0 * CS3:1 * CS3]
    l1 = xcat[:, 1 * CS3:2 * CS3]
    l0 = xcat[:, 2 * CS3:3 * CS3]

    # ---- ladder 2 -----------------------------------------------------------
    x = _dot(x2, sqw_ref[_W22])
    x = _relu(_bn1d(x, _row(vec32_ref, _G22), _row(vec32_ref, _BE22)))
    h2_gen = _dot(x, sqw_ref[_W23]) + _row(vec32_ref, _B23)

    # ---- ladder 1 ----  combine_noise(h2_gen, l1, 'concat') @ W == split matmul
    x = _dot(h2_gen, sqw_ref[_W11A]) + _dot(l1, sqw_ref[_W11B])
    x = _relu(_bn1d(x, _row(vec32_ref, _G11), _row(vec32_ref, _BE11)))
    x = _dot(x, sqw_ref[_W12])
    x = _relu(_bn1d(x, _row(vec32_ref, _G12), _row(vec32_ref, _BE12)))
    h1_gen = _dot(x, sqw_ref[_W13]) + _row(vec32_ref, _B13)

    # ---- ladder 0: concat + affd0_1 as split matmul on packed (64, 256) ----
    x = (_dot(h1_gen, w01_ref[pl.ds(0, CS3), :])
         + _dot(l0, w01_ref[pl.ds(CS3, CS3), :]))
    x = _relu(_bn1d(x, _row(vec256_ref, _G01), _row(vec256_ref, _BE01)))
    # (B, cs2*8*8) NCHW-flat == PyTorch h0_gen.reshape(B, cs2, 8, 8)

    # ---- ConvTranspose2d #1 as dense bf16 matmul, then BatchNorm2d + relu ---
    # (conv bias is dead under the following batch-stat BatchNorm2d)
    cp2.wait()
    y = _dot(x.astype(jnp.bfloat16), wc2_vmem[...])                 # (B, cs1*S1) f32
    nb = y.shape[0]
    colsum = jnp.sum(y, axis=0, keepdims=True)                      # one pass:
    colsq = jnp.sum(y * y, axis=0, keepdims=True)                   #   sum & sumsq
    inv_n = 1.0 / float(nb * S1)
    parts = []
    for c in range(CS1):                      # per-channel stats via 128-aligned
        lo = c * S1                           # lane slices (S1 = 256)
        sl = slice(lo, lo + S1)
        mu = jnp.sum(colsum[:, sl], axis=1, keepdims=True) * inv_n  # (1, 1)
        ex2 = jnp.sum(colsq[:, sl], axis=1, keepdims=True) * inv_n
        var = jnp.maximum(ex2 - mu * mu, 0.0)
        inv = jax.lax.rsqrt(var + EPS)
        g = vec1024_ref[pl.ds(_GC2, 1), pl.ds(lo, S1)]              # (1, 256)
        be = vec1024_ref[pl.ds(_BEC2, 1), pl.ds(lo, S1)]
        parts.append(_relu(g * ((y[:, sl] - mu) * inv) + be).astype(jnp.bfloat16))
    y = jnp.concatenate(parts, axis=1)                              # (B, 1024) bf16

    # ---- ConvTranspose2d #2 as dense bf16 matmul, then bias + sigmoid (f32) -
    cp3.wait()
    z = _dot(y, wc3_vmem[...]) + _row(vec1024_ref, _BC3)
    out_ref[...] = jax.nn.sigmoid(z)


# ---------------- wrapper -----------------------------------------------------
def decoder_forward(h0, h1, h2, wlat, vec96, sqw, vec32, w01, vec256,
                    vec1024, wc2, wc3):
    nb = h0.shape[0]
    # concat order must match the block-diagonal wlat layout: [h2 | h1 | h0]
    hcat = jnp.concatenate([h2, h1, h0], axis=1)                    # (B, 6)
    vmem = pltpu.MemorySpace.VMEM
    args = (hcat, wlat, vec96, sqw, vec32, w01, vec256, vec1024, wc2, wc3)
    flat = pl.pallas_call(
        decoder_kernel,
        out_shape=jax.ShapeDtypeStruct((nb, H2 * H2), jnp.float32),
        in_specs=[pl.BlockSpec(memory_space=vmem)] * 8
                 + [pl.BlockSpec(memory_space=pl.ANY)] * 2,          # wc2, wc3
        out_specs=pl.BlockSpec(memory_space=vmem),
        scratch_shapes=[
            pltpu.VMEM((CS2 * H0 * H0, CS1 * S1), jnp.bfloat16),     # wc2 buffer
            pltpu.VMEM((CS1 * S1, H2 * H2), jnp.bfloat16),           # wc3 buffer
            pltpu.SemaphoreType.DMA((2,)),
        ],
        # right-sized: actual footprint ~2.7 MiB; stays well under v7x's 64 MiB
        compiler_params=pltpu.CompilerParams(vmem_limit_bytes=16 * 1024 * 1024),
    )(*args)
    return flat.reshape(nb, 1, H2, H2)   # NCHW, like PyTorch


# ---------------- deterministic parameter construction (glue) ----------------
def _deconv_dense(w, cin, cout, hin):
    """Expand a ConvTranspose2d weight (cin, cout, K, K) into the dense
    (cin*hin*hin, cout*hout*hout) matrix (stride=2, pad=1), NCHW-flat."""
    hout = hin * STRIDE
    m = np.zeros((cin * hin * hin, cout * hout * hout), np.float32)
    w = np.asarray(w)
    ci_off = np.arange(cin) * (hin * hin)
    co_off = np.arange(cout) * (hout * hout)
    for iy in range(hin):
        for ix in range(hin):
            for ky in range(K):
                for kx in range(K):
                    oy = iy * STRIDE - PAD + ky
                    ox = ix * STRIDE - PAD + kx
                    if 0 <= oy < hout and 0 <= ox < hout:
                        rows = ci_off + iy * hin + ix
                        cols = co_off + oy * hout + ox
                        m[rows[:, None], cols[None, :]] = w[:, :, ky, kx]
    return m


if __name__ == "__main__":
    key = jax.random.PRNGKey(0)
    keys = jax.random.split(key, 32)

    def unif(k, shape, fan_in):
        bound = 1.0 / np.sqrt(fan_in)
        return jax.random.uniform(k, shape, jnp.float32, -bound, bound)

    # fused latent-projection weight: block-diagonal (6, 96); biases dead under BN
    w21 = unif(keys[0], (LAT[2], CS3), LAT[2])      # affd2_1
    wl13 = unif(keys[3], (LAT[1], CS3), LAT[1])     # affl1_3
    wl03 = unif(keys[7], (LAT[0], CS3), LAT[0])     # affl0_3
    r0 = LAT[2]
    r1 = LAT[2] + LAT[1]
    r2 = LAT[2] + LAT[1] + LAT[0]
    wlat = jnp.zeros((r2, 3 * CS3), jnp.float32)
    wlat = wlat.at[0:r0, 0 * CS3:1 * CS3].set(w21)
    wlat = wlat.at[r0:r1, 1 * CS3:2 * CS3].set(wl13)
    wlat = wlat.at[r1:r2, 2 * CS3:3 * CS3].set(wl03)
    vec96 = jnp.stack([jnp.ones((3 * CS3,), jnp.float32),     # bnd2_1|bnl1_3|bnl0_3 gamma
                       jnp.zeros((3 * CS3,), jnp.float32)])   # ... beta

    # 32x32 weights: affd2_2, affd2_3, affd1_1 (split halves), affd1_2, affd1_3
    w11 = unif(keys[4], (2 * CS3, CS3), 2 * CS3)
    sqw = jnp.stack([unif(keys[1], (CS3, CS3), CS3),      # w22
                     unif(keys[2], (CS3, CS3), CS3),      # w23
                     w11[:CS3], w11[CS3:],                # w11a, w11b
                     unif(keys[5], (CS3, CS3), CS3),      # w12
                     unif(keys[6], (CS3, CS3), CS3)])     # w13    -> (6, 32, 32)

    ones32 = jnp.ones((CS3,), jnp.float32)
    zeros32 = jnp.zeros((CS3,), jnp.float32)
    b23 = unif(keys[13], (CS3,), CS3)
    b13 = unif(keys[14], (CS3,), CS3)
    vec32 = jnp.stack([ones32, zeros32,        # bnd2_2 gamma/beta
                       b23,                    # affd2_3 bias
                       ones32, zeros32,        # bnd1_1
                       ones32, zeros32,        # bnd1_2
                       b13])                   # affd1_3 bias      -> (8, 32)

    # affd0_1 weight, packed (64, 256): rows 0:32 act on h1_gen, 32:64 on l0
    nflat = H0 * H0 * CS2
    w01 = unif(keys[8], (2 * CS3, nflat), 2 * CS3)                  # (64, 256)
    vec256 = jnp.stack([jnp.ones((nflat,), jnp.float32),            # bnd0_1 gamma
                        jnp.zeros((nflat,), jnp.float32)])          # bnd0_1 beta

    # convd0_2 (ConvTranspose2d cs2->cs1): dense-lowered, bf16; bias dead under BN2d
    wc2_raw = 0.1 * jax.random.normal(keys[9], (CS2, CS1, K, K), jnp.float32)
    wc2 = jnp.asarray(_deconv_dense(wc2_raw, CS2, CS1, H0)).astype(jnp.bfloat16)  # (256, 1024)

    # convd0_3 (ConvTranspose2d cs1->1): dense-lowered, bf16
    wc3_raw = 0.1 * jax.random.normal(keys[11], (CS1, 1, K, K), jnp.float32)
    bc3_raw = 0.1 * jax.random.normal(keys[12], (1,), jnp.float32)
    wc3 = jnp.asarray(_deconv_dense(wc3_raw, CS1, 1, H1)).astype(jnp.bfloat16)    # (1024, 1024)
    bc3f = jnp.asarray(np.repeat(np.asarray(bc3_raw), H2 * H2), jnp.float32)      # (1024,)

    vec1024 = jnp.stack([jnp.ones((CS1 * S1,), jnp.float32),        # bnd0_2 gamma (pre-broadcast)
                         jnp.zeros((CS1 * S1,), jnp.float32),       # bnd0_2 beta
                         bc3f])                                     # convd0_3 bias -> (3, 1024)

    # inputs
    h0 = jax.random.normal(keys[20], (B, LAT[0]), jnp.float32)
    h1 = jax.random.normal(keys[21], (B, LAT[1]), jnp.float32)
    h2 = jax.random.normal(keys[22], (B, LAT[2]), jnp.float32)

    out = decoder_forward(h0, h1, h2, wlat, vec96, sqw, vec32, w01, vec256,
                          vec1024, wc2, wc3)
    out = jax.block_until_ready(out)

    assert out.shape == (B, 1, H2, H2), out.shape
    assert bool(jnp.isfinite(out).all())
    assert bool((out >= 0.0).all() and (out <= 1.0).all())   # sigmoid output
    print("KERNEL_OK")
</pallas_src>

<mosaic_0001>
module attributes {stable_mosaic.version = 11 : i64} {
  func.func @decoder_kernel(%arg0: memref<8x6xf32, #tpu.memory_space<vmem>>, %arg1: memref<6x96xf32, #tpu.memory_space<vmem>>, %arg2: memref<2x96xf32, #tpu.memory_space<vmem>>, %arg3: memref<6x32x32xf32, #tpu.memory_space<vmem>>, %arg4: memref<8x32xf32, #tpu.memory_space<vmem>>, %arg5: memref<64x256xf32, #tpu.memory_space<vmem>>, %arg6: memref<2x256xf32, #tpu.memory_space<vmem>>, %arg7: memref<3x1024xf32, #tpu.memory_space<vmem>>, %arg8: memref<256x1024xbf16, #tpu.memory_space<any>>, %arg9: memref<1024x1024xbf16, #tpu.memory_space<any>>, %arg10: memref<8x1024xf32, #tpu.memory_space<vmem>>, %arg11: memref<256x1024xbf16, #tpu.memory_space<vmem>>, %arg12: memref<1024x1024xbf16, #tpu.memory_space<vmem>>, %arg13: memref<2x!tpu.dma_semaphore, #tpu.memory_space<semaphore_mem>>) attributes {dimension_semantics = [], scalar_prefetch = 0 : i64, scratch_operands = 3 : i64, tpu.core_type = #tpu.core_type<tc>} {
    %c0_i32 = arith.constant 0 : i32
    %0 = tpu.memref_slice %arg13[%c0_i32] : memref<2x!tpu.dma_semaphore, #tpu.memory_space<semaphore_mem>> -> memref<1x!tpu.dma_semaphore, #tpu.memory_space<semaphore_mem>>
    %1 = tpu.memref_squeeze %0 : memref<1x!tpu.dma_semaphore, #tpu.memory_space<semaphore_mem>> -> memref<!tpu.dma_semaphore, #tpu.memory_space<semaphore_mem>>
    tpu.enqueue_dma source(%arg8 : memref<256x1024xbf16, #tpu.memory_space<any>>) target(%arg11 : memref<256x1024xbf16, #tpu.memory_space<vmem>>) target_semaphore(%1 : memref<!tpu.dma_semaphore, #tpu.memory_space<semaphore_mem>>)
    %c1_i32 = arith.constant 1 : i32
    %2 = tpu.memref_slice %arg13[%c1_i32] : memref<2x!tpu.dma_semaphore, #tpu.memory_space<semaphore_mem>> -> memref<1x!tpu.dma_semaphore, #tpu.memory_space<semaphore_mem>>
    %3 = tpu.memref_squeeze %2 : memref<1x!tpu.dma_semaphore, #tpu.memory_space<semaphore_mem>> -> memref<!tpu.dma_semaphore, #tpu.memory_space<semaphore_mem>>
    tpu.enqueue_dma source(%arg9 : memref<1024x1024xbf16, #tpu.memory_space<any>>) target(%arg12 : memref<1024x1024xbf16, #tpu.memory_space<vmem>>) target_semaphore(%3 : memref<!tpu.dma_semaphore, #tpu.memory_space<semaphore_mem>>)
    %c0 = arith.constant 0 : index
    %c0_0 = arith.constant 0 : index
    %4 = vector.load %arg0[%c0, %c0_0] : memref<8x6xf32, #tpu.memory_space<vmem>>, vector<8x6xf32>
    %c0_1 = arith.constant 0 : index
    %c0_2 = arith.constant 0 : index
    %5 = vector.load %arg1[%c0_1, %c0_2] : memref<6x96xf32, #tpu.memory_space<vmem>>, vector<6x96xf32>
    %cst = arith.constant dense<0.000000e+00> : vector<8x96xf32>
    %6 = tpu.matmul %4, %5, %cst {dimension_numbers = #tpu.dot_dimension_numbers<[1], [0], [0], [1], [0, 0, 1, 1], [], []>} : vector<8x6xf32>, vector<6x96xf32>, vector<8x96xf32> -> vector<8x96xf32>
    %c0_3 = arith.constant 0 : index
    %c0_4 = arith.constant 0 : index
    %7 = vector.load %arg2[%c0_3, %c0_4] : memref<2x96xf32, #tpu.memory_space<vmem>>, vector<1x96xf32>
    %c1 = arith.constant 1 : index
    %c0_5 = arith.constant 0 : index
    %8 = vector.load %arg2[%c1, %c0_5] : memref<2x96xf32, #tpu.memory_space<vmem>>, vector<1x96xf32>
    %cst_6 = arith.constant dense<0.000000e+00> : vector<96xf32>
    %9 = vector.multi_reduction <add>, %6, %cst_6 [0] : vector<8x96xf32> to vector<96xf32>
    %10 = vector.shape_cast %9 : vector<96xf32> to vector<1x96xf32>
    %cst_7 = arith.constant 1.250000e-01 : f32
    %11 = vector.broadcast %cst_7 : f32 to vector<1x96xf32>
    %12 = arith.mulf %10, %11 : vector<1x96xf32>
    %13 = arith.mulf %6, %6 : vector<8x96xf32>
    %cst_8 = arith.constant dense<0.000000e+00> : vector<96xf32>
    %14 = vector.multi_reduction <add>, %13, %cst_8 [0] : vector<8x96xf32> to vector<96xf32>
    %15 = vector.shape_cast %14 : vector<96xf32> to vector<1x96xf32>
    %cst_9 = arith.constant 1.250000e-01 : f32
    %16 = vector.broadcast %cst_9 : f32 to vector<1x96xf32>
    %17 = arith.mulf %15, %16 : vector<1x96xf32>
    %18 = arith.mulf %12, %12 : vector<1x96xf32>
    %19 = arith.subf %17, %18 : vector<1x96xf32>
    %cst_10 = arith.constant 0.000000e+00 : f32
    %20 = vector.broadcast %cst_10 : f32 to vector<1x96xf32>
    %21 = arith.maximumf %19, %20 : vector<1x96xf32>
    %22 = vector.broadcast %12 : vector<1x96xf32> to vector<8x96xf32>
    %23 = arith.subf %6, %22 : vector<8x96xf32>
    %24 = vector.broadcast %7 : vector<1x96xf32> to vector<8x96xf32>
    %25 = arith.mulf %24, %23 : vector<8x96xf32>
    %cst_11 = arith.constant 1.000000e-03 : f32
    %26 = vector.broadcast %cst_11 : f32 to vector<1x96xf32>
    %27 = arith.addf %21, %26 : vector<1x96xf32>
    %28 = math.rsqrt %27 : vector<1x96xf32>
    %29 = vector.broadcast %28 : vector<1x96xf32> to vector<8x96xf32>
    %30 = arith.mulf %25, %29 : vector<8x96xf32>
    %31 = vector.broadcast %8 : vector<1x96xf32> to vector<8x96xf32>
    %32 = arith.addf %30, %31 : vector<8x96xf32>
    %cst_12 = arith.constant 0.000000e+00 : f32
    %33 = vector.broadcast %cst_12 : f32 to vector<8x96xf32>
    %34 = arith.maximumf %32, %33 : vector<8x96xf32>
    %35 = vector.extract_strided_slice %34 {offsets = [0, 0], sizes = [8, 32], strides = [1, 1]} : vector<8x96xf32> to vector<8x32xf32>
    %36 = vector.extract_strided_slice %34 {offsets = [0, 32], sizes = [8, 32], strides = [1, 1]} : vector<8x96xf32> to vector<8x32xf32>
    %37 = vector.extract_strided_slice %34 {offsets = [0, 64], sizes = [8, 32], strides = [1, 1]} : vector<8x96xf32> to vector<8x32xf32>
    %c0_13 = arith.constant 0 : index
    %c0_14 = arith.constant 0 : index
    %c0_15 = arith.constant 0 : index
    %38 = vector.load %arg3[%c0_13, %c0_14, %c0_15] : memref<6x32x32xf32, #tpu.memory_space<vmem>>, vector<1x32x32xf32>
    %39 = vector.shape_cast %38 : vector<1x32x32xf32> to vector<32x32xf32>
    %cst_16 = arith.constant dense<0.000000e+00> : vector<8x32xf32>
    %40 = tpu.matmul %35, %39, %cst_16 {dimension_numbers = #tpu.dot_dimension_numbers<[1], [0], [0], [1], [0, 0, 1, 1], [], []>} : vector<8x32xf32>, vector<32x32xf32>, vector<8x32xf32> -> vector<8x32xf32>
    %c0_17 = arith.constant 0 : index
    %c0_18 = arith.constant 0 : index
    %41 = vector.load %arg4[%c0_17, %c0_18] : memref<8x32xf32, #tpu.memory_space<vmem>>, vector<1x32xf32>
    %c1_19 = arith.constant 1 : index
    %c0_20 = arith.constant 0 : index
    %42 = vector.load %arg4[%c1_19, %c0_20] : memref<8x32xf32, #tpu.memory_space<vmem>>, vector<1x32xf32>
    %cst_21 = arith.constant dense<0.000000e+00> : vector<32xf32>
    %43 = vector.multi_reduction <add>, %40, %cst_21 [0] : vector<8x32xf32> to vector<32xf32>
    %44 = vector.shape_cast %43 : vector<32xf32> to vector<1x32xf32>
    %cst_22 = arith.constant 1.250000e-01 : f32
    %45 = vector.broadcast %cst_22 : f32 to vector<1x32xf32>
    %46 = arith.mulf %44, %45 : vector<1x32xf32>
    %47 = arith.mulf %40, %40 : vector<8x32xf32>
    %cst_23 = arith.constant dense<0.000000e+00> : vector<32xf32>
    %48 = vector.multi_reduction <add>, %47, %cst_23 [0] : vector<8x32xf32> to vector<32xf32>
    %49 = vector.shape_cast %48 : vector<32xf32> to vector<1x32xf32>
    %cst_24 = arith.constant 1.250000e-01 : f32
    %50 = vector.broadcast %cst_24 : f32 to vector<1x32xf32>
    %51 = arith.mulf %49, %50 : vector<1x32xf32>
    %52 = arith.mulf %46, %46 : vector<1x32xf32>
    %53 = arith.subf %51, %52 : vector<1x32xf32>
    %cst_25 = arith.constant 0.000000e+00 : f32
    %54 = vector.broadcast %cst_25 : f32 to vector<1x32xf32>
    %55 = arith.maximumf %53, %54 : vector<1x32xf32>
    %56 = vector.broadcast %46 : vector<1x32xf32> to vector<8x32xf32>
    %57 = arith.subf %40, %56 : vector<8x32xf32>
    %58 = vector.broadcast %41 : vector<1x32xf32> to vector<8x32xf32>
    %59 = arith.mulf %58, %57 : vector<8x32xf32>
    %cst_26 = arith.constant 1.000000e-03 : f32
    %60 = vector.broadcast %cst_26 : f32 to vector<1x32xf32>
    %61 = arith.addf %55, %60 : vector<1x32xf32>
    %62 = math.rsqrt %61 : vector<1x32xf32>
    %63 = vector.broadcast %62 : vector<1x32xf32> to vector<8x32xf32>
    %64 = arith.mulf %59, %63 : vector<8x32xf32>
    %65 = vector.broadcast %42 : vector<1x32xf32> to vector<8x32xf32>
    %66 = arith.addf %64, %65 : vector<8x32xf32>
    %cst_27 = arith.constant 0.000000e+00 : f32
    %67 = vector.broadcast %cst_27 : f32 to vector<8x32xf32>
    %68 = arith.maximumf %66, %67 : vector<8x32xf32>
    %c1_28 = arith.constant 1 : index
    %c0_29 = arith.constant 0 : index
    %c0_30 = arith.constant 0 : index
    %69 = vector.load %arg3[%c1_28, %c0_29, %c0_30] : memref<6x32x32xf32, #tpu.memory_space<vmem>>, vector<1x32x32xf32>
    %70 = vector.shape_cast %69 : vector<1x32x32xf32> to vector<32x32xf32>
    %cst_31 = arith.constant dense<0.000000e+00> : vector<8x32xf32>
    %71 = tpu.matmul %68, %70, %cst_31 {dimension_numbers = #tpu.dot_dimension_numbers<[1], [0], [0], [1], [0, 0, 1, 1], [], []>} : vector<8x32xf32>, vector<32x32xf32>, vector<8x32xf32> -> vector<8x32xf32>
    %c2 = arith.constant 2 : index
    %c0_32 = arith.constant 0 : index
    %72 = vector.load %arg4[%c2, %c0_32] : memref<8x32xf32, #tpu.memory_space<vmem>>, vector<1x32xf32>
    %73 = vector.broadcast %72 : vector<1x32xf32> to vector<8x32xf32>
    %74 = arith.addf %71, %73 : vector<8x32xf32>
    %c2_33 = arith.constant 2 : index
    %c0_34 = arith.constant 0 : index
    %c0_35 = arith.constant 0 : index
    %75 = vector.load %arg3[%c2_33, %c0_34, %c0_35] : memref<6x32x32xf32, #tpu.memory_space<vmem>>, vector<1x32x32xf32>
    %76 = vector.shape_cast %75 : vector<1x32x32xf32> to vector<32x32xf32>
    %cst_36 = arith.constant dense<0.000000e+00> : vector<8x32xf32>
    %77 = tpu.matmul %74, %76, %cst_36 {dimension_numbers = #tpu.dot_dimension_numbers<[1], [0], [0], [1], [0, 0, 1, 1], [], []>} : vector<8x32xf32>, vector<32x32xf32>, vector<8x32xf32> -> vector<8x32xf32>
    %c3 = arith.constant 3 : index
    %c0_37 = arith.constant 0 : index
    %c0_38 = arith.constant 0 : index
    %78 = vector.load %arg3[%c3, %c0_37, %c0_38] : memref<6x32x32xf32, #tpu.memory_space<vmem>>, vector<1x32x32xf32>
    %79 = vector.shape_cast %78 : vector<1x32x32xf32> to vector<32x32xf32>
    %cst_39 = arith.constant dense<0.000000e+00> : vector<8x32xf32>
    %80 = tpu.matmul %36, %79, %cst_39 {dimension_numbers = #tpu.dot_dimension_numbers<[1], [0], [0], [1], [0, 0, 1, 1], [], []>} : vector<8x32xf32>, vector<32x32xf32>, vector<8x32xf32> -> vector<8x32xf32>
    %81 = arith.addf %77, %80 : vector<8x32xf32>
    %c3_40 = arith.constant 3 : index
    %c0_41 = arith.constant 0 : index
    %82 = vector.load %arg4[%c3_40, %c0_41] : memref<8x32xf32, #tpu.memory_space<vmem>>, vector<1x32xf32>
    %c4 = arith.constant 4 : index
    %c0_42 = arith.constant 0 : index
    %83 = vector.load %arg4[%c4, %c0_42] : memref<8x32xf32, #tpu.memory_space<vmem>>, vector<1x32xf32>
    %cst_43 = arith.constant dense<0.000000e+00> : vector<32xf32>
    %84 = vector.multi_reduction <add>, %81, %cst_43 [0] : vector<8x32xf32> to vector<32xf32>
    %85 = vector.shape_cast %84 : vector<32xf32> to vector<1x32xf32>
    %cst_44 = arith.constant 1.250000e-01 : f32
    %86 = vector.broadcast %cst_44 : f32 to vector<1x32xf32>
    %87 = arith.mulf %85, %86 : vector<1x32xf32>
    %88 = arith.mulf %81, %81 : vector<8x32xf32>
    %cst_45 = arith.constant dense<0.000000e+00> : vector<32xf32>
    %89 = vector.multi_reduction <add>, %88, %cst_45 [0] : vector<8x32xf32> to vector<32xf32>
    %90 = vector.shape_cast %89 : vector<32xf32> to vector<1x32xf32>
    %cst_46 = arith.constant 1.250000e-01 : f32
    %91 = vector.broadcast %cst_46 : f32 to vector<1x32xf32>
    %92 = arith.mulf %90, %91 : vector<1x32xf32>
    %93 = arith.mulf %87, %87 : vector<1x32xf32>
    %94 = arith.subf %92, %93 : vector<1x32xf32>
    %cst_47 = arith.constant 0.000000e+00 : f32
    %95 = vector.broadcast %cst_47 : f32 to vector<1x32xf32>
    %96 = arith.maximumf %94, %95 : vector<1x32xf32>
    %97 = vector.broadcast %87 : vector<1x32xf32> to vector<8x32xf32>
    %98 = arith.subf %81, %97 : vector<8x32xf32>
    %99 = vector.broadcast %82 : vector<1x32xf32> to vector<8x32xf32>
    %100 = arith.mulf %99, %98 : vector<8x32xf32>
    %cst_48 = arith.constant 1.000000e-03 : f32
    %101 = vector.broadcast %cst_48 : f32 to vector<1x32xf32>
    %102 = arith.addf %96, %101 : vector<1x32xf32>
    %103 = math.rsqrt %102 : vector<1x32xf32>
    %104 = vector.broadcast %103 : vector<1x32xf32> to vector<8x32xf32>
    %105 = arith.mulf %100, %104 : vector<8x32xf32>
    %106 = vector.broadcast %83 : vector<1x32xf32> to vector<8x32xf32>
    %107 = arith.addf %105, %106 : vector<8x32xf32>
    %cst_49 = arith.constant 0.000000e+00 : f32
    %108 = vector.broadcast %cst_49 : f32 to vector<8x32xf32>
    %109 = arith.maximumf %107, %108 : vector<8x32xf32>
    %c4_50 = arith.constant 4 : index
    %c0_51 = arith.constant 0 : index
    %c0_52 = arith.constant 0 : index
    %110 = vector.load %arg3[%c4_50, %c0_51, %c0_52] : memref<6x32x32xf32, #tpu.memory_space<vmem>>, vector<1x32x32xf32>
    %111 = vector.shape_cast %110 : vector<1x32x32xf32> to vector<32x32xf32>
    %cst_53 = arith.constant dense<0.000000e+00> : vector<8x32xf32>
    %112 = tpu.matmul %109, %111, %cst_53 {dimension_numbers = #tpu.dot_dimension_numbers<[1], [0], [0], [1], [0, 0, 1, 1], [], []>} : vector<8x32xf32>, vector<32x32xf32>, vector<8x32xf32> -> vector<8x32xf32>
    %c5 = arith.constant 5 : index
    %c0_54 = arith.constant 0 : index
    %113 = vector.load %arg4[%c5, %c0_54] : memref<8x32xf32, #tpu.memory_space<vmem>>, vector<1x32xf32>
    %c6 = arith.constant 6 : index
    %c0_55 = arith.constant 0 : index
    %114 = vector.load %arg4[%c6, %c0_55] : memref<8x32xf32, #tpu.memory_space<vmem>>, vector<1x32xf32>
    %cst_56 = arith.constant dense<0.000000e+00> : vector<32xf32>
    %115 = vector.multi_reduction <add>, %112, %cst_56 [0] : vector<8x32xf32> to vector<32xf32>
    %116 = vector.shape_cast %115 : vector<32xf32> to vector<1x32xf32>
    %cst_57 = arith.constant 1.250000e-01 : f32
    %117 = vector.broadcast %cst_57 : f32 to vector<1x32xf32>
    %118 = arith.mulf %116, %117 : vector<1x32xf32>
    %119 = arith.mulf %112, %112 : vector<8x32xf32>
    %cst_58 = arith.constant dense<0.000000e+00> : vector<32xf32>
    %120 = vector.multi_reduction <add>, %119, %cst_58 [0] : vector<8x32xf32> to vector<32xf32>
    %121 = vector.shape_cast %120 : vector<32xf32> to vector<1x32xf32>
    %cst_59 = arith.constant 1.250000e-01 : f32
    %122 = vector.broadcast %cst_59 : f32 to vector<1x32xf32>
    %123 = arith.mulf %121, %122 : vector<1x32xf32>
    %124 = arith.mulf %118, %118 : vector<1x32xf32>
    %125 = arith.subf %123, %124 : vector<1x32xf32>
    %cst_60 = arith.constant 0.000000e+00 : f32
    %126 = vector.broadcast %cst_60 : f32 to vector<1x32xf32>
    %127 = arith.maximumf %125, %126 : vector<1x32xf32>
    %128 = vector.broadcast %118 : vector<1x32xf32> to vector<8x32xf32>
    %129 = arith.subf %112, %128 : vector<8x32xf32>
    %130 = vector.broadcast %113 : vector<1x32xf32> to vector<8x32xf32>
    %131 = arith.mulf %130, %129 : vector<8x32xf32>
    %cst_61 = arith.constant 1.000000e-03 : f32
    %132 = vector.broadcast %cst_61 : f32 to vector<1x32xf32>
    %133 = arith.addf %127, %132 : vector<1x32xf32>
    %134 = math.rsqrt %133 : vector<1x32xf32>
    %135 = vector.broadcast %134 : vector<1x32xf32> to vector<8x32xf32>
    %136 = arith.mulf %131, %135 : vector<8x32xf32>
    %137 = vector.broadcast %114 : vector<1x32xf32> to vector<8x32xf32>
    %138 = arith.addf %136, %137 : vector<8x32xf32>
    %cst_62 = arith.constant 0.000000e+00 : f32
    %139 = vector.broadcast %cst_62 : f32 to vector<8x32xf32>
    %140 = arith.maximumf %138, %139 : vector<8x32xf32>
    %c5_63 = arith.constant 5 : index
    %c0_64 = arith.constant 0 : index
    %c0_65 = arith.constant 0 : index
    %141 = vector.load %arg3[%c5_63, %c0_64, %c0_65] : memref<6x32x32xf32, #tpu.memory_space<vmem>>, vector<1x32x32xf32>
    %142 = vector.shape_cast %141 : vector<1x32x32xf32> to vector<32x32xf32>
    %cst_66 = arith.constant dense<0.000000e+00> : vector<8x32xf32>
    %143 = tpu.matmul %140, %142, %cst_66 {dimension_numbers = #tpu.dot_dimension_numbers<[1], [0], [0], [1], [0, 0, 1, 1], [], []>} : vector<8x32xf32>, vector<32x32xf32>, vector<8x32xf32> -> vector<8x32xf32>
    %c7 = arith.constant 7 : index
    %c0_67 = arith.constant 0 : index
    %144 = vector.load %arg4[%c7, %c0_67] : memref<8x32xf32, #tpu.memory_space<vmem>>, vector<1x32xf32>
    %145 = vector.broadcast %144 : vector<1x32xf32> to vector<8x32xf32>
    %146 = arith.addf %143, %145 : vector<8x32xf32>
    %c0_68 = arith.constant 0 : index
    %c0_69 = arith.constant 0 : index
    %147 = vector.load %arg5[%c0_68, %c0_69] : memref<64x256xf32, #tpu.memory_space<vmem>>, vector<32x256xf32>
    %cst_70 = arith.constant dense<0.000000e+00> : vector<8x256xf32>
    %148 = tpu.matmul %146, %147, %cst_70 {dimension_numbers = #tpu.dot_dimension_numbers<[1], [0], [0], [1], [0, 0, 1, 1], [], []>} : vector<8x32xf32>, vector<32x256xf32>, vector<8x256xf32> -> vector<8x256xf32>
    %c32 = arith.constant 32 : index
    %c0_71 = arith.constant 0 : index
    %149 = vector.load %arg5[%c32, %c0_71] : memref<64x256xf32, #tpu.memory_space<vmem>>, vector<32x256xf32>
    %cst_72 = arith.constant dense<0.000000e+00> : vector<8x256xf32>
    %150 = tpu.matmul %37, %149, %cst_72 {dimension_numbers = #tpu.dot_dimension_numbers<[1], [0], [0], [1], [0, 0, 1, 1], [], []>} : vector<8x32xf32>, vector<32x256xf32>, vector<8x256xf32> -> vector<8x256xf32>
    %151 = arith.addf %148, %150 : vector<8x256xf32>
    %c0_73 = arith.constant 0 : index
    %c0_74 = arith.constant 0 : index
    %152 = vector.load %arg6[%c0_73, %c0_74] : memref<2x256xf32, #tpu.memory_space<vmem>>, vector<1x256xf32>
    %c1_75 = arith.constant 1 : index
    %c0_76 = arith.constant 0 : index
    %153 = vector.load %arg6[%c1_75, %c0_76] : memref<2x256xf32, #tpu.memory_space<vmem>>, vector<1x256xf32>
    %cst_77 = arith.constant dense<0.000000e+00> : vector<256xf32>
    %154 = vector.multi_reduction <add>, %151, %cst_77 [0] : vector<8x256xf32> to vector<256xf32>
    %155 = vector.shape_cast %154 : vector<256xf32> to vector<1x256xf32>
    %cst_78 = arith.constant 1.250000e-01 : f32
    %156 = vector.broadcast %cst_78 : f32 to vector<1x256xf32>
    %157 = arith.mulf %155, %156 : vector<1x256xf32>
    %158 = arith.mulf %151, %151 : vector<8x256xf32>
    %cst_79 = arith.constant dense<0.000000e+00> : vector<256xf32>
    %159 = vector.multi_reduction <add>, %158, %cst_79 [0] : vector<8x256xf32> to vector<256xf32>
    %160 = vector.shape_cast %159 : vector<256xf32> to vector<1x256xf32>
    %cst_80 = arith.constant 1.250000e-01 : f32
    %161 = vector.broadcast %cst_80 : f32 to vector<1x256xf32>
    %162 = arith.mulf %160, %161 : vector<1x256xf32>
    %163 = arith.mulf %157, %157 : vector<1x256xf32>
    %164 = arith.subf %162, %163 : vector<1x256xf32>
    %cst_81 = arith.constant 0.000000e+00 : f32
    %165 = vector.broadcast %cst_81 : f32 to vector<1x256xf32>
    %166 = arith.maximumf %164, %165 : vector<1x256xf32>
    %167 = vector.broadcast %157 : vector<1x256xf32> to vector<8x256xf32>
    %168 = arith.subf %151, %167 : vector<8x256xf32>
    %169 = vector.broadcast %152 : vector<1x256xf32> to vector<8x256xf32>
    %170 = arith.mulf %169, %168 : vector<8x256xf32>
    %cst_82 = arith.constant 1.000000e-03 : f32
    %171 = vector.broadcast %cst_82 : f32 to vector<1x256xf32>
    %172 = arith.addf %166, %171 : vector<1x256xf32>
    %173 = math.rsqrt %172 : vector<1x256xf32>
    %174 = vector.broadcast %173 : vector<1x256xf32> to vector<8x256xf32>
    %175 = arith.mulf %170, %174 : vector<8x256xf32>
    %176 = vector.broadcast %153 : vector<1x256xf32> to vector<8x256xf32>
    %177 = arith.addf %175, %176 : vector<8x256xf32>
    %cst_83 = arith.constant 0.000000e+00 : f32
    %178 = vector.broadcast %cst_83 : f32 to vector<8x256xf32>
    %179 = arith.maximumf %177, %178 : vector<8x256xf32>
    %c0_i32_84 = arith.constant 0 : i32
    %180 = tpu.memref_slice %arg13[%c0_i32_84] : memref<2x!tpu.dma_semaphore, #tpu.memory_space<semaphore_mem>> -> memref<1x!tpu.dma_semaphore, #tpu.memory_space<semaphore_mem>>
    %181 = tpu.memref_squeeze %180 : memref<1x!tpu.dma_semaphore, #tpu.memory_space<semaphore_mem>> -> memref<!tpu.dma_semaphore, #tpu.memory_space<semaphore_mem>>
    tpu.wait_dma2 semaphore(%181 : memref<!tpu.dma_semaphore, #tpu.memory_space<semaphore_mem>>) src(%arg8 : memref<256x1024xbf16, #tpu.memory_space<any>>) dst(%arg11 : memref<256x1024xbf16, #tpu.memory_space<vmem>>)
    %182 = arith.truncf %179 : vector<8x256xf32> to vector<8x256xbf16>
    %c0_85 = arith.constant 0 : index
    %c0_86 = arith.constant 0 : index
    %183 = vector.load %arg11[%c0_85, %c0_86] : memref<256x1024xbf16, #tpu.memory_space<vmem>>, vector<256x1024xbf16>
    %cst_87 = arith.constant dense<0.000000e+00> : vector<8x1024xf32>
    %184 = tpu.matmul %182, %183, %cst_87 {dimension_numbers = #tpu.dot_dimension_numbers<[1], [0], [0], [1], [0, 0, 1, 1], [], []>} : vector<8x256xbf16>, vector<256x1024xbf16>, vector<8x1024xf32> -> vector<8x1024xf32>
    %cst_88 = arith.constant dense<0.000000e+00> : vector<1024xf32>
    %185 = vector.multi_reduction <add>, %184, %cst_88 [0] : vector<8x1024xf32> to vector<1024xf32>
    %186 = vector.shape_cast %185 : vector<1024xf32> to vector<1x1024xf32>
    %187 = arith.mulf %184, %184 : vector<8x1024xf32>
    %cst_89 = arith.constant dense<0.000000e+00> : vector<1024xf32>
    %188 = vector.multi_reduction <add>, %187, %cst_89 [0] : vector<8x1024xf32> to vector<1024xf32>
    %189 = vector.shape_cast %188 : vector<1024xf32> to vector<1x1024xf32>
    %190 = vector.extract_strided_slice %186 {offsets = [0, 0], sizes = [1, 256], strides = [1, 1]} : vector<1x1024xf32> to vector<1x256xf32>
    %cst_90 = arith.constant dense<0.000000e+00> : vector<1xf32>
    %191 = vector.multi_reduction <add>, %190, %cst_90 [1] : vector<1x256xf32> to vector<1xf32>
    %192 = vector.shape_cast %191 : vector<1xf32> to vector<1x1xf32>
    %cst_91 = arith.constant 4.8828125E-4 : f32
    %193 = vector.broadcast %cst_91 : f32 to vector<1x1xf32>
    %194 = arith.mulf %192, %193 : vector<1x1xf32>
    %195 = vector.extract_strided_slice %189 {offsets = [0, 0], sizes = [1, 256], strides = [1, 1]} : vector<1x1024xf32> to vector<1x256xf32>
    %cst_92 = arith.constant dense<0.000000e+00> : vector<1xf32>
    %196 = vector.multi_reduction <add>, %195, %cst_92 [1] : vector<1x256xf32> to vector<1xf32>
    %197 = vector.shape_cast %196 : vector<1xf32> to vector<1x1xf32>
    %cst_93 = arith.constant 4.8828125E-4 : f32
    %198 = vector.broadcast %cst_93 : f32 to vector<1x1xf32>
    %199 = arith.mulf %197, %198 : vector<1x1xf32>
    %200 = arith.mulf %194, %194 : vector<1x1xf32>
    %201 = arith.subf %199, %200 : vector<1x1xf32>
    %cst_94 = arith.constant 0.000000e+00 : f32
    %202 = vector.broadcast %cst_94 : f32 to vector<1x1xf32>
    %203 = arith.maximumf %201, %202 : vector<1x1xf32>
    %cst_95 = arith.constant 1.000000e-03 : f32
    %204 = vector.broadcast %cst_95 : f32 to vector<1x1xf32>
    %205 = arith.addf %203, %204 : vector<1x1xf32>
    %206 = math.rsqrt %205 : vector<1x1xf32>
    %c0_96 = arith.constant 0 : index
    %c0_97 = arith.constant 0 : index
    %207 = vector.load %arg7[%c0_96, %c0_97] : memref<3x1024xf32, #tpu.memory_space<vmem>>, vector<1x256xf32>
    %c1_98 = arith.constant 1 : index
    %c0_99 = arith.constant 0 : index
    %208 = vector.load %arg7[%c1_98, %c0_99] : memref<3x1024xf32, #tpu.memory_space<vmem>>, vector<1x256xf32>
    %209 = vector.extract_strided_slice %184 {offsets = [0, 0], sizes = [8, 256], strides = [1, 1]} : vector<8x1024xf32> to vector<8x256xf32>
    %210 = vector.broadcast %194 : vector<1x1xf32> to vector<8x256xf32>
    %211 = arith.subf %209, %210 : vector<8x256xf32>
    %212 = vector.broadcast %206 : vector<1x1xf32> to vector<8x256xf32>
    %213 = arith.mulf %211, %212 : vector<8x256xf32>
    %214 = vector.broadcast %207 : vector<1x256xf32> to vector<8x256xf32>
    %215 = arith.mulf %214, %213 : vector<8x256xf32>
    %216 = vector.broadcast %208 : vector<1x256xf32> to vector<8x256xf32>
    %217 = arith.addf %215, %216 : vector<8x256xf32>
    %cst_100 = arith.constant 0.000000e+00 : f32
    %218 = vector.broadcast %cst_100 : f32 to vector<8x256xf32>
    %219 = arith.maximumf %217, %218 : vector<8x256xf32>
    %220 = arith.truncf %219 : vector<8x256xf32> to vector<8x256xbf16>
    %221 = vector.extract_strided_slice %186 {offsets = [0, 256], sizes = [1, 256], strides = [1, 1]} : vector<1x1024xf32> to vector<1x256xf32>
    %cst_101 = arith.constant dense<0.000000e+00> : vector<1xf32>
    %222 = vector.multi_reduction <add>, %221, %cst_101 [1] : vector<1x256xf32> to vector<1xf32>
    %223 = vector.shape_cast %222 : vector<1xf32> to vector<1x1xf32>
    %cst_102 = arith.constant 4.8828125E-4 : f32
    %224 = vector.broadcast %cst_102 : f32 to vector<1x1xf32>
    %225 = arith.mulf %223, %224 : vector<1x1xf32>
    %226 = vector.extract_strided_slice %189 {offsets = [0, 256], sizes = [1, 256], strides = [1, 1]} : vector<1x1024xf32> to vector<1x256xf32>
    %cst_103 = arith.constant dense<0.000000e+00> : vector<1xf32>
    %227 = vector.multi_reduction <add>, %226, %cst_103 [1] : vector<1x256xf32> to vector<1xf32>
    %228 = vector.shape_cast %227 : vector<1xf32> to vector<1x1xf32>
    %cst_104 = arith.constant 4.8828125E-4 : f32
    %229 = vector.broadcast %cst_104 : f32 to vector<1x1xf32>
    %230 = arith.mulf %228, %229 : vector<1x1xf32>
    %231 = arith.mulf %225, %225 : vector<1x1xf32>
    %232 = arith.subf %230, %231 : vector<1x1xf32>
    %cst_105 = arith.constant 0.000000e+00 : f32
    %233 = vector.broadcast %cst_105 : f32 to vector<1x1xf32>
    %234 = arith.maximumf %232, %233 : vector<1x1xf32>
    %cst_106 = arith.constant 1.000000e-03 : f32
    %235 = vector.broadcast %cst_106 : f32 to vector<1x1xf32>
    %236 = arith.addf %234, %235 : vector<1x1xf32>
    %237 = math.rsqrt %236 : vector<1x1xf32>
    %c0_107 = arith.constant 0 : index
    %c256 = arith.constant 256 : index
    %238 = vector.load %arg7[%c0_107, %c256] : memref<3x1024xf32, #tpu.memory_space<vmem>>, vector<1x256xf32>
    %c1_108 = arith.constant 1 : index
    %c256_109 = arith.constant 256 : index
    %239 = vector.load %arg7[%c1_108, %c256_109] : memref<3x1024xf32, #tpu.memory_space<vmem>>, vector<1x256xf32>
    %240 = vector.extract_strided_slice %184 {offsets = [0, 256], sizes = [8, 256], strides = [1, 1]} : vector<8x1024xf32> to vector<8x256xf32>
    %241 = vector.broadcast %225 : vector<1x1xf32> to vector<8x256xf32>
    %242 = arith.subf %240, %241 : vector<8x256xf32>
    %243 = vector.broadcast %237 : vector<1x1xf32> to vector<8x256xf32>
    %244 = arith.mulf %242, %243 : vector<8x256xf32>
    %245 = vector.broadcast %238 : vector<1x256xf32> to vector<8x256xf32>
    %246 = arith.mulf %245, %244 : vector<8x256xf32>
    %247 = vector.broadcast %239 : vector<1x256xf32> to vector<8x256xf32>
    %248 = arith.addf %246, %247 : vector<8x256xf32>
    %cst_110 = arith.constant 0.000000e+00 : f32
    %249 = vector.broadcast %cst_110 : f32 to vector<8x256xf32>
    %250 = arith.maximumf %248, %249 : vector<8x256xf32>
    %251 = arith.truncf %250 : vector<8x256xf32> to vector<8x256xbf16>
    %252 = vector.extract_strided_slice %186 {offsets = [0, 512], sizes = [1, 256], strides = [1, 1]} : vector<1x1024xf32> to vector<1x256xf32>
    %cst_111 = arith.constant dense<0.000000e+00> : vector<1xf32>
    %253 = vector.multi_reduction <add>, %252, %cst_111 [1] : vector<1x256xf32> to vector<1xf32>
    %254 = vector.shape_cast %253 : vector<1xf32> to vector<1x1xf32>
    %cst_112 = arith.constant 4.8828125E-4 : f32
    %255 = vector.broadcast %cst_112 : f32 to vector<1x1xf32>
    %256 = arith.mulf %254, %255 : vector<1x1xf32>
    %257 = vector.extract_strided_slice %189 {offsets = [0, 512], sizes = [1, 256], strides = [1, 1]} : vector<1x1024xf32> to vector<1x256xf32>
    %cst_113 = arith.constant dense<0.000000e+00> : vector<1xf32>
    %258 = vector.multi_reduction <add>, %257, %cst_113 [1] : vector<1x256xf32> to vector<1xf32>
    %259 = vector.shape_cast %258 : vector<1xf32> to vector<1x1xf32>
    %cst_114 = arith.constant 4.8828125E-4 : f32
    %260 = vector.broadcast %cst_114 : f32 to vector<1x1xf32>
    %261 = arith.mulf %259, %260 : vector<1x1xf32>
    %262 = arith.mulf %256, %256 : vector<1x1xf32>
    %263 = arith.subf %261, %262 : vector<1x1xf32>
    %cst_115 = arith.constant 0.000000e+00 : f32
    %264 = vector.broadcast %cst_115 : f32 to vector<1x1xf32>
    %265 = arith.maximumf %263, %264 : vector<1x1xf32>
    %cst_116 = arith.constant 1.000000e-03 : f32
    %266 = vector.broadcast %cst_116 : f32 to vector<1x1xf32>
    %267 = arith.addf %265, %266 : vector<1x1xf32>
    %268 = math.rsqrt %267 : vector<1x1xf32>
    %c0_117 = arith.constant 0 : index
    %c512 = arith.constant 512 : index
    %269 = vector.load %arg7[%c0_117, %c512] : memref<3x1024xf32, #tpu.memory_space<vmem>>, vector<1x256xf32>
    %c1_118 = arith.constant 1 : index
    %c512_119 = arith.constant 512 : index
    %270 = vector.load %arg7[%c1_118, %c512_119] : memref<3x1024xf32, #tpu.memory_space<vmem>>, vector<1x256xf32>
    %271 = vector.extract_strided_slice %184 {offsets = [0, 512], sizes = [8, 256], strides = [1, 1]} : vector<8x1024xf32> to vector<8x256xf32>
    %272 = vector.broadcast %256 : vector<1x1xf32> to vector<8x256xf32>
    %273 = arith.subf %271, %272 : vector<8x256xf32>
    %274 = vector.broadcast %268 : vector<1x1xf32> to vector<8x256xf32>
    %275 = arith.mulf %273, %274 : vector<8x256xf32>
    %276 = vector.broadcast %269 : vector<1x256xf32> to vector<8x256xf32>
    %277 = arith.mulf %276, %275 : vector<8x256xf32>
    %278 = vector.broadcast %270 : vector<1x256xf32> to vector<8x256xf32>
    %279 = arith.addf %277, %278 : vector<8x256xf32>
    %cst_120 = arith.constant 0.000000e+00 : f32
    %280 = vector.broadcast %cst_120 : f32 to vector<8x256xf32>
    %281 = arith.maximumf %279, %280 : vector<8x256xf32>
    %282 = arith.truncf %281 : vector<8x256xf32> to vector<8x256xbf16>
    %283 = vector.extract_strided_slice %186 {offsets = [0, 768], sizes = [1, 256], strides = [1, 1]} : vector<1x1024xf32> to vector<1x256xf32>
    %cst_121 = arith.constant dense<0.000000e+00> : vector<1xf32>
    %284 = vector.multi_reduction <add>, %283, %cst_121 [1] : vector<1x256xf32> to vector<1xf32>
    %285 = vector.shape_cast %284 : vector<1xf32> to vector<1x1xf32>
    %cst_122 = arith.constant 4.8828125E-4 : f32
    %286 = vector.broadcast %cst_122 : f32 to vector<1x1xf32>
    %287 = arith.mulf %285, %286 : vector<1x1xf32>
    %288 = vector.extract_strided_slice %189 {offsets = [0, 768], sizes = [1, 256], strides = [1, 1]} : vector<1x1024xf32> to vector<1x256xf32>
    %cst_123 = arith.constant dense<0.000000e+00> : vector<1xf32>
    %289 = vector.multi_reduction <add>, %288, %cst_123 [1] : vector<1x256xf32> to vector<1xf32>
    %290 = vector.shape_cast %289 : vector<1xf32> to vector<1x1xf32>
    %cst_124 = arith.constant 4.8828125E-4 : f32
    %291 = vector.broadcast %cst_124 : f32 to vector<1x1xf32>
    %292 = arith.mulf %290, %291 : vector<1x1xf32>
    %293 = arith.mulf %287, %287 : vector<1x1xf32>
    %294 = arith.subf %292, %293 : vector<1x1xf32>
    %cst_125 = arith.constant 0.000000e+00 : f32
    %295 = vector.broadcast %cst_125 : f32 to vector<1x1xf32>
    %296 = arith.maximumf %294, %295 : vector<1x1xf32>
    %cst_126 = arith.constant 1.000000e-03 : f32
    %297 = vector.broadcast %cst_126 : f32 to vector<1x1xf32>
    %298 = arith.addf %296, %297 : vector<1x1xf32>
    %299 = math.rsqrt %298 : vector<1x1xf32>
    %c0_127 = arith.constant 0 : index
    %c768 = arith.constant 768 : index
    %300 = vector.load %arg7[%c0_127, %c768] : memref<3x1024xf32, #tpu.memory_space<vmem>>, vector<1x256xf32>
    %c1_128 = arith.constant 1 : index
    %c768_129 = arith.constant 768 : index
    %301 = vector.load %arg7[%c1_128, %c768_129] : memref<3x1024xf32, #tpu.memory_space<vmem>>, vector<1x256xf32>
    %302 = vector.extract_strided_slice %184 {offsets = [0, 768], sizes = [8, 256], strides = [1, 1]} : vector<8x1024xf32> to vector<8x256xf32>
    %303 = vector.broadcast %287 : vector<1x1xf32> to vector<8x256xf32>
    %304 = arith.subf %302, %303 : vector<8x256xf32>
    %305 = vector.broadcast %299 : vector<1x1xf32> to vector<8x256xf32>
    %306 = arith.mulf %304, %305 : vector<8x256xf32>
    %307 = vector.broadcast %300 : vector<1x256xf32> to vector<8x256xf32>
    %308 = arith.mulf %307, %306 : vector<8x256xf32>
    %309 = vector.broadcast %301 : vector<1x256xf32> to vector<8x256xf32>
    %310 = arith.addf %308, %309 : vector<8x256xf32>
    %cst_130 = arith.constant 0.000000e+00 : f32
    %311 = vector.broadcast %cst_130 : f32 to vector<8x256xf32>
    %312 = arith.maximumf %310, %311 : vector<8x256xf32>
    %313 = arith.truncf %312 : vector<8x256xf32> to vector<8x256xbf16>
    %314 = tpu.concatenate %220, %251, %282, %313 in 1 : vector<8x256xbf16>, vector<8x256xbf16>, vector<8x256xbf16>, vector<8x256xbf16> -> vector<8x1024xbf16>
    %c1_i32_131 = arith.constant 1 : i32
    %315 = tpu.memref_slice %arg13[%c1_i32_131] : memref<2x!tpu.dma_semaphore, #tpu.memory_space<semaphore_mem>> -> memref<1x!tpu.dma_semaphore, #tpu.memory_space<semaphore_mem>>
    %316 = tpu.memref_squeeze %315 : memref<1x!tpu.dma_semaphore, #tpu.memory_space<semaphore_mem>> -> memref<!tpu.dma_semaphore, #tpu.memory_space<semaphore_mem>>
    tpu.wait_dma2 semaphore(%316 : memref<!tpu.dma_semaphore, #tpu.memory_space<semaphore_mem>>) src(%arg9 : memref<1024x1024xbf16, #tpu.memory_space<any>>) dst(%arg12 : memref<1024x1024xbf16, #tpu.memory_space<vmem>>)
    %c0_132 = arith.constant 0 : index
    %c0_133 = arith.constant 0 : index
    %317 = vector.load %arg12[%c0_132, %c0_133] : memref<1024x1024xbf16, #tpu.memory_space<vmem>>, vector<1024x1024xbf16>
    %cst_134 = arith.constant dense<0.000000e+00> : vector<8x1024xf32>
    %318 = tpu.matmul %314, %317, %cst_134 {dimension_numbers = #tpu.dot_dimension_numbers<[1], [0], [0], [1], [0, 0, 1, 1], [], []>} : vector<8x1024xbf16>, vector<1024x1024xbf16>, vector<8x1024xf32> -> vector<8x1024xf32>
    %c2_135 = arith.constant 2 : index
    %c0_136 = arith.constant 0 : index
    %319 = vector.load %arg7[%c2_135, %c0_136] : memref<3x1024xf32, #tpu.memory_space<vmem>>, vector<1x1024xf32>
    %320 = vector.broadcast %319 : vector<1x1024xf32> to vector<8x1024xf32>
    %321 = arith.addf %318, %320 : vector<8x1024xf32>
    %322 = arith.negf %321 : vector<8x1024xf32>
    %323 = math.exp %322 : vector<8x1024xf32>
    %cst_137 = arith.constant 1.000000e+00 : f32
    %324 = vector.broadcast %cst_137 : f32 to vector<8x1024xf32>
    %325 = arith.addf %324, %323 : vector<8x1024xf32>
    %326 = arith.divf %324, %325 : vector<8x1024xf32>
    %c0_138 = arith.constant 0 : index
    %c0_139 = arith.constant 0 : index
    %327 = vector.load %arg10[%c0_138, %c0_139] : memref<8x1024xf32, #tpu.memory_space<vmem>>, vector<8x1024xf32>
    tpu.vector_store %arg10[%c0_138, %c0_139], %326 {strides = array<i32>} : memref<8x1024xf32, #tpu.memory_space<vmem>>, vector<8x1024xf32>,
    return
  }
}

</mosaic_0001>

<bundles_post_ra>
// kernel: tpu_custom_call.1
= control target key start
LH: loop header
LB: loop body
LE: loop exit
PB: predicated region body
PF: predicated region fallthrough
CT: control target
= control target key end

     0   :  { %15 = vsyncpa [#allocation6], 0  ;;  %s4025_s0 = inlined_call_operand.hbm [shape: f32[8,6], index: 0, kind: input, shape index: {}]   ;;  %s4026_s1 = inlined_call_operand.hbm [shape: f32[6,96], index: 1, kind: input, shape index: {}]   ;;  %s4027_s2 = inlined_call_operand.hbm [shape: f32[2,96], index: 2, kind: input, shape index: {}]   ;;  %s4028_s3 = inlined_call_operand.hbm [shape: f32[6,32,32], index: 3, kind: input, shape index: {}]   ;;  %s4029_s4 = inlined_call_operand.hbm [shape: f32[8,32], index: 4, kind: input, shape index: {}]   ;;  %s4030_s5 = inlined_call_operand.hbm [shape: f32[64,256], index: 5, kind: input, shape index: {}]   ;;  %s4031_s6 = inlined_call_operand.hbm [shape: f32[2,256], index: 6, kind: input, shape index: {}]   ;;  %s4032_s7 = inlined_call_operand.hbm [shape: f32[3,1024], index: 7, kind: input, shape index: {}]   ;;  %s4033_s8 = inlined_call_operand.hbm [shape: bf16[256,1024], index: 8, kind: input, shape index: {}]   ;;  %s4034_s9 = inlined_call_operand.hbm [shape: bf16[1024,1024], index: 9, kind: input, shape index: {}]   ;;  %s4035_s10 = inlined_call_operand.hbm [shape: f32[8,1024], index: 10, kind: output, shape index: {}]  }
   0x1   :  { %16 = vsyncpa [#allocation9], 0 }
   0x2   :  { %17 = vsyncpa [#allocation12], 0 }
   0x3   :  { %18 = vsyncpa [#allocation15], 0 }
   0x4   :  { %19 = vsyncpa [#allocation18], 0 }
   0x5   :  { %20 = vsyncpa [#allocation7], 0  ;;  %s3598_s13 = smov [#allocation8]   ;;  %s3599_s15 = smov [#allocation11]  }
   0x6   :  { %s37_s14 = sshll.u32 %s3598_s13, 4  ;;  %s56_s16 = sshll.u32 %s3599_s15, 4  ;;  %s38_s14 = int_to_ptr.vmem [resolvable:$true] %s37_s14  ;;  %s3681_s16 = int_to_ptr.vmem [resolvable:$true] %s56_s16 }
   0x7   :  { %s3384_s19 = scalar_lea.hbm %s4026_s1, 128 }
   0x8   :  { %p3385_p0 = scmp.ne.s32.totalorder %s4026_s1, %s3384_s19  ;;  %p3388_p1 = scmp.lt.u32.totalorder %s3384_s19, %s4026_s1 }
   0xa   :  { %p3390_p2 = pnand %p3388_p1, %p3385_p0 }
   0xc   :  { %3393 = shalt.err (!%p3390_p2)
}
   0xd   :  { %s3394_s24 = scalar_lea.vmem %s38_s14, 128  ;;  %p3399_p4 = scmp.lt.s32.totalorder %s38_s14, %s38_s14 }
   0xe   :  { %p3395_p3 = scmp.ne.s32.totalorder %s38_s14, %s3394_s24  ;;  %p3400_p5 = scmp.lt.s32.totalorder %s3394_s24, %s3394_s24 }
  0x10   :  { %p3401_p6 = por %p3400_p5, %p3399_p4 }
  0x12   :  { %p3402_p7 = pnand %p3401_p6, %p3395_p3 }
  0x14   :  { %3405 = shalt.err (!%p3402_p7)
}
  0x15   :  { %40 = dma.hbm_to_vmem [thread:$0]  %s4026_s1, 128, %s38_s14, [#allocation9]  }
  0x16   :  { %s3406_s29 = scalar_lea.hbm %s4028_s3, 3072 }
  0x17   :  { %p3407_p8 = scmp.ne.s32.totalorder %s4028_s3, %s3406_s29  ;;  %p3410_p9 = scmp.lt.u32.totalorder %s3406_s29, %s4028_s3 }
  0x19   :  { %p3412_p10 = pnand %p3410_p9, %p3407_p8 }
  0x1b   :  { %3415 = shalt.err (!%p3412_p10)
}
  0x1c   :  { %s3416_s15 = scalar_lea.vmem %s3681_s16, 3072  ;;  %p3421_p12 = scmp.lt.s32.totalorder %s3681_s16, %s3681_s16 }
  0x1d   :  { %p3417_p11 = scmp.ne.s32.totalorder %s3681_s16, %s3416_s15  ;;  %p3422_p13 = scmp.lt.s32.totalorder %s3416_s15, %s3416_s15 }
  0x1f   :  { %p3423_p0 = por %p3422_p13, %p3421_p12 }
  0x21   :  { %p3424_p1 = pnand %p3423_p0, %p3417_p11 }
  0x23   :  { %3427 = shalt.err (!%p3424_p1)
}
  0x24   :  { %s3600_s1 = smov 128   ;;  %s3601_s14 = smov 8  }
  0x25   :  { %62 = dma.hbm_to_vmem [thread:$0]  %s4028_s3, 3072, %s3681_s16, [#allocation12], %s3600_s1, %s3600_s1, %s3601_s14  }
  0x26   :  { %s3602_s19 = smov [#allocation14]   ;;  %s3428_s23 = scalar_lea.hbm %s4030_s5, 2048 }
  0x27   :  { %s78_s20 = sshll.u32 %s3602_s19, 4  ;;  %p3429_p2 = scmp.ne.s32.totalorder %s4030_s5, %s3428_s23  ;;  %s79_s20 = int_to_ptr.vmem [resolvable:$true] %s78_s20 }
  0x28   :  { %p3432_p3 = scmp.lt.u32.totalorder %s3428_s23, %s4030_s5 }
  0x2a   :  { %p3434_p4 = pnand %p3432_p3, %p3429_p2 }
  0x2c   :  { %3437 = shalt.err (!%p3434_p4)
}
  0x2d   :  { %s3438_s28 = scalar_lea.vmem %s79_s20, 2048  ;;  %p3443_p6 = scmp.lt.s32.totalorder %s79_s20, %s79_s20 }
  0x2e   :  { %p3439_p5 = scmp.ne.s32.totalorder %s79_s20, %s3438_s28  ;;  %p3444_p7 = scmp.lt.s32.totalorder %s3438_s28, %s3438_s28 }
  0x30   :  { %p3445_p8 = por %p3444_p7, %p3443_p6 }
  0x32   :  { %p3446_p9 = pnand %p3445_p8, %p3439_p5 }
  0x34   :  { %3449 = shalt.err (!%p3446_p9)
}
  0x35   :  { %s3603_s3 = smov 256   ;;  %s3604_s16 = smov 16  }
  0x36   :  { %84 = dma.hbm_to_vmem [thread:$0]  %s4030_s5, 2048, %s79_s20, [#allocation15], %s3603_s3, %s3603_s3, %s3604_s16  }
  0x37   :  { %s3605_s11 = smov [#allocation5]   ;;  %s3606_s13 = smov [#allocation10]  }
  0x38   :  { %s27_s12 = sshll.u32 %s3605_s11, 4  ;;  %s47_s15 = sshll.u32 %s3606_s13, 4  ;;  %s28_s12 = int_to_ptr.vmem [resolvable:$true] %s27_s12  ;;  %s48_s15 = int_to_ptr.vmem [resolvable:$true] %s47_s15 }
  0x39   :  { %s3450_s19 = scalar_lea.hbm %s4025_s0, 128 }
  0x3a   :  { %p3451_p10 = scmp.ne.s32.totalorder %s4025_s0, %s3450_s19  ;;  %p3454_p11 = scmp.lt.u32.totalorder %s3450_s19, %s4025_s0 }
  0x3c   :  { %p3456_p12 = pnand %p3454_p11, %p3451_p10 }
  0x3e   :  { %3459 = shalt.err (!%p3456_p12)
}
  0x3f   :  { %s3460_s5 = scalar_lea.vmem %s28_s12, 128  ;;  %p3465_p0 = scmp.lt.s32.totalorder %s28_s12, %s28_s12 }
  0x40   :  { %p3461_p13 = scmp.ne.s32.totalorder %s28_s12, %s3460_s5  ;;  %p3466_p1 = scmp.lt.s32.totalorder %s3460_s5, %s3460_s5 }
  0x42   :  { %p3467_p2 = por %p3466_p1, %p3465_p0 }
  0x44   :  { %p3468_p3 = pnand %p3467_p2, %p3461_p13 }
  0x46   :  { %3471 = shalt.err (!%p3468_p3)
}
  0x47   :  { %30 = dma.hbm_to_vmem [thread:$0]  %s4025_s0, 128, %s28_s12, [#allocation6]  }
  0x48   :  { %s3472_s28 = scalar_lea.hbm %s4027_s2, 32 }
  0x49   :  { %p3473_p4 = scmp.ne.s32.totalorder %s4027_s2, %s3472_s28  ;;  %p3476_p5 = scmp.lt.u32.totalorder %s3472_s28, %s4027_s2 }
  0x4b   :  { %p3478_p6 = pnand %p3476_p5, %p3473_p4 }
  0x4d   :  { %3481 = shalt.err (!%p3478_p6)
}
  0x4e   :  { %s3482_s11 = scalar_lea.vmem %s48_s15, 32  ;;  %p3487_p8 = scmp.lt.s32.totalorder %s48_s15, %s48_s15 }
  0x4f   :  { %p3483_p7 = scmp.ne.s32.totalorder %s48_s15, %s3482_s11  ;;  %p3488_p9 = scmp.lt.s32.totalorder %s3482_s11, %s3482_s11 }
  0x51   :  { %p3489_p10 = por %p3488_p9, %p3487_p8 }
  0x53   :  { %p3490_p11 = pnand %p3489_p10, %p3483_p7 }
  0x55   :  { %3493 = shalt.err (!%p3490_p11)
}
  0x56   :  { %50 = dma.hbm_to_vmem [thread:$0]  %s4027_s2, 32, %s48_s15, [#allocation9]  }
  0x57   :  { %s3607_s13 = smov [#allocation13]   ;;  %s3608_s18 = smov [#allocation16]  }
  0x58   :  { %s69_s17 = sshll.u32 %s3607_s13, 4  ;;  %s91_s19 = sshll.u32 %s3608_s18, 4  ;;  %s70_s17 = int_to_ptr.vmem [resolvable:$true] %s69_s17  ;;  %s92_s19 = int_to_ptr.vmem [resolvable:$true] %s91_s19 }
  0x59   :  { %s3494_s23 = scalar_lea.hbm %s4029_s4, 128 }
  0x5a   :  { %p3495_p12 = scmp.ne.s32.totalorder %s4029_s4, %s3494_s23  ;;  %p3498_p13 = scmp.lt.u32.totalorder %s3494_s23, %s4029_s4 }
  0x5c   :  { %p3500_p0 = pnand %p3498_p13, %p3495_p12 }
  0x5e   :  { %3503 = shalt.err (!%p3500_p0)
}
  0x5f   :  { %s3504_s2 = scalar_lea.vmem %s70_s17, 128  ;;  %p3509_p2 = scmp.lt.s32.totalorder %s70_s17, %s70_s17 }
  0x60   :  { %p3505_p1 = scmp.ne.s32.totalorder %s70_s17, %s3504_s2  ;;  %p3510_p3 = scmp.lt.s32.totalorder %s3504_s2, %s3504_s2 }
  0x62   :  { %p3511_p4 = por %p3510_p3, %p3509_p2 }
  0x64   :  { %p3512_p5 = pnand %p3511_p4, %p3505_p1 }
  0x66   :  { %3515 = shalt.err (!%p3512_p5)
}
  0x67   :  { %72 = dma.hbm_to_vmem [thread:$0]  %s4029_s4, 128, %s70_s17, [#allocation12]  }
  0x68   :  { %s3516_s3 = scalar_lea.hbm %s4031_s6, 64 }
  0x69   :  { %p3517_p6 = scmp.ne.s32.totalorder %s4031_s6, %s3516_s3  ;;  %p3520_p7 = scmp.lt.u32.totalorder %s3516_s3, %s4031_s6 }
  0x6b   :  { %p3522_p8 = pnand %p3520_p7, %p3517_p6 }
  0x6d   :  { %3525 = shalt.err (!%p3522_p8)
}
  0x6e   :  { %s3526_s0 = scalar_lea.vmem %s92_s19, 64  ;;  %p3531_p10 = scmp.lt.s32.totalorder %s92_s19, %s92_s19 }
  0x6f   :  { %p3527_p9 = scmp.ne.s32.totalorder %s92_s19, %s3526_s0  ;;  %p3532_p11 = scmp.lt.s32.totalorder %s3526_s0, %s3526_s0 }
  0x71   :  { %p3533_p12 = por %p3532_p11, %p3531_p10 }
  0x73   :  { %p3534_p13 = pnand %p3533_p12, %p3527_p9 }
  0x75   :  { %3537 = shalt.err (!%p3534_p13)
}
  0x76   :  { %94 = dma.hbm_to_vmem [thread:$0]  %s4031_s6, 64, %s92_s19, [#allocation15]  }
  0x77   :  { %s3609_s13 = smov [#allocation17]   ;;  %s3538_s22 = scalar_lea.hbm %s4032_s7, 512 }
  0x78   :  { %s101_s17 = sshll.u32 %s3609_s13, 4  ;;  %p3539_p0 = scmp.ne.s32.totalorder %s4032_s7, %s3538_s22  ;;  %s102_s17 = int_to_ptr.vmem [resolvable:$true] %s101_s17 }
  0x79   :  { %p3542_p1 = scmp.lt.u32.totalorder %s3538_s22, %s4032_s7 }
  0x7b   :  { %p3544_p2 = pnand %p3542_p1, %p3539_p0 }
  0x7d   :  { %3547 = shalt.err (!%p3544_p2)
}
  0x7e   :  { %s3548_s25 = scalar_lea.vmem %s102_s17, 512  ;;  %p3553_p4 = scmp.lt.s32.totalorder %s102_s17, %s102_s17 }
  0x7f   :  { %p3549_p3 = scmp.ne.s32.totalorder %s102_s17, %s3548_s25  ;;  %p3554_p5 = scmp.lt.s32.totalorder %s3548_s25, %s3548_s25 }
  0x81   :  { %p3555_p6 = por %p3554_p5, %p3553_p4 }
  0x83   :  { %p3556_p7 = pnand %p3555_p6, %p3549_p3 }
  0x85   :  { %3559 = shalt.err (!%p3556_p7)
}
  0x86   :  { %104 = dma.hbm_to_vmem [thread:$0]  %s4032_s7, 512, %s102_s17, [#allocation18]  }
  0x87   :  { %3582 = dma.done.wait [#allocation6], 128  }
  0x88   :  { %3583 = vsyncadd [#allocation6], 4294967168 }
  0x89   :  { %3584 = dma.done.wait [#allocation9], 160  }
  0x8a   :  { %3585 = vsyncadd [#allocation9], 4294967136 }
  0x8b   :  { %3586 = dma.done.wait [#allocation12], 3200  }
  0x8c   :  { %3587 = vsyncadd [#allocation12], 4294964096 }
  0x8d   :  { %3588 = dma.done.wait [#allocation15], 2112  }
  0x8e   :  { %3589 = vsyncadd [#allocation15], 4294965184 }
  0x8f   :  { %3590 = dma.done.wait [#allocation18], 512  }
  0x90   :  { %3591 = vsyncadd [#allocation18], 4294966784  ;;  %s133_s2 = sld [smem:[#allocation0]]   ;;  %149 = sst [smem:[#allocation21 + $0x2]] %s3601_s14  ;;  %v3610_v0 = vmov 0.0   ;;  %vm3613_vm0 = vmmov 0  }
  0x91   :  { %3121 = vmatprep.subr.mxu0 %v3610_v0  ;;  %s3611_s15 = smov 64   ;;  %s3612_s7 = smov [#allocation2]   ;;  %3123 = vmatprep.mubr.msk.f32.mxu0 %vm3613_vm0, %v3610_v0  ;;  %vm205_vm1 = vcmask 1045504   ;;  %vm201_vm2 = vcmask 48128   ;;  %v3623_v6 = vmov 0.0|0.0   ;;  %vm281_vm3 = vcmask 785408  }
  0x92   :  { %151 = sst [smem:[#allocation21 + $0x3]] %s3611_s15  ;;  %s141_s26 = sshll.u32 %s3612_s7, 4  ;;  %3156 = vmatprep.mubr.msk.f32.mxu1 %vm3613_vm0, %v3610_v0  ;;  %3204 = vmatprep.subr.bf16.mxu1 %v3623_v6  ;;  %vm321_vm4 = vcmask 261120   ;;  %s142_s26 = int_to_ptr.vmem [resolvable:$true] %s141_s26 }
  0x93   :  { %153 = sst [smem:[#allocation21 + $0x4]] %s3600_s1  ;;  %s3614_s27 = smov 1024  }
  0x94   :  { %159 = sst [smem:[#allocation21 + $0x7]] %s3611_s15  ;;  %s3615_s3 = smov 2  }
  0x95   :  { %145 = sst [smem:[#allocation21]] %s3614_s27  ;;  %s3616_s29 = smov 512  }
  0x96   :  { %147 = sst [smem:[#allocation21 + $0x1]] %s3614_s27  ;;  %s3055_s28 = sshll.u32 %s133_s2, 26 }
  0x97   :  { %155 = sst [smem:[#allocation21 + $0x5]] %s3615_s3  ;;  %s3056_s16 = sadd.s32 134217728, %s3055_s28 }
  0x98   :  { %157 = sst [smem:[#allocation21 + $0x6]] %s3616_s29  ;;  %s3617_s30 = smov 4  }
  0x99   :  { %161 = sst [smem:[#allocation21 + $0x8]] %s3617_s30  ;;  %s3618_s11 = smov [#allocation4]  }
  0x9a   :  { %s3619_s0 = smov [#allocation20]   ;;  %s3620_s13 = smov [#allocation3]  }
  0x9b   :  { %163 = dma.general %s4033_s8, 16384, %s142_s26, %s3618_s11, %s3619_s0, [#allocation21], %s3056_s16, 0  }
  0x9c   :  { %180 = sst [smem:[#allocation23]] %s3614_s27  ;;  %s176_s17 = sshll.u32 %s3620_s13, 4  ;;  %s177_s17 = int_to_ptr.vmem [resolvable:$true] %s176_s17 }
  0x9d   :  { %182 = sst [smem:[#allocation23 + $0x1]] %s3614_s27  ;;  %s3621_s18 = smov [#allocation4 + $0x1]  }
  0x9e   :  { %184 = sst [smem:[#allocation23 + $0x2]] %s3601_s14  ;;  %s3622_s21 = smov [#allocation22]  }
  0x9f   :  { %186 = sst [smem:[#allocation23 + $0x3]] %s3611_s15 }
  0xa0   :  { %188 = sst [smem:[#allocation23 + $0x4]] %s3600_s1 }
  0xa1   :  { %190 = sst [smem:[#allocation23 + $0x5]] %s3615_s3 }
  0xa2   :  { %192 = sst [smem:[#allocation23 + $0x6]] %s3616_s29 }
  0xa3   :  { %194 = sst [smem:[#allocation23 + $0x7]] %s3611_s15 }
  0xa4   :  { %196 = sst [smem:[#allocation23 + $0x8]] %s3617_s30 }
  0xa5   :  { %198 = dma.general %s4034_s9, 65536, %s177_s17, %s3621_s18, %s3622_s21, [#allocation23], %s3056_s16, 0  }
  0xa6   :  { %v200_v1 = vld [vmem:[#allocation8] sm:$0x3f]  ;;  %v199_v2 = vld [vmem:[#allocation5] sm:$0xff]  ;;  %v317_v3 = vld [vmem:[#allocation11] sm:$0xff]  ;;  %s3624_s9 = smov 96  }
  0xa7   :  { %3122 = vmatpush3.msk.msra.mxu0 %vm205_vm1, %v200_v1  ;;  %v318_v4 = vld [vmem:[#allocation11 + $0x8] sm:$0xff]  ;;  %v319_v5 = vld [vmem:[#allocation11 + $0x10] sm:$0xff]  ;;  %v320_v8 = vld [vmem:[#allocation11 + $0x18] sm:$0xff] }
  0xa8   :  { %3124 = vmatmul.mubr.msk.f32.vlgmr.msra.gmra.mrb[0].mxu0 %vm201_vm2, %v199_v2  ;;  %3192 = vmatprep.subr.bf16.mxu0 %v3623_v6  ;;  %v3193_v7 = vpack.c.bf16 %v318_v4, %v317_v3  ;;  %v3196_v9 = vpack.c.bf16 %v320_v8, %v319_v5  ;;  %v521_v10 = vld [vmem:[#allocation11 + $0x60] sm:$0xff]  ;;  %v522_v11 = vld [vmem:[#allocation11 + $0x68] sm:$0xff]  ;;  %v523_v12 = vld [vmem:[#allocation11 + $0x70] sm:$0xff] }
  0xa9   :  { %3134 = vmatprep.mubr.msk.f32.mxu0 %vm3613_vm0, %v3610_v0  ;;  %v3205_v13 = vpack.c.bf16 %v522_v11, %v521_v10  ;;  %v524_v14 = vld [vmem:[#allocation11 + $0x78] sm:$0xff]  ;;  %v433_v48 = vld [vmem:[#allocation11 + $0x20] sm:$0xff]  ;;  %v434_v49 = vld [vmem:[#allocation11 + $0x28] sm:$0xff] }
  0xaa   :  { %3194 = vmatpush3.bf16.msra.mxu0 %v3193_v7  ;;  %v3208_v15 = vpack.c.bf16 %v524_v14, %v523_v12  ;;  %v3061_v40 = vld [vmem:[#allocation10] ss:$0 sm:$0xff]  ;;  %v3062_v43 = vld [vmem:[#allocation10 + $0x1] ss:$0 sm:$0xff]  ;;  %v3199_v50 = vpack.c.bf16 %v434_v49, %v433_v48  ;;  %v435_v51 = vld [vmem:[#allocation11 + $0x30] sm:$0xff] }
  0xab   :  { %3195 = vmatprep.subr.bf16.mxu0 %v3623_v6  ;;  %3206 = vmatpush3.bf16.msra.mxu1 %v3205_v13  ;;  %v436_v52 = vld [vmem:[#allocation11 + $0x38] sm:$0xff]  ;;  %v516_v54 = vld [vmem:[#allocation11 + $0x40] sm:$0xff]  ;;  %v517_v55 = vld [vmem:[#allocation11 + $0x48] sm:$0xff] }
  0xac   :  { %3207 = vmatprep.subr.bf16.mxu1 %v3623_v6  ;;  %v3202_v53 = vpack.c.bf16 %v436_v52, %v435_v51  ;;  %v518_v56 = vld [vmem:[#allocation11 + $0x50] sm:$0xff]  ;;  %v3211_v57 = vpack.c.bf16 %v517_v55, %v516_v54  ;;  %v519_v58 = vld [vmem:[#allocation11 + $0x58] sm:$0xff] }
  0xad   :  { %v3214_v59 = vpack.c.bf16 %v519_v58, %v518_v56  ;;  %v712_v49 = vld [vmem:[#allocation11 + $0x90] sm:$0xff] }
  0xae   :  { %3197 = vmatpush3.bf16.msra.mxu0 %v3196_v9 }
  0xaf   :  { %3198 = vmatprep.subr.bf16.mxu0 %v3623_v6  ;;  %3209 = vmatpush3.bf16.msra.mxu1 %v3208_v15 }
  0xb0   :  { %3210 = vmatprep.subr.bf16.mxu1 %v3623_v6 }
 0x17b   :  { %v275_v16 = vpop.f32.mrb[0].mxu0 }
 0x17c   :  { %v282_v17 = vsel %vm281_vm3, %v275_v16, 0.0  ;;  %v290_v18 = vmul.f32 %v275_v16, %v275_v16  ;;  %v3125_v19 = vpop.f32.mrb[1].mxu0 }
 0x17d   :  { %v283_v20 = vrot.slane %v282_v17, 4 }
 0x17e   :  { %v291_v21 = vsel %vm281_vm3, %v290_v18, 0.0 }
 0x17f   :  { %v284_v22 = vadd.f32 %v283_v20, %v282_v17  ;;  %v292_v23 = vrot.slane %v291_v21, 4 }
 0x181   :  { %v285_v24 = vrot.slane %v284_v22, 2  ;;  %v293_v25 = vadd.f32 %v292_v23, %v291_v21 }
 0x183   :  { %v286_v26 = vadd.f32 %v285_v24, %v284_v22  ;;  %v294_v27 = vrot.slane %v293_v25, 2  ;;  %v3064_v22 = vld [vmem:[#allocation13] ss:$0 sm:$0xff] }
 0x185   :  { %v287_v28 = vrot.slane %v286_v26, 1  ;;  %v295_v29 = vadd.f32 %v294_v27, %v293_v25  ;;  %v3065_v25 = vld [vmem:[#allocation13 + $0x1] ss:$0 sm:$0xff] }
 0x187   :  { %v288_v30 = vadd.f32 %v287_v28, %v286_v26  ;;  %v296_v31 = vrot.slane %v295_v29, 1 }
 0x189   :  { %v289_v32 = vmul.f32 0.125, %v288_v30  ;;  %v297_v33 = vadd.f32 %v296_v31, %v295_v29  ;;  %v916_v29 = vld [vmem:[#allocation14 + $0x48] sm:$0xff]  ;;  %v918_v30 = vld [vmem:[#allocation14 + $0x58] sm:$0xff] }
 0x18a   :  { %v3228_v31 = vpack.c.bf16 %v918_v30, %v916_v29  ;;  %v907_v29 = vld [vmem:[#allocation14] sm:$0xff] }
 0x18b   :  { %v298_v34 = vmul.f32 0.125, %v297_v33  ;;  %v299_v35 = vmul.f32 %v289_v32, %v289_v32  ;;  %v302_v39 = vsub.f32 %v275_v16, %v289_v32  ;;  %v915_v32 = vld [vmem:[#allocation14 + $0x40] sm:$0xff]  ;;  %v917_v33 = vld [vmem:[#allocation14 + $0x50] sm:$0xff] }
 0x18d   :  { %v300_v36 = vsub.f32 %v298_v34, %v299_v35  ;;  %v307_v41 = vmul.f32 %v3061_v40, %v302_v39  ;;  %v3066_v34 = vld [vmem:[#allocation13 + $0x2] ss:$0 sm:$0xff]  ;;  %v920_v35 = vld [vmem:[#allocation14 + $0x68] sm:$0xff] }
 0x18f   :  { %v301_v37 = vmax.f32 %v300_v36, 0.0  ;;  %v922_v36 = vld [vmem:[#allocation14 + $0x78] sm:$0xff] }
 0x191   :  { %v308_v38 = vadd.f32 0.001, %v301_v37 }
 0x193   :  { %3332 = vrsqrt.f32 %v308_v38  ;;  %v3230_v38 = vpack.c.bf16 %v917_v33, %v915_v32  ;;  %v912_v32 = vld [vmem:[#allocation14 + $0x28] sm:$0xff]  ;;  %v914_v33 = vld [vmem:[#allocation14 + $0x38] sm:$0xff] }
 0x19d   :  { %v3333_v42 = vpop.eup %3332 }
 0x19e   :  { %v310_v44 = vmul.f32 %v3333_v42, %v307_v41  ;;  %v3232_v41 = vpack.c.bf16 %v922_v36, %v920_v35  ;;  %v919_v42 = vld [vmem:[#allocation14 + $0x60] sm:$0xff]  ;;  %v3240_v35 = vpack.c.bf16 %v914_v33, %v912_v32  ;;  %v913_v36 = vld [vmem:[#allocation14 + $0x30] sm:$0xff] }
 0x1a0   :  { %v315_v45 = vadd.f32 %v3062_v43, %v310_v44  ;;  %v921_v43 = vld [vmem:[#allocation14 + $0x70] sm:$0xff] }
 0x1a1   :  { %v3234_v44 = vpack.c.bf16 %v921_v43, %v919_v42 }
 0x1a2   :  { %v316_v46 = vmax.f32 %v315_v45, 0.0 }
 0x1a4   :  { %525 = vrot.lane.b32.xlu0 %v316_v46, %s3624_s9  ;;  %3135 = vmatmul.mubr.msk.f32.vlgmr.msra.gmra.mrb[2].mxu0 %vm321_vm4, %v316_v46 }
 0x1a5   :  { %3145 = vmatprep.mubr.msk.f32.mxu0 %vm3613_vm0, %v3610_v0  ;;  %3200 = vmatpush3.bf16.msra.mxu0 %v3199_v50  ;;  %v713_v50 = vld [vmem:[#allocation11 + $0x98] sm:$0xff] }
 0x1a6   :  { %3201 = vmatprep.subr.bf16.mxu0 %v3623_v6  ;;  %v3220_v51 = vpack.c.bf16 %v713_v50, %v712_v49 }
 0x1a8   :  { %923 = vrot.lane.b32.xlu0 %v316_v46, %s3611_s15  ;;  %v710_v46 = vld [vmem:[#allocation11 + $0x80] sm:$0xff] }
 0x1a9   :  { %3203 = vmatpush3.bf16.msra.mxu0 %v3202_v53 }
 0x1aa   :  { %3216 = vmatprep.subr.bf16.mxu0 %v3623_v6 }
 0x216   :  { %v526_v47 = vpop.permute.xlu0 %525 }
 0x217   :  { %3157 = vmatmul.mubr.msk.f32.vlgmr.msra.gmra.mrb[0].mxu1 %vm321_vm4, %v526_v47  ;;  %v711_v47 = vld [vmem:[#allocation11 + $0x88] sm:$0xff] }
 0x218   :  { %3167 = vmatprep.mubr.msk.f32.mxu1 %vm3613_vm0, %v3610_v0  ;;  %3212 = vmatpush3.bf16.msra.mxu1 %v3211_v57  ;;  %v3217_v48 = vpack.c.bf16 %v711_v47, %v710_v46 }
 0x219   :  { %3213 = vmatprep.subr.bf16.mxu1 %v3623_v6 }
 0x21a   :  { %v924_v45 = vpop.permute.xlu0 %923 }
 0x21c   :  { %3215 = vmatpush3.bf16.msra.mxu1 %v3214_v59 }
 0x21d   :  { %3229 = vmatprep.subr.bf16.mxu1 %v3228_v31  ;;  %v909_v31 = vld [vmem:[#allocation14 + $0x10] sm:$0xff] }
 0x277   :  { %v391_v60 = vpop.f32.mrb[2].mxu0 }
 0x278   :  { %v397_v61 = vsel %vm321_vm4, %v391_v60, 0.0  ;;  %v405_v62 = vmul.f32 %v391_v60, %v391_v60  ;;  %v3136_v63 = vpop.f32.mrb[3].mxu0 }
 0x279   :  { %v398_v1 = vrot.slane %v397_v61, 4 }
 0x27a   :  { %v406_v2 = vsel %vm321_vm4, %v405_v62, 0.0 }
 0x27b   :  { %v399_v3 = vadd.f32 %v398_v1, %v397_v61  ;;  %v407_v4 = vrot.slane %v406_v2, 4 }
 0x27d   :  { %v400_v5 = vrot.slane %v399_v3, 2  ;;  %v408_v7 = vadd.f32 %v407_v4, %v406_v2 }
 0x27f   :  { %v401_v8 = vadd.f32 %v400_v5, %v399_v3  ;;  %v409_v9 = vrot.slane %v408_v7, 2 }
 0x281   :  { %v402_v10 = vrot.slane %v401_v8, 1  ;;  %v410_v11 = vadd.f32 %v409_v9, %v408_v7 }
 0x283   :  { %v403_v12 = vadd.f32 %v402_v10, %v401_v8  ;;  %v411_v13 = vrot.slane %v410_v11, 1 }
 0x285   :  { %v404_v14 = vmul.f32 0.125, %v403_v12  ;;  %v412_v15 = vadd.f32 %v411_v13, %v410_v11 }
 0x287   :  { %v413_v16 = vmul.f32 0.125, %v412_v15  ;;  %v414_v17 = vmul.f32 %v404_v14, %v404_v14  ;;  %v417_v21 = vsub.f32 %v391_v60, %v404_v14  ;;  %v3070_v14 = vld [vmem:[#allocation13 + $0x3] ss:$0 sm:$0xff] }
 0x289   :  { %v415_v18 = vsub.f32 %v413_v16, %v414_v17  ;;  %v422_v23 = vmul.f32 %v3064_v22, %v417_v21  ;;  %v3071_v17 = vld [vmem:[#allocation13 + $0x4] ss:$0 sm:$0xff]  ;;  %v826_v22 = vld [vmem:[#allocation11 + $0xa8] sm:$0xff] }
 0x28a   :  { %v825_v21 = vld [vmem:[#allocation11 + $0xa0] sm:$0xff] }
 0x28b   :  { %v416_v19 = vmax.f32 %v415_v18, 0.0 }
 0x28d   :  { %v423_v20 = vadd.f32 0.001, %v416_v19 }
 0x28f   :  { %3334 = vrsqrt.f32 %v423_v20 }
 0x299   :  { %v3335_v24 = vpop.eup %3334 }
 0x29a   :  { %v425_v26 = vmul.f32 %v3335_v24, %v422_v23  ;;  %v3223_v23 = vpack.c.bf16 %v826_v22, %v825_v21  ;;  %v827_v24 = vld [vmem:[#allocation11 + $0xb0] sm:$0xff] }
 0x29c   :  { %v430_v27 = vadd.f32 %v3065_v25, %v425_v26  ;;  %v828_v25 = vld [vmem:[#allocation11 + $0xb8] sm:$0xff] }
 0x29d   :  { %v3226_v26 = vpack.c.bf16 %v828_v25, %v827_v24 }
 0x29e   :  { %v431_v28 = vmax.f32 %v430_v27, 0.0  ;;  %v908_v27 = vld [vmem:[#allocation14 + $0x8] sm:$0xff] }
 0x2a0   :  { %3146 = vmatmul.mubr.msk.f32.vlgmr.msra.gmra.mrb[4].mxu0 %vm321_vm4, %v431_v28  ;;  %v910_v28 = vld [vmem:[#allocation14 + $0x18] sm:$0xff] }
 0x2a1   :  { %3178 = vmatprep.mubr.msk.f32.mxu0 %vm3613_vm0, %v3610_v0  ;;  %3218 = vmatpush3.bf16.msra.mxu0 %v3217_v48  ;;  %v3236_v30 = vpack.c.bf16 %v910_v28, %v908_v27 }
 0x2a2   :  { %3219 = vmatprep.subr.bf16.mxu0 %v3623_v6 }
 0x2a5   :  { %3221 = vmatpush3.bf16.msra.mxu0 %v3220_v51 }
 0x2a6   :  { %3222 = vmatprep.subr.bf16.mxu0 %v3623_v6 }
 0x373   :  { %v511_v37 = vpop.f32.mrb[4].mxu0 }
 0x374   :  { %v512_v39 = vadd.f32 %v3066_v34, %v511_v37  ;;  %v3147_v40 = vpop.f32.mrb[5].mxu0  ;;  %v3238_v34 = vpack.c.bf16 %v909_v31, %v907_v29 }
 0x376   :  { %3168 = vmatmul.mubr.msk.f32.vlgmr.msra.gmra.mrb[0].mxu1 %vm321_vm4, %v512_v39 }
 0x377   :  { %3231 = vmatpush1.bf16.msra.mxu1 %v3230_v38  ;;  %991 = vmatprep.mubr.f32.mxu1 %v3610_v0 }
 0x378   :  { %3233 = vmatprep.subr.bf16.mxu1 %v3232_v41 }
 0x37b   :  { %3235 = vmatpush1.bf16.msra.mxu1 %v3234_v44 }
 0x37c   :  { %3237 = vmatprep.subr.bf16.mxu1 %v3236_v30 }
 0x37e   :  { %3077 = vmatmul.mubr.msk.f32.vlgmr.msra.gmra.mrb[2].mxu1 %vm321_vm4, %v924_v45 }
 0x37f   :  { %1065 = vmatprep.mubr.f32.mxu1 %v3610_v0  ;;  %3239 = vmatpush1.bf16.msra.mxu1 %v3238_v34 }
 0x380   :  { %3241 = vmatprep.subr.bf16.mxu1 %v3240_v35 }
 0x449   :  { %v668_v52 = vpop.f32.mrb[0].mxu1 }
 0x44a   :  { %v674_v53 = vsel %vm321_vm4, %v668_v52, 0.0  ;;  %v682_v54 = vmul.f32 %v668_v52, %v668_v52  ;;  %v3169_v55 = vpop.f32.mrb[1].mxu1 }
 0x44b   :  { %v675_v56 = vrot.slane %v674_v53, 4 }
 0x44c   :  { %v683_v57 = vsel %vm321_vm4, %v682_v54, 0.0 }
 0x44d   :  { %v676_v58 = vadd.f32 %v675_v56, %v674_v53  ;;  %v684_v59 = vrot.slane %v683_v57, 4 }
 0x44f   :  { %v677_v60 = vrot.slane %v676_v58, 2  ;;  %v685_v61 = vadd.f32 %v684_v59, %v683_v57 }
 0x451   :  { %v678_v62 = vadd.f32 %v677_v60, %v676_v58  ;;  %v686_v63 = vrot.slane %v685_v61, 2 }
 0x453   :  { %v679_v1 = vrot.slane %v678_v62, 1  ;;  %v687_v2 = vadd.f32 %v686_v63, %v685_v61  ;;  %v3073_v61 = vld [vmem:[#allocation13 + $0x5] ss:$0 sm:$0xff] }
 0x455   :  { %v680_v3 = vadd.f32 %v679_v1, %v678_v62  ;;  %v688_v4 = vrot.slane %v687_v2, 1  ;;  %v3074_v1 = vld [vmem:[#allocation13 + $0x6] ss:$0 sm:$0xff] }
 0x457   :  { %v681_v5 = vmul.f32 0.125, %v680_v3  ;;  %v689_v7 = vadd.f32 %v688_v4, %v687_v2 }
 0x459   :  { %v690_v8 = vmul.f32 0.125, %v689_v7  ;;  %v691_v9 = vmul.f32 %v681_v5, %v681_v5  ;;  %v694_v13 = vsub.f32 %v668_v52, %v681_v5  ;;  %v3075_v5 = vld [vmem:[#allocation13 + $0x7] ss:$0 sm:$0xff] }
 0x45b   :  { %v692_v10 = vsub.f32 %v690_v8, %v691_v9  ;;  %v699_v15 = vmul.f32 %v3070_v14, %v694_v13 }
 0x45d   :  { %v693_v11 = vmax.f32 %v692_v10, 0.0 }
 0x45f   :  { %v700_v12 = vadd.f32 0.001, %v693_v11 }
 0x461   :  { %3336 = vrsqrt.f32 %v700_v12 }
 0x46b   :  { %v3337_v16 = vpop.eup %3336 }
 0x46c   :  { %v702_v18 = vmul.f32 %v3337_v16, %v699_v15 }
 0x46e   :  { %v707_v19 = vadd.f32 %v3071_v17, %v702_v18 }
 0x470   :  { %v708_v20 = vmax.f32 %v707_v19, 0.0 }
 0x472   :  { %3179 = vmatmul.mubr.msk.f32.vlgmr.msra.gmra.mrb[6].mxu0 %vm321_vm4, %v708_v20 }
 0x473   :  { %3189 = vmatprep.mubr.msk.f32.mxu0 %vm3613_vm0, %v3610_v0  ;;  %3224 = vmatpush3.bf16.msra.mxu0 %v3223_v23  ;;  %v911_v0 = vld [vmem:[#allocation14 + $0x20] sm:$0xff] }
 0x474   :  { %3225 = vmatprep.subr.bf16.mxu0 %v3623_v6  ;;  %v3242_v37 = vpack.c.bf16 %v913_v36, %v911_v0 }
 0x476   :  { %3243 = vmatpush1.bf16.msra.mxu1 %v3242_v37 }
 0x477   :  { %3227 = vmatpush3.bf16.msra.mxu0 %v3226_v26 }
 0x545   :  { %v783_v6 = vpop.f32.mrb[6].mxu0 }
 0x546   :  { %v789_v38 = vsel %vm321_vm4, %v783_v6, 0.0  ;;  %v797_v39 = vmul.f32 %v783_v6, %v783_v6  ;;  %v3180_v40 = vpop.f32.mrb[7].mxu0 }
 0x547   :  { %v790_v41 = vrot.slane %v789_v38, 4  ;;  %v1114_v40 = vlaneseq }
 0x548   :  { %v798_v42 = vsel %vm321_vm4, %v797_v39, 0.0 }
 0x549   :  { %v791_v43 = vadd.f32 %v790_v41, %v789_v38  ;;  %v799_v44 = vrot.slane %v798_v42, 4 }
 0x54b   :  { %v792_v45 = vrot.slane %v791_v43, 2  ;;  %v800_v46 = vadd.f32 %v799_v44, %v798_v42 }
 0x54d   :  { %v793_v47 = vadd.f32 %v792_v45, %v791_v43  ;;  %v801_v48 = vrot.slane %v800_v46, 2 }
 0x54f   :  { %v794_v49 = vrot.slane %v793_v47, 1  ;;  %v802_v50 = vadd.f32 %v801_v48, %v800_v46  ;;  %v3845_v46 = vshrl.u32 %v1114_v40, 7 }
 0x551   :  { %v795_v51 = vadd.f32 %v794_v49, %v793_v47  ;;  %v803_v52 = vrot.slane %v802_v50, 1 }
 0x553   :  { %v796_v53 = vmul.f32 0.125, %v795_v51  ;;  %v804_v54 = vadd.f32 %v803_v52, %v802_v50  ;;  %v3848_v50 = vsub.s32 0, %v3845_v46  ;;  %v1072_v51 = vld [vmem:[#allocation16] ss:$2 sm:$0x3]  ;;  %v3851_v52 = vsub.s32 1, %v3845_v46 }
 0x555   :  { %v805_v55 = vmul.f32 0.125, %v804_v54  ;;  %v806_v56 = vmul.f32 %v796_v53, %v796_v53  ;;  %v809_v60 = vsub.f32 %v783_v6, %v796_v53  ;;  %v1117_v54 = vrot.slane %v1072_v51, %v3848_v50 }
 0x557   :  { %v807_v57 = vsub.f32 %v805_v55, %v806_v56  ;;  %v814_v62 = vmul.f32 %v3073_v61, %v809_v60  ;;  %v1074_v55 = vld [vmem:[#allocation16 + $0x1] ss:$2 sm:$0x3] }
 0x559   :  { %v808_v58 = vmax.f32 %v807_v57, 0.0  ;;  %v1121_v57 = vrot.slane %v1072_v51, %v3851_v52 }
 0x55b   :  { %v815_v59 = vadd.f32 0.001, %v808_v58 }
 0x55d   :  { %3338 = vrsqrt.f32 %v815_v59  ;;  %v1136_v59 = vrot.slane %v1074_v55, %v3848_v50 }
 0x567   :  { %v3339_v63 = vpop.eup %3338 }
 0x568   :  { %v817_v2 = vmul.f32 %v3339_v63, %v814_v62  ;;  %v1140_v62 = vrot.slane %v1074_v55, %v3851_v52 }
 0x56a   :  { %v822_v3 = vadd.f32 %v3074_v1, %v817_v2 }
 0x56c   :  { %v823_v4 = vmax.f32 %v822_v3, 0.0 }
 0x56e   :  { %3190 = vmatmul.mubr.msk.f32.vlgmr.msra.gmra.mrb[8].mxu0 %vm321_vm4, %v823_v4 }
 0x641   :  { %v903_v7 = vpop.f32.mrb[8].mxu0 }
 0x642   :  { %v904_v8 = vadd.f32 %v3075_v5, %v903_v7  ;;  %v3191_v9 = vpop.f32.mrb[9].mxu0 }
 0x644   :  { %3078 = vmatmul.mubr.msk.f32.vlgmr.msra.gmra.mrb[2].mxu1 %vm321_vm4, %v904_v8 }
 0x717   :  { %v1067_v10 = vpop.f32.mrb[2].mxu1 }
 0x718   :  { %v1075_v11 = vrot.slane %v1067_v10, 4  ;;  %v1089_v12 = vmul.f32 %v1067_v10, %v1067_v10  ;;  %v1069_v13 = vpop.f32.mrb[3].mxu1 }
 0x719   :  { %v1081_v14 = vrot.slane %v1069_v13, 4  ;;  %v1090_v15 = vmul.f32 %v1069_v13, %v1069_v13 }
 0x71a   :  { %v1076_v16 = vadd.f32 %v1075_v11, %v1067_v10  ;;  %v1091_v17 = vrot.slane %v1089_v12, 4 }
 0x71b   :  { %v1082_v18 = vadd.f32 %v1081_v14, %v1069_v13  ;;  %v1097_v19 = vrot.slane %v1090_v15, 4 }
 0x71c   :  { %v1077_v20 = vrot.slane %v1076_v16, 2  ;;  %v1092_v21 = vadd.f32 %v1091_v17, %v1089_v12 }
 0x71d   :  { %v1083_v22 = vrot.slane %v1082_v18, 2  ;;  %v1098_v23 = vadd.f32 %v1097_v19, %v1090_v15 }
 0x71e   :  { %v1078_v24 = vadd.f32 %v1077_v20, %v1076_v16  ;;  %v1093_v25 = vrot.slane %v1092_v21, 2 }
 0x71f   :  { %v1084_v26 = vadd.f32 %v1083_v22, %v1082_v18  ;;  %v1099_v27 = vrot.slane %v1098_v23, 2 }
 0x720   :  { %v1079_v28 = vrot.slane %v1078_v24, 1  ;;  %v1094_v29 = vadd.f32 %v1093_v25, %v1092_v21 }
 0x721   :  { %v1085_v30 = vrot.slane %v1084_v26, 1  ;;  %v1100_v31 = vadd.f32 %v1099_v27, %v1098_v23 }
 0x722   :  { %v1080_v32 = vadd.f32 %v1079_v28, %v1078_v24  ;;  %v1095_v33 = vrot.slane %v1094_v29, 1 }
 0x723   :  { %v1086_v34 = vadd.f32 %v1085_v30, %v1084_v26  ;;  %v1101_v35 = vrot.slane %v1100_v31, 1 }
 0x724   :  { %v1087_v0 = vmul.f32 0.125, %v1080_v32  ;;  %v1096_v36 = vadd.f32 %v1095_v33, %v1094_v29 }
 0x725   :  { %v1088_v37 = vmul.f32 0.125, %v1086_v34  ;;  %v1102_v6 = vadd.f32 %v1101_v35, %v1100_v31 }
 0x726   :  { %v1103_v38 = vmul.f32 0.125, %v1096_v36  ;;  %v1105_v39 = vmul.f32 %v1087_v0, %v1087_v0  ;;  %v1111_v53 = vsub.f32 %v1067_v10, %v1087_v0 }
 0x727   :  { %v1104_v41 = vmul.f32 0.125, %v1102_v6  ;;  %v1106_v42 = vmul.f32 %v1088_v37, %v1088_v37  ;;  %v1112_v56 = vsub.f32 %v1069_v13, %v1088_v37 }
 0x728   :  { %v1107_v43 = vsub.f32 %v1103_v38, %v1105_v39  ;;  %v1124_v58 = vmul.f32 %v1117_v54, %v1111_v53 }
 0x729   :  { %v1108_v44 = vsub.f32 %v1104_v41, %v1106_v42  ;;  %v1125_v61 = vmul.f32 %v1121_v57, %v1112_v56 }
 0x72a   :  { %v1109_v45 = vmax.f32 %v1107_v43, 0.0 }
 0x72b   :  { %v1110_v47 = vmax.f32 %v1108_v44, 0.0 }
 0x72c   :  { %v1126_v48 = vadd.f32 0.001, %v1109_v45 }
 0x72d   :  { %v1127_v49 = vadd.f32 0.001, %v1110_v47 }
 0x72e   :  { %3340 = vrsqrt.f32 %v1126_v48 }
 0x72f   :  { %3342 = vrsqrt.f32 %v1127_v49 }
 0x738   :  { %v3341_v60 = vpop.eup %3340 }
 0x739   :  { %v3343_v63 = vpop.eup %3342  ;;  %v1130_v1 = vmul.f32 %v3341_v60, %v1124_v58 }
 0x73a   :  { %v1131_v2 = vmul.f32 %v3343_v63, %v1125_v61 }
 0x73b   :  { %v3857_v3 = vadd.f32 %v1136_v59, %v1130_v1 }
 0x73c   :  { %v1144_v4 = vadd.f32 %v1140_v62, %v1131_v2 }
 0x73d   :  { %v1145_v5 = vmax.f32 %v3857_v3, 0.0 }
 0x73e   :  { %v1146_v7 = vmax.f32 %v1144_v4, 0.0 }
 0x73f   :  { %3592 = dma.done.wait [#allocation4], 16384 }
 0x740   :  { %3593 = vsyncadd [#allocation4], 4294950912  ;;  %v3860_v8 = vpack.c.bf16 %v1146_v7, %v1146_v7  ;;  %v1154_v9 = vld [vmem:[#allocation2 + $0x8] sm:$0xff]  ;;  %v1156_v10 = vld [vmem:[#allocation2 + $0x18] sm:$0xff] }
 0x741   :  { %v1153_v11 = vld [vmem:[#allocation2] sm:$0xff]  ;;  %1281 = vmatprep.subr.bf16.mxu0 %v1154_v9  ;;  %1322 = vmatprep.subr.bf16.mxu1 %v1156_v10  ;;  %v1155_v12 = vld [vmem:[#allocation2 + $0x10] sm:$0xff]  ;;  %v1162_v13 = vld [vmem:[#allocation2 + $0x48] sm:$0xff] }
 0x742   :  { %1313 = vmatprep.mubr.bf16.mxu0 %v3860_v8  ;;  %1354 = vmatprep.mubr.bf16.mxu1 %v3860_v8  ;;  %v1164_v14 = vld [vmem:[#allocation2 + $0x58] sm:$0xff]  ;;  %v1161_v15 = vld [vmem:[#allocation2 + $0x40] sm:$0xff]  ;;  %v1163_v16 = vld [vmem:[#allocation2 + $0x50] sm:$0xff] }
 0x743   :  { %1282 = vmatpush1.bf16.msra.mxu0 %v1153_v11  ;;  %1323 = vmatpush1.bf16.msra.mxu1 %v1155_v12  ;;  %v1170_v17 = vld [vmem:[#allocation2 + $0x88] sm:$0xff]  ;;  %v1172_v18 = vld [vmem:[#allocation2 + $0x98] sm:$0xff]  ;;  %v1169_v19 = vld [vmem:[#allocation2 + $0x80] sm:$0xff] }
 0x744   :  { %1283 = vmatprep.subr.bf16.mxu0 %v1162_v13  ;;  %1324 = vmatprep.subr.bf16.mxu1 %v1164_v14  ;;  %v1171_v20 = vld [vmem:[#allocation2 + $0x90] sm:$0xff]  ;;  %v1178_v21 = vld [vmem:[#allocation2 + $0xc8] sm:$0xff]  ;;  %v1180_v22 = vld [vmem:[#allocation2 + $0xd8] sm:$0xff] }
 0x745   :  { %v1177_v23 = vld [vmem:[#allocation2 + $0xc0] sm:$0xff]  ;;  %v1179_v24 = vld [vmem:[#allocation2 + $0xd0] sm:$0xff]  ;;  %v1186_v25 = vld [vmem:[#allocation2 + $0x108] sm:$0xff] }
 0x746   :  { %v1188_v26 = vld [vmem:[#allocation2 + $0x118] sm:$0xff]  ;;  %v1185_v27 = vld [vmem:[#allocation2 + $0x100] sm:$0xff]  ;;  %v1187_v28 = vld [vmem:[#allocation2 + $0x110] sm:$0xff] }
 0x747   :  { %1284 = vmatpush1.bf16.msra.mxu0 %v1161_v15  ;;  %1325 = vmatpush1.bf16.msra.mxu1 %v1163_v16  ;;  %v1194_v29 = vld [vmem:[#allocation2 + $0x148] sm:$0xff]  ;;  %v1196_v30 = vld [vmem:[#allocation2 + $0x158] sm:$0xff]  ;;  %v1193_v31 = vld [vmem:[#allocation2 + $0x140] sm:$0xff] }
 0x748   :  { %1285 = vmatprep.subr.bf16.mxu0 %v1170_v17  ;;  %1326 = vmatprep.subr.bf16.mxu1 %v1172_v18  ;;  %v1195_v32 = vld [vmem:[#allocation2 + $0x150] sm:$0xff]  ;;  %v1202_v33 = vld [vmem:[#allocation2 + $0x188] sm:$0xff]  ;;  %v1204_v34 = vld [vmem:[#allocation2 + $0x198] sm:$0xff]  ;;  %v3867_v17 = vpack.c.bf16 %v1145_v5, %v1145_v5 }
 0x749   :  { %v1201_v35 = vld [vmem:[#allocation2 + $0x180] sm:$0xff]  ;;  %v1203_v0 = vld [vmem:[#allocation2 + $0x190] sm:$0xff]  ;;  %v1210_v36 = vld [vmem:[#allocation2 + $0x1c8] sm:$0xff] }
 0x74a   :  { %v1212_v37 = vld [vmem:[#allocation2 + $0x1d8] sm:$0xff]  ;;  %v1209_v6 = vld [vmem:[#allocation2 + $0x1c0] sm:$0xff]  ;;  %v1211_v38 = vld [vmem:[#allocation2 + $0x1d0] sm:$0xff] }
 0x74b   :  { %1286 = vmatpush1.bf16.msra.mxu0 %v1169_v19  ;;  %1327 = vmatpush1.bf16.msra.mxu1 %v1171_v20  ;;  %v1218_v39 = vld [vmem:[#allocation2 + $0x208] sm:$0xff]  ;;  %v1220_v40 = vld [vmem:[#allocation2 + $0x218] sm:$0xff]  ;;  %v1217_v41 = vld [vmem:[#allocation2 + $0x200] sm:$0xff] }
 0x74c   :  { %1287 = vmatprep.subr.bf16.mxu0 %v1178_v21  ;;  %1328 = vmatprep.subr.bf16.mxu1 %v1180_v22  ;;  %v1219_v42 = vld [vmem:[#allocation2 + $0x210] sm:$0xff]  ;;  %v1226_v43 = vld [vmem:[#allocation2 + $0x248] sm:$0xff]  ;;  %v1228_v44 = vld [vmem:[#allocation2 + $0x258] sm:$0xff] }
 0x74d   :  { %v1225_v45 = vld [vmem:[#allocation2 + $0x240] sm:$0xff]  ;;  %v1227_v47 = vld [vmem:[#allocation2 + $0x250] sm:$0xff]  ;;  %v1234_v48 = vld [vmem:[#allocation2 + $0x288] sm:$0xff] }
 0x74e   :  { %v1236_v49 = vld [vmem:[#allocation2 + $0x298] sm:$0xff]  ;;  %v1233_v51 = vld [vmem:[#allocation2 + $0x280] sm:$0xff]  ;;  %v1235_v53 = vld [vmem:[#allocation2 + $0x290] sm:$0xff] }
 0x74f   :  { %1288 = vmatpush1.bf16.msra.mxu0 %v1177_v23  ;;  %1329 = vmatpush1.bf16.msra.mxu1 %v1179_v24  ;;  %v1242_v54 = vld [vmem:[#allocation2 + $0x2c8] sm:$0xff]  ;;  %v1244_v55 = vld [vmem:[#allocation2 + $0x2d8] sm:$0xff]  ;;  %v1241_v56 = vld [vmem:[#allocation2 + $0x2c0] sm:$0xff] }
 0x750   :  { %1289 = vmatprep.subr.bf16.mxu0 %v1186_v25  ;;  %1330 = vmatprep.subr.bf16.mxu1 %v1188_v26  ;;  %v1243_v57 = vld [vmem:[#allocation2 + $0x2d0] sm:$0xff]  ;;  %v1250_v58 = vld [vmem:[#allocation2 + $0x308] sm:$0xff]  ;;  %v1252_v59 = vld [vmem:[#allocation2 + $0x318] sm:$0xff] }
 0x751   :  { %v1249_v60 = vld [vmem:[#allocation2 + $0x300] sm:$0xff]  ;;  %v1251_v61 = vld [vmem:[#allocation2 + $0x310] sm:$0xff]  ;;  %v1258_v62 = vld [vmem:[#allocation2 + $0x348] sm:$0xff] }
 0x752   :  { %v1260_v63 = vld [vmem:[#allocation2 + $0x358] sm:$0xff]  ;;  %v1257_v1 = vld [vmem:[#allocation2 + $0x340] sm:$0xff]  ;;  %v1259_v2 = vld [vmem:[#allocation2 + $0x350] sm:$0xff] }
 0x753   :  { %1290 = vmatpush1.bf16.msra.mxu0 %v1185_v27  ;;  %1331 = vmatpush1.bf16.msra.mxu1 %v1187_v28  ;;  %v1266_v4 = vld [vmem:[#allocation2 + $0x388] sm:$0xff]  ;;  %v1268_v7 = vld [vmem:[#allocation2 + $0x398] sm:$0xff]  ;;  %v1265_v9 = vld [vmem:[#allocation2 + $0x380] sm:$0xff] }
 0x754   :  { %1291 = vmatprep.subr.bf16.mxu0 %v1194_v29  ;;  %1332 = vmatprep.subr.bf16.mxu1 %v1196_v30  ;;  %v1267_v10 = vld [vmem:[#allocation2 + $0x390] sm:$0xff]  ;;  %v1274_v11 = vld [vmem:[#allocation2 + $0x3c8] sm:$0xff]  ;;  %v1276_v12 = vld [vmem:[#allocation2 + $0x3d8] sm:$0xff] }
 0x755   :  { %v1273_v13 = vld [vmem:[#allocation2 + $0x3c0] sm:$0xff]  ;;  %v1275_v14 = vld [vmem:[#allocation2 + $0x3d0] sm:$0xff]  ;;  %v1158_v15 = vld [vmem:[#allocation2 + $0x28] sm:$0xff] }
 0x756   :  { %v1160_v16 = vld [vmem:[#allocation2 + $0x38] sm:$0xff]  ;;  %v1157_v18 = vld [vmem:[#allocation2 + $0x20] sm:$0xff]  ;;  %v1159_v19 = vld [vmem:[#allocation2 + $0x30] sm:$0xff] }
 0x757   :  { %1292 = vmatpush1.bf16.msra.mxu0 %v1193_v31  ;;  %1333 = vmatpush1.bf16.msra.mxu1 %v1195_v32  ;;  %v1166_v20 = vld [vmem:[#allocation2 + $0x68] sm:$0xff]  ;;  %v1168_v21 = vld [vmem:[#allocation2 + $0x78] sm:$0xff]  ;;  %v1165_v3 = vld [vmem:[#allocation2 + $0x60] sm:$0xff] }
 0x758   :  { %1293 = vmatprep.subr.bf16.mxu0 %v1202_v33  ;;  %1334 = vmatprep.subr.bf16.mxu1 %v1204_v34  ;;  %v1167_v22 = vld [vmem:[#allocation2 + $0x70] sm:$0xff]  ;;  %v1174_v5 = vld [vmem:[#allocation2 + $0xa8] sm:$0xff]  ;;  %v1176_v23 = vld [vmem:[#allocation2 + $0xb8] sm:$0xff] }
 0x759   :  { %v1173_v24 = vld [vmem:[#allocation2 + $0xa0] sm:$0xff]  ;;  %v1175_v25 = vld [vmem:[#allocation2 + $0xb0] sm:$0xff]  ;;  %v1182_v26 = vld [vmem:[#allocation2 + $0xe8] sm:$0xff] }
 0x75a   :  { %v1184_v27 = vld [vmem:[#allocation2 + $0xf8] sm:$0xff]  ;;  %v1181_v28 = vld [vmem:[#allocation2 + $0xe0] sm:$0xff]  ;;  %v1183_v29 = vld [vmem:[#allocation2 + $0xf0] sm:$0xff] }
 0x75b   :  { %1294 = vmatpush1.bf16.msra.mxu0 %v1201_v35  ;;  %1335 = vmatpush1.bf16.msra.mxu1 %v1203_v0  ;;  %v1190_v30 = vld [vmem:[#allocation2 + $0x128] sm:$0xff]  ;;  %v1192_v31 = vld [vmem:[#allocation2 + $0x138] sm:$0xff]  ;;  %v1191_v32 = vld [vmem:[#allocation2 + $0x130] sm:$0xff] }
 0x75c   :  { %1295 = vmatprep.subr.bf16.mxu0 %v1210_v36  ;;  %1336 = vmatprep.subr.bf16.mxu1 %v1212_v37  ;;  %v1198_v33 = vld [vmem:[#allocation2 + $0x168] sm:$0xff]  ;;  %v1200_v34 = vld [vmem:[#allocation2 + $0x178] sm:$0xff]  ;;  %v1197_v35 = vld [vmem:[#allocation2 + $0x160] sm:$0xff] }
 0x75d   :  { %v1199_v0 = vld [vmem:[#allocation2 + $0x170] sm:$0xff]  ;;  %v1206_v36 = vld [vmem:[#allocation2 + $0x1a8] sm:$0xff]  ;;  %v1208_v37 = vld [vmem:[#allocation2 + $0x1b8] sm:$0xff] }
 0x75f   :  { %1296 = vmatpush1.bf16.msra.mxu0 %v1209_v6  ;;  %1337 = vmatpush1.bf16.msra.mxu1 %v1211_v38  ;;  %v1205_v6 = vld [vmem:[#allocation2 + $0x1a0] sm:$0xff]  ;;  %v1207_v38 = vld [vmem:[#allocation2 + $0x1b0] sm:$0xff] }
 0x760   :  { %1297 = vmatprep.subr.bf16.mxu0 %v1218_v39  ;;  %1338 = vmatprep.subr.bf16.mxu1 %v1220_v40  ;;  %v1214_v39 = vld [vmem:[#allocation2 + $0x1e8] sm:$0xff]  ;;  %v1216_v40 = vld [vmem:[#allocation2 + $0x1f8] sm:$0xff] }
 0x763   :  { %1298 = vmatpush1.bf16.msra.mxu0 %v1217_v41  ;;  %1339 = vmatpush1.bf16.msra.mxu1 %v1219_v42  ;;  %v1213_v41 = vld [vmem:[#allocation2 + $0x1e0] sm:$0xff]  ;;  %v1215_v42 = vld [vmem:[#allocation2 + $0x1f0] sm:$0xff] }
 0x764   :  { %1299 = vmatprep.subr.bf16.mxu0 %v1226_v43  ;;  %1340 = vmatprep.subr.bf16.mxu1 %v1228_v44  ;;  %v1222_v43 = vld [vmem:[#allocation2 + $0x228] sm:$0xff]  ;;  %v1224_v44 = vld [vmem:[#allocation2 + $0x238] sm:$0xff] }
 0x767   :  { %1300 = vmatpush1.bf16.msra.mxu0 %v1225_v45  ;;  %1341 = vmatpush1.bf16.msra.mxu1 %v1227_v47  ;;  %v1221_v45 = vld [vmem:[#allocation2 + $0x220] sm:$0xff]  ;;  %v1223_v47 = vld [vmem:[#allocation2 + $0x230] sm:$0xff] }
 0x768   :  { %1301 = vmatprep.subr.bf16.mxu0 %v1234_v48  ;;  %1342 = vmatprep.subr.bf16.mxu1 %v1236_v49  ;;  %v1230_v48 = vld [vmem:[#allocation2 + $0x268] sm:$0xff]  ;;  %v1232_v49 = vld [vmem:[#allocation2 + $0x278] sm:$0xff] }
 0x76b   :  { %1302 = vmatpush1.bf16.msra.mxu0 %v1233_v51  ;;  %1343 = vmatpush1.bf16.msra.mxu1 %v1235_v53  ;;  %v1229_v51 = vld [vmem:[#allocation2 + $0x260] sm:$0xff]  ;;  %v1231_v53 = vld [vmem:[#allocation2 + $0x270] sm:$0xff] }
 0x76c   :  { %1303 = vmatprep.subr.bf16.mxu0 %v1242_v54  ;;  %1344 = vmatprep.subr.bf16.mxu1 %v1244_v55  ;;  %v1238_v54 = vld [vmem:[#allocation2 + $0x2a8] sm:$0xff]  ;;  %v1240_v55 = vld [vmem:[#allocation2 + $0x2b8] sm:$0xff] }
 0x76f   :  { %1304 = vmatpush1.bf16.msra.mxu0 %v1241_v56  ;;  %1345 = vmatpush1.bf16.msra.mxu1 %v1243_v57  ;;  %v1237_v56 = vld [vmem:[#allocation2 + $0x2a0] sm:$0xff]  ;;  %v1239_v57 = vld [vmem:[#allocation2 + $0x2b0] sm:$0xff] }
 0x770   :  { %1305 = vmatprep.subr.bf16.mxu0 %v1250_v58  ;;  %1346 = vmatprep.subr.bf16.mxu1 %v1252_v59  ;;  %v1246_v58 = vld [vmem:[#allocation2 + $0x2e8] sm:$0xff]  ;;  %v1248_v59 = vld [vmem:[#allocation2 + $0x2f8] sm:$0xff] }
 0x773   :  { %1306 = vmatpush1.bf16.msra.mxu0 %v1249_v60  ;;  %1347 = vmatpush1.bf16.msra.mxu1 %v1251_v61  ;;  %v1245_v60 = vld [vmem:[#allocation2 + $0x2e0] sm:$0xff]  ;;  %v1247_v61 = vld [vmem:[#allocation2 + $0x2f0] sm:$0xff] }
 0x774   :  { %1307 = vmatprep.subr.bf16.mxu0 %v1258_v62  ;;  %1348 = vmatprep.subr.bf16.mxu1 %v1260_v63  ;;  %v1254_v62 = vld [vmem:[#allocation2 + $0x328] sm:$0xff]  ;;  %v1256_v63 = vld [vmem:[#allocation2 + $0x338] sm:$0xff] }
 0x777   :  { %1308 = vmatpush1.bf16.msra.mxu0 %v1257_v1  ;;  %1349 = vmatpush1.bf16.msra.mxu1 %v1259_v2  ;;  %v1253_v1 = vld [vmem:[#allocation2 + $0x320] sm:$0xff]  ;;  %v1255_v2 = vld [vmem:[#allocation2 + $0x330] sm:$0xff] }
 0x778   :  { %1309 = vmatprep.subr.bf16.mxu0 %v1266_v4  ;;  %1350 = vmatprep.subr.bf16.mxu1 %v1268_v7  ;;  %v1262_v4 = vld [vmem:[#allocation2 + $0x368] sm:$0xff]  ;;  %v1264_v7 = vld [vmem:[#allocation2 + $0x378] sm:$0xff] }
 0x77b   :  { %1310 = vmatpush1.bf16.msra.mxu0 %v1265_v9  ;;  %1351 = vmatpush1.bf16.msra.mxu1 %v1267_v10  ;;  %v1261_v9 = vld [vmem:[#allocation2 + $0x360] sm:$0xff]  ;;  %v1263_v10 = vld [vmem:[#allocation2 + $0x370] sm:$0xff] }
 0x77c   :  { %1311 = vmatprep.subr.bf16.mxu0 %v1274_v11  ;;  %1352 = vmatprep.subr.bf16.mxu1 %v1276_v12  ;;  %v1270_v11 = vld [vmem:[#allocation2 + $0x3a8] sm:$0xff]  ;;  %v1272_v12 = vld [vmem:[#allocation2 + $0x3b8] sm:$0xff] }
 0x77f   :  { %1312 = vmatpush1.bf16.msra.mxu0 %v1273_v13  ;;  %1353 = vmatpush1.bf16.msra.mxu1 %v1275_v14  ;;  %v1269_v13 = vld [vmem:[#allocation2 + $0x3a0] sm:$0xff]  ;;  %v1271_v14 = vld [vmem:[#allocation2 + $0x3b0] sm:$0xff] }
 0x780   :  { %1363 = vmatprep.subr.bf16.mxu0 %v1158_v15  ;;  %1404 = vmatprep.subr.bf16.mxu1 %v1160_v16  ;;  %v1278_v15 = vld [vmem:[#allocation2 + $0x3e8] sm:$0xff]  ;;  %v1280_v16 = vld [vmem:[#allocation2 + $0x3f8] sm:$0xff] }
 0x782   :  { %1314 = vmatmul.mubr.bf16.vlgmr.msra.gmra.mrb[12].mxu0 %v3867_v17  ;;  %1355 = vmatmul.mubr.bf16.vlgmr.msra.gmra.mrb[4].mxu1 %v3867_v17 }
 0x783   :  { %1364 = vmatpush1.bf16.msra.mxu0 %v1157_v18  ;;  %1405 = vmatpush1.bf16.msra.mxu1 %v1159_v19  ;;  %v1277_v18 = vld [vmem:[#allocation2 + $0x3e0] sm:$0xff]  ;;  %v1279_v19 = vld [vmem:[#allocation2 + $0x3f0] sm:$0xff] }
 0x784   :  { %1365 = vmatprep.subr.bf16.mxu0 %v1166_v20  ;;  %1406 = vmatprep.subr.bf16.mxu1 %v1168_v21 }
 0x785   :  { %1395 = vmatprep.mubr.bf16.mxu0 %v3860_v8  ;;  %1436 = vmatprep.mubr.bf16.mxu1 %v3860_v8  ;;  %v1189_v8 = vld [vmem:[#allocation2 + $0x120] sm:$0xff] }
 0x787   :  { %1366 = vmatpush1.bf16.msra.mxu0 %v1165_v3  ;;  %1407 = vmatpush1.bf16.msra.mxu1 %v1167_v22 }
 0x788   :  { %1367 = vmatprep.subr.bf16.mxu0 %v1174_v5  ;;  %1408 = vmatprep.subr.bf16.mxu1 %v1176_v23 }
 0x78b   :  { %1368 = vmatpush1.bf16.msra.mxu0 %v1173_v24  ;;  %1409 = vmatpush1.bf16.msra.mxu1 %v1175_v25 }
 0x78c   :  { %1369 = vmatprep.subr.bf16.mxu0 %v1182_v26  ;;  %1410 = vmatprep.subr.bf16.mxu1 %v1184_v27 }
 0x78f   :  { %1370 = vmatpush1.bf16.msra.mxu0 %v1181_v28  ;;  %1411 = vmatpush1.bf16.msra.mxu1 %v1183_v29 }
 0x790   :  { %1371 = vmatprep.subr.bf16.mxu0 %v1190_v30  ;;  %1412 = vmatprep.subr.bf16.mxu1 %v1192_v31 }
 0x793   :  { %1372 = vmatpush1.bf16.msra.mxu0 %v1189_v8  ;;  %1413 = vmatpush1.bf16.msra.mxu1 %v1191_v32 }
 0x794   :  { %1373 = vmatprep.subr.bf16.mxu0 %v1198_v33  ;;  %1414 = vmatprep.subr.bf16.mxu1 %v1200_v34 }
 0x797   :  { %1374 = vmatpush1.bf16.msra.mxu0 %v1197_v35  ;;  %1415 = vmatpush1.bf16.msra.mxu1 %v1199_v0 }
 0x798   :  { %1375 = vmatprep.subr.bf16.mxu0 %v1206_v36  ;;  %1416 = vmatprep.subr.bf16.mxu1 %v1208_v37 }
 0x79b   :  { %1376 = vmatpush1.bf16.msra.mxu0 %v1205_v6  ;;  %1417 = vmatpush1.bf16.msra.mxu1 %v1207_v38 }
 0x79c   :  { %1377 = vmatprep.subr.bf16.mxu0 %v1214_v39  ;;  %1418 = vmatprep.subr.bf16.mxu1 %v1216_v40 }
 0x79f   :  { %1378 = vmatpush1.bf16.msra.mxu0 %v1213_v41  ;;  %1419 = vmatpush1.bf16.msra.mxu1 %v1215_v42 }
 0x7a0   :  { %1379 = vmatprep.subr.bf16.mxu0 %v1222_v43  ;;  %1420 = vmatprep.subr.bf16.mxu1 %v1224_v44 }
 0x7a3   :  { %1380 = vmatpush1.bf16.msra.mxu0 %v1221_v45  ;;  %1421 = vmatpush1.bf16.msra.mxu1 %v1223_v47 }
 0x7a4   :  { %1381 = vmatprep.subr.bf16.mxu0 %v1230_v48  ;;  %1422 = vmatprep.subr.bf16.mxu1 %v1232_v49 }
 0x7a7   :  { %1382 = vmatpush1.bf16.msra.mxu0 %v1229_v51  ;;  %1423 = vmatpush1.bf16.msra.mxu1 %v1231_v53 }
 0x7a8   :  { %1383 = vmatprep.subr.bf16.mxu0 %v1238_v54  ;;  %1424 = vmatprep.subr.bf16.mxu1 %v1240_v55 }
 0x7ab   :  { %1384 = vmatpush1.bf16.msra.mxu0 %v1237_v56  ;;  %1425 = vmatpush1.bf16.msra.mxu1 %v1239_v57 }
 0x7ac   :  { %1385 = vmatprep.subr.bf16.mxu0 %v1246_v58  ;;  %1426 = vmatprep.subr.bf16.mxu1 %v1248_v59 }
 0x7af   :  { %1386 = vmatpush1.bf16.msra.mxu0 %v1245_v60  ;;  %1427 = vmatpush1.bf16.msra.mxu1 %v1247_v61 }
 0x7b0   :  { %1387 = vmatprep.subr.bf16.mxu0 %v1254_v62  ;;  %1428 = vmatprep.subr.bf16.mxu1 %v1256_v63 }
 0x7b3   :  { %1388 = vmatpush1.bf16.msra.mxu0 %v1253_v1  ;;  %1429 = vmatpush1.bf16.msra.mxu1 %v1255_v2 }
 0x7b4   :  { %1389 = vmatprep.subr.bf16.mxu0 %v1262_v4  ;;  %1430 = vmatprep.subr.bf16.mxu1 %v1264_v7 }
 0x7b7   :  { %1390 = vmatpush1.bf16.msra.mxu0 %v1261_v9  ;;  %1431 = vmatpush1.bf16.msra.mxu1 %v1263_v10 }
 0x7b8   :  { %1391 = vmatprep.subr.bf16.mxu0 %v1270_v11  ;;  %1432 = vmatprep.subr.bf16.mxu1 %v1272_v12 }
 0x7bb   :  { %1392 = vmatpush1.bf16.msra.mxu0 %v1269_v13  ;;  %1433 = vmatpush1.bf16.msra.mxu1 %v1271_v14 }
 0x7bc   :  { %1393 = vmatprep.subr.bf16.mxu0 %v1278_v15  ;;  %1434 = vmatprep.subr.bf16.mxu1 %v1280_v16 }
 0x7bf   :  { %1394 = vmatpush1.bf16.msra.mxu0 %v1277_v18  ;;  %1435 = vmatpush1.bf16.msra.mxu1 %v1279_v19 }
 0x7c2   :  { %1396 = vmatmul.mubr.bf16.vlgmr.msra.gmra.mrb[16].mxu0 %v3867_v17  ;;  %1437 = vmatmul.mubr.bf16.vlgmr.msra.gmra.mrb[8].mxu1 %v3867_v17 }
 0x855   :  { %v3875_v20 = vpop.f32.mrb[12].mxu0  ;;  %v3877_v21 = vpop.f32.mrb[4].mxu1 }
 0x856   :  { %v1445_v3 = vrot.slane %v3875_v20, 4  ;;  %v1493_v22 = vmul.f32 %v3875_v20, %v3875_v20  ;;  %v1457_v5 = vrot.slane %v3877_v21, 4  ;;  %v1495_v23 = vmul.f32 %v3877_v21, %v3877_v21  ;;  %v3885_v24 = vpop.f32.mrb[13].mxu0  ;;  %v3887_v25 = vpop.f32.mrb[5].mxu1 }
 0x857   :  { %v1451_v17 = vrot.slane %v3885_v24, 4  ;;  %v1494_v26 = vmul.f32 %v3885_v24, %v3885_v24  ;;  %v1463_v27 = vrot.slane %v3887_v25, 4  ;;  %v1496_v28 = vmul.f32 %v3887_v25, %v3887_v25  ;;  %v1319_v29 = vpop.f32.mrb[14].mxu0  ;;  %v1360_v30 = vpop.f32.mrb[6].mxu1 }
 0x858   :  { %v1446_v31 = vadd.f32 %v1445_v3, %v3875_v20  ;;  %v1501_v8 = vrot.slane %v1493_v22, 4  ;;  %v1458_v32 = vadd.f32 %v1457_v5, %v3877_v21  ;;  %v1513_v33 = vrot.slane %v1495_v23, 4  ;;  %v1320_v34 = vpop.f32.mrb[15].mxu0  ;;  %v1361_v35 = vpop.f32.mrb[7].mxu1 }
 0x859   :  { %v1452_v0 = vadd.f32 %v1451_v17, %v3885_v24  ;;  %v1507_v36 = vrot.slane %v1494_v26, 4  ;;  %v1464_v37 = vadd.f32 %v1463_v27, %v3887_v25  ;;  %v1519_v6 = vrot.slane %v1496_v28, 4 }
 0x85a   :  { %v1447_v38 = vrot.slane %v1446_v31, 2  ;;  %v1514_v39 = vadd.f32 %v1513_v33, %v1495_v23  ;;  %v1459_v40 = vrot.slane %v1458_v32, 2  ;;  %v1502_v41 = vadd.f32 %v1501_v8, %v1493_v22 }
 0x85b   :  { %v1453_v42 = vrot.slane %v1452_v0, 2  ;;  %v1520_v43 = vadd.f32 %v1519_v6, %v1496_v28  ;;  %v1465_v44 = vrot.slane %v1464_v37, 2  ;;  %v1508_v45 = vadd.f32 %v1507_v36, %v1494_v26 }
 0x85c   :  { %v1448_v47 = vadd.f32 %v1447_v38, %v1446_v31  ;;  %v1515_v48 = vrot.slane %v1514_v39, 2  ;;  %v1460_v49 = vadd.f32 %v1459_v40, %v1458_v32  ;;  %v1503_v51 = vrot.slane %v1502_v41, 2 }
 0x85d   :  { %v1454_v53 = vadd.f32 %v1453_v42, %v1452_v0  ;;  %v1521_v54 = vrot.slane %v1520_v43, 2  ;;  %v1466_v55 = vadd.f32 %v1465_v44, %v1464_v37  ;;  %v1509_v56 = vrot.slane %v1508_v45, 2 }
 0x85e   :  { %v1449_v57 = vrot.slane %v1448_v47, 1  ;;  %v1516_v58 = vadd.f32 %v1515_v48, %v1514_v39  ;;  %v1461_v59 = vrot.slane %v1460_v49, 1  ;;  %v1504_v60 = vadd.f32 %v1503_v51, %v1502_v41 }
 0x85f   :  { %v1455_v61 = vrot.slane %v1454_v53, 1  ;;  %v1522_v62 = vadd.f32 %v1521_v54, %v1520_v43  ;;  %v1467_v63 = vrot.slane %v1466_v55, 1  ;;  %v1510_v1 = vadd.f32 %v1509_v56, %v1508_v45 }
 0x860   :  { %v1450_v2 = vadd.f32 %v1449_v57, %v1448_v47  ;;  %v1517_v4 = vrot.slane %v1516_v58, 1  ;;  %v1462_v7 = vadd.f32 %v1461_v59, %v1460_v49  ;;  %v1505_v9 = vrot.slane %v1504_v60, 1 }
 0x861   :  { %v1456_v10 = vadd.f32 %v1455_v61, %v1454_v53  ;;  %v1523_v11 = vrot.slane %v1522_v62, 1  ;;  %v1468_v12 = vadd.f32 %v1467_v63, %v1466_v55  ;;  %v1511_v13 = vrot.slane %v1510_v1, 1 }
 0x862   :  { %v1518_v14 = vadd.f32 %v1517_v4, %v1516_v58  ;;  %v1506_v15 = vadd.f32 %v1505_v9, %v1504_v60 }
 0x863   :  { %v1549_v16 = vadd.f32 %v1456_v10, %v1450_v2  ;;  %v1524_v18 = vadd.f32 %v1523_v11, %v1522_v62  ;;  %v1599_v19 = vadd.f32 %v1468_v12, %v1462_v7  ;;  %v1512_v3 = vadd.f32 %v1511_v13, %v1510_v1 }
 0x865   :  { %1550 = vadd.xlane.f32.xlu0 %v1549_v16  ;;  %v1603_v22 = vadd.f32 %v1524_v18, %v1518_v14  ;;  %v1553_v5 = vadd.f32 %v1512_v3, %v1506_v15 }
 0x867   :  { %1604 = vadd.xlane.f32.xlu1 %v1603_v22 }
 0x869   :  { %1600 = vadd.xlane.f32.xlu0 %v1599_v19 }
 0x86d   :  { %1554 = vadd.xlane.f32.xlu0 %v1553_v5 }
 0x895   :  { %v3899_v23 = vpop.f32.mrb[16].mxu0  ;;  %v3901_v17 = vpop.f32.mrb[8].mxu1 }
 0x896   :  { %v1469_v26 = vrot.slane %v3899_v23, 4  ;;  %v1497_v27 = vmul.f32 %v3899_v23, %v3899_v23  ;;  %v1481_v28 = vrot.slane %v3901_v17, 4  ;;  %v1499_v29 = vmul.f32 %v3901_v17, %v3901_v17  ;;  %v3909_v30 = vpop.f32.mrb[17].mxu0  ;;  %v3911_v31 = vpop.f32.mrb[9].mxu1 }
 0x897   :  { %v1475_v8 = vrot.slane %v3909_v30, 4  ;;  %v1498_v32 = vmul.f32 %v3909_v30, %v3909_v30  ;;  %v1487_v33 = vrot.slane %v3911_v31, 4  ;;  %v1500_v34 = vmul.f32 %v3911_v31, %v3911_v31  ;;  %v1401_v35 = vpop.f32.mrb[18].mxu0  ;;  %v1442_v0 = vpop.f32.mrb[10].mxu1 }
 0x898   :  { %v1470_v36 = vadd.f32 %v1469_v26, %v3899_v23  ;;  %v1525_v37 = vrot.slane %v1497_v27, 4  ;;  %v1482_v6 = vadd.f32 %v1481_v28, %v3901_v17  ;;  %v1537_v38 = vrot.slane %v1499_v29, 4  ;;  %v1402_v39 = vpop.f32.mrb[19].mxu0  ;;  %v1443_v40 = vpop.f32.mrb[11].mxu1 }
 0x899   :  { %v1476_v41 = vadd.f32 %v1475_v8, %v3909_v30  ;;  %v1531_v42 = vrot.slane %v1498_v32, 4  ;;  %v1488_v43 = vadd.f32 %v1487_v33, %v3911_v31  ;;  %v1543_v44 = vrot.slane %v1500_v34, 4 }
 0x89a   :  { %v1471_v45 = vrot.slane %v1470_v36, 2  ;;  %v1526_v47 = vadd.f32 %v1525_v37, %v1497_v27  ;;  %v1483_v48 = vrot.slane %v1482_v6, 2  ;;  %v1538_v49 = vadd.f32 %v1537_v38, %v1499_v29 }
 0x89b   :  { %v1477_v51 = vrot.slane %v1476_v41, 2  ;;  %v1532_v53 = vadd.f32 %v1531_v42, %v1498_v32  ;;  %v1489_v54 = vrot.slane %v1488_v43, 2  ;;  %v1544_v55 = vadd.f32 %v1543_v44, %v1500_v34 }
 0x89c   :  { %v1472_v56 = vadd.f32 %v1471_v45, %v1470_v36  ;;  %v1527_v57 = vrot.slane %v1526_v47, 2  ;;  %v1484_v58 = vadd.f32 %v1483_v48, %v1482_v6  ;;  %v1539_v59 = vrot.slane %v1538_v49, 2 }
 0x89d   :  { %v1478_v60 = vadd.f32 %v1477_v51, %v1476_v41  ;;  %v1533_v61 = vrot.slane %v1532_v53, 2  ;;  %v1490_v62 = vadd.f32 %v1489_v54, %v1488_v43  ;;  %v1545_v63 = vrot.slane %v1544_v55, 2  ;;  %v1615_v51 = vld [vmem:[#allocation17 + $0x9] ss:$4 sm:$0x3] }
 0x89e   :  { %v1473_v1 = vrot.slane %v1472_v56, 1  ;;  %v1528_v2 = vadd.f32 %v1527_v57, %v1526_v47  ;;  %v1485_v4 = vrot.slane %v1484_v58, 1  ;;  %v1540_v7 = vadd.f32 %v1539_v59, %v1538_v49  ;;  %v1613_v49 = vld [vmem:[#allocation17 + $0x8] ss:$4 sm:$0x3] }
 0x89f   :  { %v1479_v9 = vrot.slane %v1478_v60, 1  ;;  %v1534_v10 = vadd.f32 %v1533_v61, %v1532_v53  ;;  %v1491_v11 = vrot.slane %v1490_v62, 1  ;;  %v1546_v12 = vadd.f32 %v1545_v63, %v1544_v55  ;;  %v1562_v53 = vld [vmem:[#allocation17] ss:$4 sm:$0x3] }
 0x8a0   :  { %v1474_v13 = vadd.f32 %v1473_v1, %v1472_v56  ;;  %v1529_v14 = vrot.slane %v1528_v2, 1  ;;  %v1486_v15 = vadd.f32 %v1485_v4, %v1484_v58  ;;  %v1541_v16 = vrot.slane %v1540_v7, 1  ;;  %v1564_v58 = vld [vmem:[#allocation17 + $0x1] ss:$4 sm:$0x3] }
 0x8a1   :  { %v1480_v18 = vadd.f32 %v1479_v9, %v1478_v60  ;;  %v1535_v19 = vrot.slane %v1534_v10, 1  ;;  %v1492_v3 = vadd.f32 %v1491_v11, %v1490_v62  ;;  %v1547_v22 = vrot.slane %v1546_v12, 1 }
 0x8a2   :  { %v1530_v5 = vadd.f32 %v1529_v14, %v1528_v2  ;;  %v1542_v26 = vadd.f32 %v1541_v16, %v1540_v7  ;;  %v1624_v54 = vrot.slane %v1613_v49, %v3848_v50  ;;  %v1628_v55 = vrot.slane %v1613_v49, %v3851_v52 }
 0x8a3   :  { %v1650_v27 = vadd.f32 %v1480_v18, %v1474_v13  ;;  %v1536_v28 = vadd.f32 %v1535_v19, %v1534_v10  ;;  %v1701_v29 = vadd.f32 %v1492_v3, %v1486_v15  ;;  %v1548_v8 = vadd.f32 %v1547_v22, %v1546_v12 }
 0x8a4   :  { %v1637_v60 = vrot.slane %v1615_v51, %v3848_v50  ;;  %v1641_v61 = vrot.slane %v1615_v51, %v3851_v52  ;;  %v1573_v62 = vrot.slane %v1562_v53, %v3848_v50  ;;  %v1577_v63 = vrot.slane %v1562_v53, %v3851_v52 }
 0x8a5   :  { %1651 = vadd.xlane.f32.xlu1 %v1650_v27  ;;  %v1654_v32 = vadd.f32 %v1536_v28, %v1530_v5  ;;  %v1705_v33 = vadd.f32 %v1548_v8, %v1542_v26 }
 0x8a7   :  { %1655 = vadd.xlane.f32.xlu0 %v1654_v32 }
 0x8a9   :  { %1702 = vadd.xlane.f32.xlu1 %v1701_v29 }
 0x8ad   :  { %1706 = vadd.xlane.f32.xlu1 %v1705_v33 }
 0x8f2   :  { %v1551_v34 = vpop.xlane.xlu0 %1550 }
 0x8f3   :  { %v1552_v36 = vmul.f32 0.00048828125, %v1551_v34 }
 0x8f4   :  { %v1605_v35 = vpop.xlane.xlu1 %1604 }
 0x8f5   :  { %v1606_v6 = vmul.f32 0.00048828125, %v1605_v35  ;;  %v1557_v41 = vmul.f32 %v1552_v36, %v1552_v36  ;;  %v1565_v1 = vsub.f32 %v3875_v20, %v1552_v36  ;;  %v1566_v2 = vsub.f32 %v3885_v24, %v1552_v36 }
 0x8f6   :  { %v1601_v0 = vpop.xlane.xlu0 %1600 }
 0x8f7   :  { %v1602_v37 = vmul.f32 0.00048828125, %v1601_v0 }
 0x8f9   :  { %v1607_v38 = vmul.f32 %v1602_v37, %v1602_v37  ;;  %v1616_v56 = vsub.f32 %v3877_v21, %v1602_v37  ;;  %v1617_v57 = vsub.f32 %v3887_v25, %v1602_v37  ;;  %v1586_v21 = vrot.slane %v1564_v58, %v3848_v50 }
 0x8fa   :  { %v1555_v39 = vpop.xlane.xlu0 %1554  ;;  %v1590_v25 = vrot.slane %v1564_v58, %v3851_v52 }
 0x8fb   :  { %v1608_v40 = vsub.f32 %v1606_v6, %v1607_v38  ;;  %v1556_v42 = vmul.f32 0.00048828125, %v1555_v39 }
 0x8fd   :  { %v1609_v43 = vmax.f32 %v1608_v40, 0.0  ;;  %v1558_v44 = vsub.f32 %v1556_v42, %v1557_v41 }
 0x8ff   :  { %v1610_v45 = vadd.f32 0.001, %v1609_v43  ;;  %v1559_v47 = vmax.f32 %v1558_v44, 0.0 }
 0x901   :  { %3344 = vrsqrt.f32 %v1610_v45  ;;  %v1560_v48 = vadd.f32 0.001, %v1559_v47  ;;  %v1664_v45 = vld [vmem:[#allocation17 + $0x10] ss:$4 sm:$0x3] }
 0x902   :  { %v1666_v47 = vld [vmem:[#allocation17 + $0x11] ss:$4 sm:$0x3]  ;;  %v1675_v51 = vrot.slane %v1664_v45, %v3848_v50  ;;  %v1679_v53 = vrot.slane %v1664_v45, %v3851_v52 }
 0x903   :  { %3346 = vrsqrt.f32 %v1560_v48 }
 0x90b   :  { %v3345_v59 = vpop.eup %3344 }
 0x90c   :  { %v1618_v4 = vmul.f32 %v3345_v59, %v1616_v56  ;;  %v1619_v7 = vmul.f32 %v3345_v59, %v1617_v57  ;;  %v1692_v56 = vrot.slane %v1666_v47, %v3851_v52  ;;  %v1715_v59 = vld [vmem:[#allocation17 + $0x18] ss:$4 sm:$0x3] }
 0x90d   :  { %v3347_v9 = vpop.eup %3346 }
 0x90e   :  { %v1631_v10 = vmul.f32 %v1624_v54, %v1618_v4  ;;  %v1632_v11 = vmul.f32 %v1628_v55, %v1619_v7  ;;  %v1567_v12 = vmul.f32 %v3347_v9, %v1565_v1  ;;  %v1568_v13 = vmul.f32 %v3347_v9, %v1566_v2 }
 0x90f   :  { %v1688_v55 = vrot.slane %v1666_v47, %v3848_v50 }
 0x910   :  { %v1644_v14 = vadd.f32 %v1637_v60, %v1631_v10  ;;  %v1645_v15 = vadd.f32 %v1641_v61, %v1632_v11  ;;  %v1580_v16 = vmul.f32 %v1573_v62, %v1567_v12  ;;  %v1581_v18 = vmul.f32 %v1577_v63, %v1568_v13  ;;  %v1717_v62 = vld [vmem:[#allocation17 + $0x19] ss:$4 sm:$0x3] }
 0x911   :  { %v1726_v63 = vrot.slane %v1715_v59, %v3848_v50  ;;  %v1739_v9 = vrot.slane %v1717_v62, %v3848_v50 }
 0x912   :  { %v1646_v19 = vmax.f32 %v1644_v14, 0.0  ;;  %v1647_v3 = vmax.f32 %v1645_v15, 0.0  ;;  %v1593_v20 = vadd.f32 %v1586_v21, %v1580_v16  ;;  %v1594_v22 = vadd.f32 %v1590_v25, %v1581_v18 }
 0x913   :  { %v1743_v21 = vrot.slane %v1717_v62, %v3851_v52 }
 0x914   :  { %v3935_v24 = vpack.c.bf16 %v1646_v19, %v1646_v19  ;;  %v3937_v5 = vpack.c.bf16 %v1647_v3, %v1647_v3  ;;  %v1595_v26 = vmax.f32 %v1593_v20, 0.0  ;;  %v1596_v27 = vmax.f32 %v1594_v22, 0.0 }
 0x916   :  { %v3939_v28 = vpack.c.bf16 %v1595_v26, %v1595_v26  ;;  %v3941_v29 = vpack.c.bf16 %v1596_v27, %v1596_v27 }
 0x932   :  { %v1652_v8 = vpop.xlane.xlu1 %1651 }
 0x933   :  { %v1653_v32 = vmul.f32 0.00048828125, %v1652_v8 }
 0x934   :  { %v1656_v33 = vpop.xlane.xlu0 %1655 }
 0x935   :  { %v1657_v34 = vmul.f32 0.00048828125, %v1656_v33  ;;  %v1658_v35 = vmul.f32 %v1653_v32, %v1653_v32  ;;  %v1667_v48 = vsub.f32 %v3899_v23, %v1653_v32  ;;  %v1668_v49 = vsub.f32 %v3909_v30, %v1653_v32 }
 0x936   :  { %v1703_v0 = vpop.xlane.xlu1 %1702  ;;  %v1730_v23 = vrot.slane %v1715_v59, %v3851_v52 }
 0x937   :  { %v1659_v36 = vsub.f32 %v1657_v34, %v1658_v35  ;;  %v1704_v37 = vmul.f32 0.00048828125, %v1703_v0 }
 0x939   :  { %v1660_v6 = vmax.f32 %v1659_v36, 0.0  ;;  %v1709_v40 = vmul.f32 %v1704_v37, %v1704_v37  ;;  %v1718_v2 = vsub.f32 %v3901_v17, %v1704_v37  ;;  %v1719_v4 = vsub.f32 %v3911_v31, %v1704_v37 }
 0x93a   :  { %v1707_v38 = vpop.xlane.xlu1 %1706 }
 0x93b   :  { %v1661_v39 = vadd.f32 0.001, %v1660_v6  ;;  %v1708_v41 = vmul.f32 0.00048828125, %v1707_v38 }
 0x93d   :  { %3348 = vrsqrt.f32 %v1661_v39  ;;  %v1710_v42 = vsub.f32 %v1708_v41, %v1709_v40 }
 0x93f   :  { %v1711_v43 = vmax.f32 %v1710_v42, 0.0 }
 0x941   :  { %v1712_v44 = vadd.f32 0.001, %v1711_v43 }
 0x943   :  { %3350 = vrsqrt.f32 %v1712_v44 }
 0x947   :  { %v3349_v54 = vpop.eup %3348 }
 0x948   :  { %v1669_v57 = vmul.f32 %v3349_v54, %v1667_v48  ;;  %v1670_v58 = vmul.f32 %v3349_v54, %v1668_v49 }
 0x94a   :  { %v1682_v60 = vmul.f32 %v1675_v51, %v1669_v57  ;;  %v1683_v61 = vmul.f32 %v1679_v53, %v1670_v58 }
 0x94c   :  { %v1695_v30 = vadd.f32 %v1688_v55, %v1682_v60  ;;  %v1696_v1 = vadd.f32 %v1692_v56, %v1683_v61 }
 0x94d   :  { %v3351_v7 = vpop.eup %3350 }
 0x94e   :  { %v1697_v25 = vmax.f32 %v1695_v30, 0.0  ;;  %v1698_v10 = vmax.f32 %v1696_v1, 0.0  ;;  %v1720_v11 = vmul.f32 %v3351_v7, %v1718_v2  ;;  %v1721_v12 = vmul.f32 %v3351_v7, %v1719_v4 }
 0x950   :  { %v3955_v13 = vpack.c.bf16 %v1697_v25, %v1697_v25  ;;  %v3957_v14 = vpack.c.bf16 %v1698_v10, %v1698_v10  ;;  %v1733_v15 = vmul.f32 %v1726_v63, %v1720_v11  ;;  %v1734_v16 = vmul.f32 %v1730_v23, %v1721_v12 }
 0x952   :  { %v1746_v18 = vadd.f32 %v1739_v9, %v1733_v15  ;;  %v1747_v19 = vadd.f32 %v1743_v21, %v1734_v16 }
 0x954   :  { %v1748_v17 = vmax.f32 %v1746_v18, 0.0  ;;  %v1749_v3 = vmax.f32 %v1747_v19, 0.0 }
 0x956   :  { %v3959_v31 = vpack.c.bf16 %v1748_v17, %v1748_v17  ;;  %v3961_v20 = vpack.c.bf16 %v1749_v3, %v1749_v3 }
 0x957   :  { %3594 = dma.done.wait [#allocation4 + $0x1], 65536 }
 0x958   :  { %3595 = vsyncadd [#allocation4 + $0x1], 4294901760  ;;  %2343 = vmatprep.mubr.bf16.mxu0 %v3941_v29  ;;  %2507 = vmatprep.mubr.bf16.mxu1 %v3941_v29  ;;  %v1757_v22 = vld [vmem:[#allocation3 + $0x8] sm:$0xff]  ;;  %v1759_v26 = vld [vmem:[#allocation3 + $0x18] sm:$0xff]  ;;  %s3625_s1 = smov [#allocation19]  }
 0x959   :  { %v1756_v27 = vld [vmem:[#allocation3] sm:$0xff]  ;;  %2311 = vmatprep.subr.bf16.mxu0 %v1757_v22  ;;  %2475 = vmatprep.subr.bf16.mxu1 %v1759_v26  ;;  %v1758_v8 = vld [vmem:[#allocation3 + $0x10] sm:$0xff]  ;;  %v1765_v32 = vld [vmem:[#allocation3 + $0x48] sm:$0xff]  ;;  %s3029_s14 = sshll.u32 %s3625_s1, 4  ;;  %s3030_s14 = int_to_ptr.vmem [resolvable:$true] %s3029_s14 }
 0x95a   :  { %v1767_v33 = vld [vmem:[#allocation3 + $0x58] sm:$0xff]  ;;  %2312 = vmatpush1.bf16.msra.mxu0 %v1756_v27  ;;  %2476 = vmatpush1.bf16.msra.mxu1 %v1758_v8  ;;  %v1764_v34 = vld [vmem:[#allocation3 + $0x40] sm:$0xff]  ;;  %v1766_v35 = vld [vmem:[#allocation3 + $0x50] sm:$0xff]  ;;  %s3560_s23 = scalar_lea.vmem %s3030_s14, 1024  ;;  %p3565_p9 = scmp.lt.s32.totalorder %s3030_s14, %s3030_s14 }
 0x95b   :  { %2313 = vmatprep.subr.bf16.mxu0 %v1765_v32  ;;  %2477 = vmatprep.subr.bf16.mxu1 %v1767_v33  ;;  %v1773_v0 = vld [vmem:[#allocation3 + $0x88] sm:$0xff]  ;;  %v1775_v36 = vld [vmem:[#allocation3 + $0x98] sm:$0xff]  ;;  %v1772_v37 = vld [vmem:[#allocation3 + $0x80] sm:$0xff]  ;;  %p3561_p8 = scmp.ne.s32.totalorder %s3030_s14, %s3560_s23  ;;  %p3566_p10 = scmp.lt.s32.totalorder %s3560_s23, %s3560_s23 }
 0x95c   :  { %v1774_v6 = vld [vmem:[#allocation3 + $0x90] sm:$0xff]  ;;  %v1781_v38 = vld [vmem:[#allocation3 + $0xc8] sm:$0xff]  ;;  %v1783_v39 = vld [vmem:[#allocation3 + $0xd8] sm:$0xff] }
 0x95d   :  { %v1780_v40 = vld [vmem:[#allocation3 + $0xc0] sm:$0xff]  ;;  %v1782_v41 = vld [vmem:[#allocation3 + $0xd0] sm:$0xff]  ;;  %v1789_v42 = vld [vmem:[#allocation3 + $0x108] sm:$0xff]  ;;  %p3567_p11 = por %p3566_p10, %p3565_p9 }
 0x95e   :  { %2314 = vmatpush1.bf16.msra.mxu0 %v1764_v34  ;;  %2478 = vmatpush1.bf16.msra.mxu1 %v1766_v35  ;;  %v1791_v43 = vld [vmem:[#allocation3 + $0x118] sm:$0xff]  ;;  %v1788_v44 = vld [vmem:[#allocation3 + $0x100] sm:$0xff]  ;;  %v1790_v45 = vld [vmem:[#allocation3 + $0x110] sm:$0xff] }
 0x95f   :  { %2315 = vmatprep.subr.bf16.mxu0 %v1773_v0  ;;  %2479 = vmatprep.subr.bf16.mxu1 %v1775_v36  ;;  %v1797_v47 = vld [vmem:[#allocation3 + $0x148] sm:$0xff]  ;;  %v1799_v48 = vld [vmem:[#allocation3 + $0x158] sm:$0xff]  ;;  %v1796_v49 = vld [vmem:[#allocation3 + $0x140] sm:$0xff]  ;;  %p3568_p12 = pnand %p3567_p11, %p3561_p8 }
 0x960   :  { %v1798_v51 = vld [vmem:[#allocation3 + $0x150] sm:$0xff]  ;;  %v1805_v53 = vld [vmem:[#allocation3 + $0x188] sm:$0xff]  ;;  %v1807_v54 = vld [vmem:[#allocation3 + $0x198] sm:$0xff] }
 0x961   :  { %v1804_v55 = vld [vmem:[#allocation3 + $0x180] sm:$0xff]  ;;  %v1806_v56 = vld [vmem:[#allocation3 + $0x190] sm:$0xff]  ;;  %v1813_v57 = vld [vmem:[#allocation3 + $0x1c8] sm:$0xff] }
 0x962   :  { %2316 = vmatpush1.bf16.msra.mxu0 %v1772_v37  ;;  %2480 = vmatpush1.bf16.msra.mxu1 %v1774_v6  ;;  %v1815_v58 = vld [vmem:[#allocation3 + $0x1d8] sm:$0xff]  ;;  %v1812_v59 = vld [vmem:[#allocation3 + $0x1c0] sm:$0xff]  ;;  %v1814_v60 = vld [vmem:[#allocation3 + $0x1d0] sm:$0xff] }
 0x963   :  { %2317 = vmatprep.subr.bf16.mxu0 %v1781_v38  ;;  %2481 = vmatprep.subr.bf16.mxu1 %v1783_v39  ;;  %v1821_v61 = vld [vmem:[#allocation3 + $0x208] sm:$0xff]  ;;  %v1823_v62 = vld [vmem:[#allocation3 + $0x218] sm:$0xff]  ;;  %v1820_v63 = vld [vmem:[#allocation3 + $0x200] sm:$0xff] }
 0x964   :  { %v1822_v23 = vld [vmem:[#allocation3 + $0x210] sm:$0xff]  ;;  %v1829_v30 = vld [vmem:[#allocation3 + $0x248] sm:$0xff]  ;;  %v1831_v1 = vld [vmem:[#allocation3 + $0x258] sm:$0xff] }
 0x965   :  { %v1828_v2 = vld [vmem:[#allocation3 + $0x240] sm:$0xff]  ;;  %v1830_v4 = vld [vmem:[#allocation3 + $0x250] sm:$0xff]  ;;  %v1837_v7 = vld [vmem:[#allocation3 + $0x288] sm:$0xff] }
 0x966   :  { %2318 = vmatpush1.bf16.msra.mxu0 %v1780_v40  ;;  %2482 = vmatpush1.bf16.msra.mxu1 %v1782_v41  ;;  %v1839_v9 = vld [vmem:[#allocation3 + $0x298] sm:$0xff]  ;;  %v1836_v21 = vld [vmem:[#allocation3 + $0x280] sm:$0xff]  ;;  %v1838_v25 = vld [vmem:[#allocation3 + $0x290] sm:$0xff] }
 0x967   :  { %2319 = vmatprep.subr.bf16.mxu0 %v1789_v42  ;;  %2483 = vmatprep.subr.bf16.mxu1 %v1791_v43  ;;  %v1845_v10 = vld [vmem:[#allocation3 + $0x2c8] sm:$0xff]  ;;  %v1847_v11 = vld [vmem:[#allocation3 + $0x2d8] sm:$0xff]  ;;  %v1844_v12 = vld [vmem:[#allocation3 + $0x2c0] sm:$0xff] }
 0x968   :  { %v1846_v15 = vld [vmem:[#allocation3 + $0x2d0] sm:$0xff]  ;;  %v1853_v16 = vld [vmem:[#allocation3 + $0x308] sm:$0xff]  ;;  %v1855_v18 = vld [vmem:[#allocation3 + $0x318] sm:$0xff] }
 0x969   :  { %v1852_v19 = vld [vmem:[#allocation3 + $0x300] sm:$0xff]  ;;  %v1854_v17 = vld [vmem:[#allocation3 + $0x310] sm:$0xff]  ;;  %v1861_v3 = vld [vmem:[#allocation3 + $0x348] sm:$0xff] }
 0x96a   :  { %2320 = vmatpush1.bf16.msra.mxu0 %v1788_v44  ;;  %2484 = vmatpush1.bf16.msra.mxu1 %v1790_v45  ;;  %v1863_v22 = vld [vmem:[#allocation3 + $0x358] sm:$0xff]  ;;  %v1860_v26 = vld [vmem:[#allocation3 + $0x340] sm:$0xff]  ;;  %v1862_v27 = vld [vmem:[#allocation3 + $0x350] sm:$0xff] }
 0x96b   :  { %2321 = vmatprep.subr.bf16.mxu0 %v1797_v47  ;;  %2485 = vmatprep.subr.bf16.mxu1 %v1799_v48  ;;  %v1869_v8 = vld [vmem:[#allocation3 + $0x388] sm:$0xff]  ;;  %v1871_v32 = vld [vmem:[#allocation3 + $0x398] sm:$0xff]  ;;  %v1868_v33 = vld [vmem:[#allocation3 + $0x380] sm:$0xff] }
 0x96c   :  { %v1870_v34 = vld [vmem:[#allocation3 + $0x390] sm:$0xff]  ;;  %v1877_v35 = vld [vmem:[#allocation3 + $0x3c8] sm:$0xff]  ;;  %v1879_v0 = vld [vmem:[#allocation3 + $0x3d8] sm:$0xff] }
 0x96d   :  { %v1876_v36 = vld [vmem:[#allocation3 + $0x3c0] sm:$0xff]  ;;  %v1878_v37 = vld [vmem:[#allocation3 + $0x3d0] sm:$0xff]  ;;  %v1885_v6 = vld [vmem:[#allocation3 + $0x408] sm:$0xff] }
 0x96e   :  { %2322 = vmatpush1.bf16.msra.mxu0 %v1796_v49  ;;  %2486 = vmatpush1.bf16.msra.mxu1 %v1798_v51  ;;  %v1887_v38 = vld [vmem:[#allocation3 + $0x418] sm:$0xff]  ;;  %v1884_v39 = vld [vmem:[#allocation3 + $0x400] sm:$0xff]  ;;  %v1886_v40 = vld [vmem:[#allocation3 + $0x410] sm:$0xff] }
 0x96f   :  { %2323 = vmatprep.subr.bf16.mxu0 %v1805_v53  ;;  %2487 = vmatprep.subr.bf16.mxu1 %v1807_v54  ;;  %v1893_v41 = vld [vmem:[#allocation3 + $0x448] sm:$0xff]  ;;  %v1895_v42 = vld [vmem:[#allocation3 + $0x458] sm:$0xff]  ;;  %v1892_v43 = vld [vmem:[#allocation3 + $0x440] sm:$0xff] }
 0x970   :  { %v1894_v44 = vld [vmem:[#allocation3 + $0x450] sm:$0xff]  ;;  %v1901_v45 = vld [vmem:[#allocation3 + $0x488] sm:$0xff]  ;;  %v1903_v47 = vld [vmem:[#allocation3 + $0x498] sm:$0xff] }
 0x971   :  { %v1900_v48 = vld [vmem:[#allocation3 + $0x480] sm:$0xff]  ;;  %v1902_v49 = vld [vmem:[#allocation3 + $0x490] sm:$0xff]  ;;  %v1909_v51 = vld [vmem:[#allocation3 + $0x4c8] sm:$0xff] }
 0x972   :  { %2324 = vmatpush1.bf16.msra.mxu0 %v1804_v55  ;;  %2488 = vmatpush1.bf16.msra.mxu1 %v1806_v56  ;;  %v1911_v53 = vld [vmem:[#allocation3 + $0x4d8] sm:$0xff]  ;;  %v1908_v54 = vld [vmem:[#allocation3 + $0x4c0] sm:$0xff]  ;;  %v1910_v55 = vld [vmem:[#allocation3 + $0x4d0] sm:$0xff] }
 0x973   :  { %2325 = vmatprep.subr.bf16.mxu0 %v1813_v57  ;;  %2489 = vmatprep.subr.bf16.mxu1 %v1815_v58  ;;  %v1917_v56 = vld [vmem:[#allocation3 + $0x508] sm:$0xff]  ;;  %v1919_v57 = vld [vmem:[#allocation3 + $0x518] sm:$0xff]  ;;  %v1916_v58 = vld [vmem:[#allocation3 + $0x500] sm:$0xff] }
 0x976   :  { %2326 = vmatpush1.bf16.msra.mxu0 %v1812_v59  ;;  %2490 = vmatpush1.bf16.msra.mxu1 %v1814_v60  ;;  %v1918_v59 = vld [vmem:[#allocation3 + $0x510] sm:$0xff]  ;;  %v1925_v60 = vld [vmem:[#allocation3 + $0x548] sm:$0xff] }
 0x977   :  { %2327 = vmatprep.subr.bf16.mxu0 %v1821_v61  ;;  %2491 = vmatprep.subr.bf16.mxu1 %v1823_v62  ;;  %v1927_v61 = vld [vmem:[#allocation3 + $0x558] sm:$0xff]  ;;  %v1924_v62 = vld [vmem:[#allocation3 + $0x540] sm:$0xff] }
 0x97a   :  { %2328 = vmatpush1.bf16.msra.mxu0 %v1820_v63  ;;  %2492 = vmatpush1.bf16.msra.mxu1 %v1822_v23  ;;  %v1926_v63 = vld [vmem:[#allocation3 + $0x550] sm:$0xff]  ;;  %v1933_v23 = vld [vmem:[#allocation3 + $0x588] sm:$0xff] }
 0x97b   :  { %2329 = vmatprep.subr.bf16.mxu0 %v1829_v30  ;;  %2493 = vmatprep.subr.bf16.mxu1 %v1831_v1  ;;  %v1935_v30 = vld [vmem:[#allocation3 + $0x598] sm:$0xff]  ;;  %v1932_v1 = vld [vmem:[#allocation3 + $0x580] sm:$0xff] }
 0x97e   :  { %2330 = vmatpush1.bf16.msra.mxu0 %v1828_v2  ;;  %2494 = vmatpush1.bf16.msra.mxu1 %v1830_v4  ;;  %v1934_v2 = vld [vmem:[#allocation3 + $0x590] sm:$0xff]  ;;  %v1941_v4 = vld [vmem:[#allocation3 + $0x5c8] sm:$0xff] }
 0x97f   :  { %2331 = vmatprep.subr.bf16.mxu0 %v1837_v7  ;;  %2495 = vmatprep.subr.bf16.mxu1 %v1839_v9  ;;  %v1943_v7 = vld [vmem:[#allocation3 + $0x5d8] sm:$0xff]  ;;  %v1940_v9 = vld [vmem:[#allocation3 + $0x5c0] sm:$0xff] }
 0x982   :  { %2332 = vmatpush1.bf16.msra.mxu0 %v1836_v21  ;;  %2496 = vmatpush1.bf16.msra.mxu1 %v1838_v25  ;;  %v1942_v21 = vld [vmem:[#allocation3 + $0x5d0] sm:$0xff]  ;;  %v1949_v25 = vld [vmem:[#allocation3 + $0x608] sm:$0xff] }
 0x983   :  { %2333 = vmatprep.subr.bf16.mxu0 %v1845_v10  ;;  %2497 = vmatprep.subr.bf16.mxu1 %v1847_v11  ;;  %v1951_v10 = vld [vmem:[#allocation3 + $0x618] sm:$0xff]  ;;  %v1948_v11 = vld [vmem:[#allocation3 + $0x600] sm:$0xff] }
 0x986   :  { %2334 = vmatpush1.bf16.msra.mxu0 %v1844_v12  ;;  %2498 = vmatpush1.bf16.msra.mxu1 %v1846_v15  ;;  %v1950_v12 = vld [vmem:[#allocation3 + $0x610] sm:$0xff]  ;;  %v1957_v15 = vld [vmem:[#allocation3 + $0x648] sm:$0xff] }
 0x987   :  { %2335 = vmatprep.subr.bf16.mxu0 %v1853_v16  ;;  %2499 = vmatprep.subr.bf16.mxu1 %v1855_v18  ;;  %v1959_v16 = vld [vmem:[#allocation3 + $0x658] sm:$0xff]  ;;  %v1956_v18 = vld [vmem:[#allocation3 + $0x640] sm:$0xff] }
 0x98a   :  { %2336 = vmatpush1.bf16.msra.mxu0 %v1852_v19  ;;  %2500 = vmatpush1.bf16.msra.mxu1 %v1854_v17  ;;  %v1958_v19 = vld [vmem:[#allocation3 + $0x650] sm:$0xff]  ;;  %v1965_v17 = vld [vmem:[#allocation3 + $0x688] sm:$0xff] }
 0x98b   :  { %2337 = vmatprep.subr.bf16.mxu0 %v1861_v3  ;;  %2501 = vmatprep.subr.bf16.mxu1 %v1863_v22  ;;  %v1967_v3 = vld [vmem:[#allocation3 + $0x698] sm:$0xff]  ;;  %v1964_v22 = vld [vmem:[#allocation3 + $0x680] sm:$0xff] }
 0x98e   :  { %2338 = vmatpush1.bf16.msra.mxu0 %v1860_v26  ;;  %2502 = vmatpush1.bf16.msra.mxu1 %v1862_v27  ;;  %v1966_v26 = vld [vmem:[#allocation3 + $0x690] sm:$0xff]  ;;  %v1973_v27 = vld [vmem:[#allocation3 + $0x6c8] sm:$0xff] }
 0x98f   :  { %2339 = vmatprep.subr.bf16.mxu0 %v1869_v8  ;;  %2503 = vmatprep.subr.bf16.mxu1 %v1871_v32  ;;  %v1975_v8 = vld [vmem:[#allocation3 + $0x6d8] sm:$0xff]  ;;  %v1972_v32 = vld [vmem:[#allocation3 + $0x6c0] sm:$0xff] }
 0x992   :  { %2340 = vmatpush1.bf16.msra.mxu0 %v1868_v33  ;;  %2504 = vmatpush1.bf16.msra.mxu1 %v1870_v34  ;;  %v1974_v33 = vld [vmem:[#allocation3 + $0x6d0] sm:$0xff]  ;;  %v1981_v34 = vld [vmem:[#allocation3 + $0x708] sm:$0xff] }
 0x993   :  { %2341 = vmatprep.subr.bf16.mxu0 %v1877_v35  ;;  %2505 = vmatprep.subr.bf16.mxu1 %v1879_v0  ;;  %v1983_v35 = vld [vmem:[#allocation3 + $0x718] sm:$0xff]  ;;  %v1980_v0 = vld [vmem:[#allocation3 + $0x700] sm:$0xff] }
 0x996   :  { %2342 = vmatpush1.bf16.msra.mxu0 %v1876_v36  ;;  %2506 = vmatpush1.bf16.msra.mxu1 %v1878_v37  ;;  %v1982_v36 = vld [vmem:[#allocation3 + $0x710] sm:$0xff]  ;;  %v1989_v37 = vld [vmem:[#allocation3 + $0x748] sm:$0xff] }
 0x997   :  { %2352 = vmatprep.subr.bf16.mxu0 %v1885_v6  ;;  %2516 = vmatprep.subr.bf16.mxu1 %v1887_v38  ;;  %v1991_v6 = vld [vmem:[#allocation3 + $0x758] sm:$0xff]  ;;  %v1988_v38 = vld [vmem:[#allocation3 + $0x740] sm:$0xff] }
 0x999   :  { %2344 = vmatmul.mubr.bf16.vlgmr.msra.gmra.mrb[20].mxu0 %v3939_v28  ;;  %2508 = vmatmul.mubr.bf16.vlgmr.msra.gmra.mrb[12].mxu1 %v3939_v28 }
 0x99a   :  { %2353 = vmatpush1.bf16.msra.mxu0 %v1884_v39  ;;  %2517 = vmatpush1.bf16.msra.mxu1 %v1886_v40  ;;  %v1990_v39 = vld [vmem:[#allocation3 + $0x750] sm:$0xff]  ;;  %v1997_v40 = vld [vmem:[#allocation3 + $0x788] sm:$0xff] }
 0x99b   :  { %2354 = vmatprep.subr.bf16.mxu0 %v1893_v41  ;;  %2518 = vmatprep.subr.bf16.mxu1 %v1895_v42  ;;  %v1999_v41 = vld [vmem:[#allocation3 + $0x798] sm:$0xff]  ;;  %v1996_v42 = vld [vmem:[#allocation3 + $0x780] sm:$0xff] }
 0x99c   :  { %2384 = vmatprep.mubr.bf16.mxu0 %v3937_v5  ;;  %2548 = vmatprep.mubr.bf16.mxu1 %v3937_v5 }
 0x99e   :  { %2355 = vmatpush1.bf16.msra.mxu0 %v1892_v43  ;;  %2519 = vmatpush1.bf16.msra.mxu1 %v1894_v44  ;;  %v1998_v43 = vld [vmem:[#allocation3 + $0x790] sm:$0xff]  ;;  %v2005_v44 = vld [vmem:[#allocation3 + $0x7c8] sm:$0xff] }
 0x99f   :  { %2356 = vmatprep.subr.bf16.mxu0 %v1901_v45  ;;  %2520 = vmatprep.subr.bf16.mxu1 %v1903_v47  ;;  %v2007_v45 = vld [vmem:[#allocation3 + $0x7d8] sm:$0xff]  ;;  %v2004_v47 = vld [vmem:[#allocation3 + $0x7c0] sm:$0xff] }
 0x9a2   :  { %2357 = vmatpush1.bf16.msra.mxu0 %v1900_v48  ;;  %2521 = vmatpush1.bf16.msra.mxu1 %v1902_v49  ;;  %v2006_v48 = vld [vmem:[#allocation3 + $0x7d0] sm:$0xff]  ;;  %v2013_v49 = vld [vmem:[#allocation3 + $0x808] sm:$0xff] }
 0x9a3   :  { %2358 = vmatprep.subr.bf16.mxu0 %v1909_v51  ;;  %2522 = vmatprep.subr.bf16.mxu1 %v1911_v53  ;;  %v2015_v51 = vld [vmem:[#allocation3 + $0x818] sm:$0xff]  ;;  %v2012_v53 = vld [vmem:[#allocation3 + $0x800] sm:$0xff] }
 0x9a6   :  { %2359 = vmatpush1.bf16.msra.mxu0 %v1908_v54  ;;  %2523 = vmatpush1.bf16.msra.mxu1 %v1910_v55  ;;  %v2014_v54 = vld [vmem:[#allocation3 + $0x810] sm:$0xff]  ;;  %v2021_v55 = vld [vmem:[#allocation3 + $0x848] sm:$0xff] }
 0x9a7   :  { %2360 = vmatprep.subr.bf16.mxu0 %v1917_v56  ;;  %2524 = vmatprep.subr.bf16.mxu1 %v1919_v57  ;;  %v2023_v56 = vld [vmem:[#allocation3 + $0x858] sm:$0xff]  ;;  %v2020_v57 = vld [vmem:[#allocation3 + $0x840] sm:$0xff] }
 0x9aa   :  { %2361 = vmatpush1.bf16.msra.mxu0 %v1916_v58  ;;  %2525 = vmatpush1.bf16.msra.mxu1 %v1918_v59  ;;  %v2022_v58 = vld [vmem:[#allocation3 + $0x850] sm:$0xff]  ;;  %v2029_v59 = vld [vmem:[#allocation3 + $0x888] sm:$0xff] }
 0x9ab   :  { %2362 = vmatprep.subr.bf16.mxu0 %v1925_v60  ;;  %2526 = vmatprep.subr.bf16.mxu1 %v1927_v61  ;;  %v2031_v60 = vld [vmem:[#allocation3 + $0x898] sm:$0xff]  ;;  %v2028_v61 = vld [vmem:[#allocation3 + $0x880] sm:$0xff] }
 0x9ae   :  { %2363 = vmatpush1.bf16.msra.mxu0 %v1924_v62  ;;  %2527 = vmatpush1.bf16.msra.mxu1 %v1926_v63  ;;  %v2030_v62 = vld [vmem:[#allocation3 + $0x890] sm:$0xff]  ;;  %v2037_v63 = vld [vmem:[#allocation3 + $0x8c8] sm:$0xff] }
 0x9af   :  { %2364 = vmatprep.subr.bf16.mxu0 %v1933_v23  ;;  %2528 = vmatprep.subr.bf16.mxu1 %v1935_v30  ;;  %v2039_v23 = vld [vmem:[#allocation3 + $0x8d8] sm:$0xff]  ;;  %v2036_v30 = vld [vmem:[#allocation3 + $0x8c0] sm:$0xff] }
 0x9b2   :  { %2365 = vmatpush1.bf16.msra.mxu0 %v1932_v1  ;;  %2529 = vmatpush1.bf16.msra.mxu1 %v1934_v2  ;;  %v2038_v1 = vld [vmem:[#allocation3 + $0x8d0] sm:$0xff]  ;;  %v2045_v2 = vld [vmem:[#allocation3 + $0x908] sm:$0xff] }
 0x9b3   :  { %2366 = vmatprep.subr.bf16.mxu0 %v1941_v4  ;;  %2530 = vmatprep.subr.bf16.mxu1 %v1943_v7  ;;  %v2047_v4 = vld [vmem:[#allocation3 + $0x918] sm:$0xff]  ;;  %v2044_v7 = vld [vmem:[#allocation3 + $0x900] sm:$0xff] }
 0x9b6   :  { %2367 = vmatpush1.bf16.msra.mxu0 %v1940_v9  ;;  %2531 = vmatpush1.bf16.msra.mxu1 %v1942_v21  ;;  %v2046_v9 = vld [vmem:[#allocation3 + $0x910] sm:$0xff]  ;;  %v2053_v21 = vld [vmem:[#allocation3 + $0x948] sm:$0xff] }
 0x9b7   :  { %2368 = vmatprep.subr.bf16.mxu0 %v1949_v25  ;;  %2532 = vmatprep.subr.bf16.mxu1 %v1951_v10  ;;  %v2055_v25 = vld [vmem:[#allocation3 + $0x958] sm:$0xff]  ;;  %v2052_v10 = vld [vmem:[#allocation3 + $0x940] sm:$0xff] }
 0x9ba   :  { %2369 = vmatpush1.bf16.msra.mxu0 %v1948_v11  ;;  %2533 = vmatpush1.bf16.msra.mxu1 %v1950_v12  ;;  %v2054_v11 = vld [vmem:[#allocation3 + $0x950] sm:$0xff]  ;;  %v2061_v12 = vld [vmem:[#allocation3 + $0x988] sm:$0xff] }
 0x9bb   :  { %2370 = vmatprep.subr.bf16.mxu0 %v1957_v15  ;;  %2534 = vmatprep.subr.bf16.mxu1 %v1959_v16  ;;  %v2063_v15 = vld [vmem:[#allocation3 + $0x998] sm:$0xff]  ;;  %v2060_v16 = vld [vmem:[#allocation3 + $0x980] sm:$0xff] }
 0x9be   :  { %2371 = vmatpush1.bf16.msra.mxu0 %v1956_v18  ;;  %2535 = vmatpush1.bf16.msra.mxu1 %v1958_v19  ;;  %v2062_v18 = vld [vmem:[#allocation3 + $0x990] sm:$0xff]  ;;  %v2069_v19 = vld [vmem:[#allocation3 + $0x9c8] sm:$0xff] }
 0x9bf   :  { %2372 = vmatprep.subr.bf16.mxu0 %v1965_v17  ;;  %2536 = vmatprep.subr.bf16.mxu1 %v1967_v3  ;;  %v2071_v17 = vld [vmem:[#allocation3 + $0x9d8] sm:$0xff]  ;;  %v2068_v3 = vld [vmem:[#allocation3 + $0x9c0] sm:$0xff] }
 0x9c2   :  { %2373 = vmatpush1.bf16.msra.mxu0 %v1964_v22  ;;  %2537 = vmatpush1.bf16.msra.mxu1 %v1966_v26  ;;  %v2070_v22 = vld [vmem:[#allocation3 + $0x9d0] sm:$0xff]  ;;  %v2077_v26 = vld [vmem:[#allocation3 + $0xa08] sm:$0xff] }
 0x9c3   :  { %2374 = vmatprep.subr.bf16.mxu0 %v1973_v27  ;;  %2538 = vmatprep.subr.bf16.mxu1 %v1975_v8  ;;  %v2079_v27 = vld [vmem:[#allocation3 + $0xa18] sm:$0xff]  ;;  %v2076_v8 = vld [vmem:[#allocation3 + $0xa00] sm:$0xff] }
 0x9c6   :  { %2375 = vmatpush1.bf16.msra.mxu0 %v1972_v32  ;;  %2539 = vmatpush1.bf16.msra.mxu1 %v1974_v33  ;;  %v2078_v32 = vld [vmem:[#allocation3 + $0xa10] sm:$0xff]  ;;  %v2085_v33 = vld [vmem:[#allocation3 + $0xa48] sm:$0xff] }
 0x9c7   :  { %2376 = vmatprep.subr.bf16.mxu0 %v1981_v34  ;;  %2540 = vmatprep.subr.bf16.mxu1 %v1983_v35  ;;  %v2087_v34 = vld [vmem:[#allocation3 + $0xa58] sm:$0xff]  ;;  %v2084_v35 = vld [vmem:[#allocation3 + $0xa40] sm:$0xff] }
 0x9ca   :  { %2377 = vmatpush1.bf16.msra.mxu0 %v1980_v0  ;;  %2541 = vmatpush1.bf16.msra.mxu1 %v1982_v36  ;;  %v2086_v0 = vld [vmem:[#allocation3 + $0xa50] sm:$0xff]  ;;  %v2093_v36 = vld [vmem:[#allocation3 + $0xa88] sm:$0xff] }
 0x9cb   :  { %2378 = vmatprep.subr.bf16.mxu0 %v1989_v37  ;;  %2542 = vmatprep.subr.bf16.mxu1 %v1991_v6  ;;  %v2095_v37 = vld [vmem:[#allocation3 + $0xa98] sm:$0xff]  ;;  %v2092_v6 = vld [vmem:[#allocation3 + $0xa80] sm:$0xff] }
 0x9ce   :  { %2379 = vmatpush1.bf16.msra.mxu0 %v1988_v38  ;;  %2543 = vmatpush1.bf16.msra.mxu1 %v1990_v39  ;;  %v2094_v38 = vld [vmem:[#allocation3 + $0xa90] sm:$0xff]  ;;  %v2101_v39 = vld [vmem:[#allocation3 + $0xac8] sm:$0xff] }
 0x9cf   :  { %2380 = vmatprep.subr.bf16.mxu0 %v1997_v40  ;;  %2544 = vmatprep.subr.bf16.mxu1 %v1999_v41  ;;  %v2103_v40 = vld [vmem:[#allocation3 + $0xad8] sm:$0xff]  ;;  %v2100_v41 = vld [vmem:[#allocation3 + $0xac0] sm:$0xff] }
 0x9d2   :  { %2381 = vmatpush1.bf16.msra.mxu0 %v1996_v42  ;;  %2545 = vmatpush1.bf16.msra.mxu1 %v1998_v43  ;;  %v2102_v42 = vld [vmem:[#allocation3 + $0xad0] sm:$0xff]  ;;  %v2109_v43 = vld [vmem:[#allocation3 + $0xb08] sm:$0xff] }
 0x9d3   :  { %2382 = vmatprep.subr.bf16.mxu0 %v2005_v44  ;;  %2546 = vmatprep.subr.bf16.mxu1 %v2007_v45  ;;  %v2111_v44 = vld [vmem:[#allocation3 + $0xb18] sm:$0xff]  ;;  %v2108_v45 = vld [vmem:[#allocation3 + $0xb00] sm:$0xff] }
 0x9d6   :  { %2383 = vmatpush1.bf16.msra.mxu0 %v2004_v47  ;;  %2547 = vmatpush1.bf16.msra.mxu1 %v2006_v48  ;;  %v2110_v47 = vld [vmem:[#allocation3 + $0xb10] sm:$0xff]  ;;  %v2117_v48 = vld [vmem:[#allocation3 + $0xb48] sm:$0xff] }
 0x9d7   :  { %2393 = vmatprep.subr.bf16.mxu0 %v2013_v49  ;;  %2557 = vmatprep.subr.bf16.mxu1 %v2015_v51  ;;  %v2119_v49 = vld [vmem:[#allocation3 + $0xb58] sm:$0xff]  ;;  %v2116_v51 = vld [vmem:[#allocation3 + $0xb40] sm:$0xff] }
 0x9d9   :  { %2385 = vmatmul.mubr.bf16.vlgmr.msra.gmra.mrb[20].mxu0 %v3935_v24  ;;  %2549 = vmatmul.mubr.bf16.vlgmr.msra.gmra.mrb[12].mxu1 %v3935_v24 }
 0x9da   :  { %2394 = vmatpush1.bf16.msra.mxu0 %v2012_v53  ;;  %2558 = vmatpush1.bf16.msra.mxu1 %v2014_v54  ;;  %v2118_v53 = vld [vmem:[#allocation3 + $0xb50] sm:$0xff]  ;;  %v2125_v54 = vld [vmem:[#allocation3 + $0xb88] sm:$0xff] }
 0x9db   :  { %2395 = vmatprep.subr.bf16.mxu0 %v2021_v55  ;;  %2559 = vmatprep.subr.bf16.mxu1 %v2023_v56  ;;  %v2127_v55 = vld [vmem:[#allocation3 + $0xb98] sm:$0xff]  ;;  %v2124_v56 = vld [vmem:[#allocation3 + $0xb80] sm:$0xff] }
 0x9dc   :  { %2425 = vmatprep.mubr.bf16.mxu0 %v3957_v14  ;;  %2589 = vmatprep.mubr.bf16.mxu1 %v3957_v14 }
 0x9de   :  { %2396 = vmatpush1.bf16.msra.mxu0 %v2020_v57  ;;  %2560 = vmatpush1.bf16.msra.mxu1 %v2022_v58  ;;  %v2126_v57 = vld [vmem:[#allocation3 + $0xb90] sm:$0xff]  ;;  %v2133_v58 = vld [vmem:[#allocation3 + $0xbc8] sm:$0xff] }
 0x9df   :  { %2397 = vmatprep.subr.bf16.mxu0 %v2029_v59  ;;  %2561 = vmatprep.subr.bf16.mxu1 %v2031_v60  ;;  %v2135_v59 = vld [vmem:[#allocation3 + $0xbd8] sm:$0xff]  ;;  %v2132_v60 = vld [vmem:[#allocation3 + $0xbc0] sm:$0xff] }
 0x9e2   :  { %2398 = vmatpush1.bf16.msra.mxu0 %v2028_v61  ;;  %2562 = vmatpush1.bf16.msra.mxu1 %v2030_v62  ;;  %v2134_v61 = vld [vmem:[#allocation3 + $0xbd0] sm:$0xff]  ;;  %v2141_v62 = vld [vmem:[#allocation3 + $0xc08] sm:$0xff] }
 0x9e3   :  { %2399 = vmatprep.subr.bf16.mxu0 %v2037_v63  ;;  %2563 = vmatprep.subr.bf16.mxu1 %v2039_v23  ;;  %v2143_v63 = vld [vmem:[#allocation3 + $0xc18] sm:$0xff]  ;;  %v2140_v23 = vld [vmem:[#allocation3 + $0xc00] sm:$0xff] }
 0x9e6   :  { %2400 = vmatpush1.bf16.msra.mxu0 %v2036_v30  ;;  %2564 = vmatpush1.bf16.msra.mxu1 %v2038_v1  ;;  %v2142_v30 = vld [vmem:[#allocation3 + $0xc10] sm:$0xff]  ;;  %v2149_v1 = vld [vmem:[#allocation3 + $0xc48] sm:$0xff] }
 0x9e7   :  { %2401 = vmatprep.subr.bf16.mxu0 %v2045_v2  ;;  %2565 = vmatprep.subr.bf16.mxu1 %v2047_v4  ;;  %v2151_v2 = vld [vmem:[#allocation3 + $0xc58] sm:$0xff]  ;;  %v2148_v4 = vld [vmem:[#allocation3 + $0xc40] sm:$0xff] }
 0x9ea   :  { %2402 = vmatpush1.bf16.msra.mxu0 %v2044_v7  ;;  %2566 = vmatpush1.bf16.msra.mxu1 %v2046_v9  ;;  %v2150_v7 = vld [vmem:[#allocation3 + $0xc50] sm:$0xff]  ;;  %v2157_v9 = vld [vmem:[#allocation3 + $0xc88] sm:$0xff] }
 0x9eb   :  { %2403 = vmatprep.subr.bf16.mxu0 %v2053_v21  ;;  %2567 = vmatprep.subr.bf16.mxu1 %v2055_v25  ;;  %v2159_v21 = vld [vmem:[#allocation3 + $0xc98] sm:$0xff]  ;;  %v2156_v25 = vld [vmem:[#allocation3 + $0xc80] sm:$0xff] }
 0x9ee   :  { %2404 = vmatpush1.bf16.msra.mxu0 %v2052_v10  ;;  %2568 = vmatpush1.bf16.msra.mxu1 %v2054_v11  ;;  %v2158_v10 = vld [vmem:[#allocation3 + $0xc90] sm:$0xff]  ;;  %v2165_v11 = vld [vmem:[#allocation3 + $0xcc8] sm:$0xff] }
 0x9ef   :  { %2405 = vmatprep.subr.bf16.mxu0 %v2061_v12  ;;  %2569 = vmatprep.subr.bf16.mxu1 %v2063_v15  ;;  %v2167_v12 = vld [vmem:[#allocation3 + $0xcd8] sm:$0xff]  ;;  %v2164_v15 = vld [vmem:[#allocation3 + $0xcc0] sm:$0xff] }
 0x9f2   :  { %2406 = vmatpush1.bf16.msra.mxu0 %v2060_v16  ;;  %2570 = vmatpush1.bf16.msra.mxu1 %v2062_v18  ;;  %v2166_v16 = vld [vmem:[#allocation3 + $0xcd0] sm:$0xff]  ;;  %v2173_v18 = vld [vmem:[#allocation3 + $0xd08] sm:$0xff] }
 0x9f3   :  { %2407 = vmatprep.subr.bf16.mxu0 %v2069_v19  ;;  %2571 = vmatprep.subr.bf16.mxu1 %v2071_v17  ;;  %v2175_v19 = vld [vmem:[#allocation3 + $0xd18] sm:$0xff]  ;;  %v2172_v17 = vld [vmem:[#allocation3 + $0xd00] sm:$0xff] }
 0x9f6   :  { %2408 = vmatpush1.bf16.msra.mxu0 %v2068_v3  ;;  %2572 = vmatpush1.bf16.msra.mxu1 %v2070_v22  ;;  %v2174_v3 = vld [vmem:[#allocation3 + $0xd10] sm:$0xff]  ;;  %v2181_v22 = vld [vmem:[#allocation3 + $0xd48] sm:$0xff] }
 0x9f7   :  { %2409 = vmatprep.subr.bf16.mxu0 %v2077_v26  ;;  %2573 = vmatprep.subr.bf16.mxu1 %v2079_v27  ;;  %v2183_v26 = vld [vmem:[#allocation3 + $0xd58] sm:$0xff]  ;;  %v2180_v27 = vld [vmem:[#allocation3 + $0xd40] sm:$0xff] }
 0x9fa   :  { %2410 = vmatpush1.bf16.msra.mxu0 %v2076_v8  ;;  %2574 = vmatpush1.bf16.msra.mxu1 %v2078_v32  ;;  %v2182_v8 = vld [vmem:[#allocation3 + $0xd50] sm:$0xff]  ;;  %v2189_v32 = vld [vmem:[#allocation3 + $0xd88] sm:$0xff] }
 0x9fb   :  { %2411 = vmatprep.subr.bf16.mxu0 %v2085_v33  ;;  %2575 = vmatprep.subr.bf16.mxu1 %v2087_v34  ;;  %v2191_v33 = vld [vmem:[#allocation3 + $0xd98] sm:$0xff]  ;;  %v2188_v34 = vld [vmem:[#allocation3 + $0xd80] sm:$0xff] }
 0x9fe   :  { %2412 = vmatpush1.bf16.msra.mxu0 %v2084_v35  ;;  %2576 = vmatpush1.bf16.msra.mxu1 %v2086_v0  ;;  %v2190_v35 = vld [vmem:[#allocation3 + $0xd90] sm:$0xff]  ;;  %v2197_v0 = vld [vmem:[#allocation3 + $0xdc8] sm:$0xff] }
 0x9ff   :  { %2413 = vmatprep.subr.bf16.mxu0 %v2093_v36  ;;  %2577 = vmatprep.subr.bf16.mxu1 %v2095_v37  ;;  %v2199_v36 = vld [vmem:[#allocation3 + $0xdd8] sm:$0xff]  ;;  %v2196_v37 = vld [vmem:[#allocation3 + $0xdc0] sm:$0xff] }
 0xa02   :  { %2414 = vmatpush1.bf16.msra.mxu0 %v2092_v6  ;;  %2578 = vmatpush1.bf16.msra.mxu1 %v2094_v38  ;;  %v2198_v6 = vld [vmem:[#allocation3 + $0xdd0] sm:$0xff]  ;;  %v2205_v38 = vld [vmem:[#allocation3 + $0xe08] sm:$0xff] }
 0xa03   :  { %2415 = vmatprep.subr.bf16.mxu0 %v2101_v39  ;;  %2579 = vmatprep.subr.bf16.mxu1 %v2103_v40  ;;  %v2207_v39 = vld [vmem:[#allocation3 + $0xe18] sm:$0xff]  ;;  %v2204_v40 = vld [vmem:[#allocation3 + $0xe00] sm:$0xff] }
 0xa06   :  { %2416 = vmatpush1.bf16.msra.mxu0 %v2100_v41  ;;  %2580 = vmatpush1.bf16.msra.mxu1 %v2102_v42  ;;  %v2206_v41 = vld [vmem:[#allocation3 + $0xe10] sm:$0xff]  ;;  %v2213_v42 = vld [vmem:[#allocation3 + $0xe48] sm:$0xff] }
 0xa07   :  { %2417 = vmatprep.subr.bf16.mxu0 %v2109_v43  ;;  %2581 = vmatprep.subr.bf16.mxu1 %v2111_v44  ;;  %v2215_v43 = vld [vmem:[#allocation3 + $0xe58] sm:$0xff]  ;;  %v2212_v44 = vld [vmem:[#allocation3 + $0xe40] sm:$0xff] }
 0xa0a   :  { %2418 = vmatpush1.bf16.msra.mxu0 %v2108_v45  ;;  %2582 = vmatpush1.bf16.msra.mxu1 %v2110_v47  ;;  %v2214_v45 = vld [vmem:[#allocation3 + $0xe50] sm:$0xff]  ;;  %v2221_v47 = vld [vmem:[#allocation3 + $0xe88] sm:$0xff] }
 0xa0b   :  { %2419 = vmatprep.subr.bf16.mxu0 %v2117_v48  ;;  %2583 = vmatprep.subr.bf16.mxu1 %v2119_v49  ;;  %v2223_v48 = vld [vmem:[#allocation3 + $0xe98] sm:$0xff]  ;;  %v2220_v49 = vld [vmem:[#allocation3 + $0xe80] sm:$0xff] }
 0xa0e   :  { %2420 = vmatpush1.bf16.msra.mxu0 %v2116_v51  ;;  %2584 = vmatpush1.bf16.msra.mxu1 %v2118_v53  ;;  %v2222_v51 = vld [vmem:[#allocation3 + $0xe90] sm:$0xff]  ;;  %v2229_v53 = vld [vmem:[#allocation3 + $0xec8] sm:$0xff] }
 0xa0f   :  { %2421 = vmatprep.subr.bf16.mxu0 %v2125_v54  ;;  %2585 = vmatprep.subr.bf16.mxu1 %v2127_v55  ;;  %v2231_v54 = vld [vmem:[#allocation3 + $0xed8] sm:$0xff]  ;;  %v2228_v55 = vld [vmem:[#allocation3 + $0xec0] sm:$0xff] }
 0xa12   :  { %2422 = vmatpush1.bf16.msra.mxu0 %v2124_v56  ;;  %2586 = vmatpush1.bf16.msra.mxu1 %v2126_v57  ;;  %v2230_v56 = vld [vmem:[#allocation3 + $0xed0] sm:$0xff]  ;;  %v2237_v57 = vld [vmem:[#allocation3 + $0xf08] sm:$0xff] }
 0xa13   :  { %2423 = vmatprep.subr.bf16.mxu0 %v2133_v58  ;;  %2587 = vmatprep.subr.bf16.mxu1 %v2135_v59  ;;  %v2239_v58 = vld [vmem:[#allocation3 + $0xf18] sm:$0xff]  ;;  %v2236_v59 = vld [vmem:[#allocation3 + $0xf00] sm:$0xff] }
 0xa16   :  { %2424 = vmatpush1.bf16.msra.mxu0 %v2132_v60  ;;  %2588 = vmatpush1.bf16.msra.mxu1 %v2134_v61  ;;  %v2238_v60 = vld [vmem:[#allocation3 + $0xf10] sm:$0xff]  ;;  %v2245_v61 = vld [vmem:[#allocation3 + $0xf48] sm:$0xff] }
 0xa17   :  { %2434 = vmatprep.subr.bf16.mxu0 %v2141_v62  ;;  %2598 = vmatprep.subr.bf16.mxu1 %v2143_v63  ;;  %v2247_v62 = vld [vmem:[#allocation3 + $0xf58] sm:$0xff]  ;;  %v2244_v63 = vld [vmem:[#allocation3 + $0xf40] sm:$0xff] }
 0xa19   :  { %2426 = vmatmul.mubr.bf16.vlgmr.msra.gmra.mrb[20].mxu0 %v3955_v13  ;;  %2590 = vmatmul.mubr.bf16.vlgmr.msra.gmra.mrb[12].mxu1 %v3955_v13 }
 0xa1a   :  { %2435 = vmatpush1.bf16.msra.mxu0 %v2140_v23  ;;  %2599 = vmatpush1.bf16.msra.mxu1 %v2142_v30  ;;  %v2246_v23 = vld [vmem:[#allocation3 + $0xf50] sm:$0xff]  ;;  %v2253_v30 = vld [vmem:[#allocation3 + $0xf88] sm:$0xff] }
 0xa1b   :  { %2436 = vmatprep.subr.bf16.mxu0 %v2149_v1  ;;  %2600 = vmatprep.subr.bf16.mxu1 %v2151_v2  ;;  %v2255_v1 = vld [vmem:[#allocation3 + $0xf98] sm:$0xff]  ;;  %v2252_v2 = vld [vmem:[#allocation3 + $0xf80] sm:$0xff] }
 0xa1c   :  { %2466 = vmatprep.mubr.bf16.mxu0 %v3961_v20  ;;  %2630 = vmatprep.mubr.bf16.mxu1 %v3961_v20 }
 0xa1e   :  { %2437 = vmatpush1.bf16.msra.mxu0 %v2148_v4  ;;  %2601 = vmatpush1.bf16.msra.mxu1 %v2150_v7  ;;  %v2254_v4 = vld [vmem:[#allocation3 + $0xf90] sm:$0xff]  ;;  %v2261_v7 = vld [vmem:[#allocation3 + $0xfc8] sm:$0xff] }
 0xa1f   :  { %2438 = vmatprep.subr.bf16.mxu0 %v2157_v9  ;;  %2602 = vmatprep.subr.bf16.mxu1 %v2159_v21  ;;  %v2263_v9 = vld [vmem:[#allocation3 + $0xfd8] sm:$0xff]  ;;  %v2260_v21 = vld [vmem:[#allocation3 + $0xfc0] sm:$0xff] }
 0xa22   :  { %2439 = vmatpush1.bf16.msra.mxu0 %v2156_v25  ;;  %2603 = vmatpush1.bf16.msra.mxu1 %v2158_v10  ;;  %v2262_v25 = vld [vmem:[#allocation3 + $0xfd0] sm:$0xff]  ;;  %v1761_v10 = vld [vmem:[#allocation3 + $0x28] sm:$0xff] }
 0xa23   :  { %2440 = vmatprep.subr.bf16.mxu0 %v2165_v11  ;;  %2604 = vmatprep.subr.bf16.mxu1 %v2167_v12  ;;  %v1763_v11 = vld [vmem:[#allocation3 + $0x38] sm:$0xff]  ;;  %v1760_v12 = vld [vmem:[#allocation3 + $0x20] sm:$0xff] }
 0xa26   :  { %2441 = vmatpush1.bf16.msra.mxu0 %v2164_v15  ;;  %2605 = vmatpush1.bf16.msra.mxu1 %v2166_v16  ;;  %v1762_v15 = vld [vmem:[#allocation3 + $0x30] sm:$0xff]  ;;  %v1769_v16 = vld [vmem:[#allocation3 + $0x68] sm:$0xff] }
 0xa27   :  { %2442 = vmatprep.subr.bf16.mxu0 %v2173_v18  ;;  %2606 = vmatprep.subr.bf16.mxu1 %v2175_v19  ;;  %v1771_v18 = vld [vmem:[#allocation3 + $0x78] sm:$0xff]  ;;  %v1768_v19 = vld [vmem:[#allocation3 + $0x60] sm:$0xff] }
 0xa2a   :  { %2443 = vmatpush1.bf16.msra.mxu0 %v2172_v17  ;;  %2607 = vmatpush1.bf16.msra.mxu1 %v2174_v3  ;;  %v1770_v17 = vld [vmem:[#allocation3 + $0x70] sm:$0xff]  ;;  %v1777_v3 = vld [vmem:[#allocation3 + $0xa8] sm:$0xff] }
 0xa2b   :  { %2444 = vmatprep.subr.bf16.mxu0 %v2181_v22  ;;  %2608 = vmatprep.subr.bf16.mxu1 %v2183_v26  ;;  %v1779_v22 = vld [vmem:[#allocation3 + $0xb8] sm:$0xff]  ;;  %v1776_v26 = vld [vmem:[#allocation3 + $0xa0] sm:$0xff] }
 0xa2e   :  { %2445 = vmatpush1.bf16.msra.mxu0 %v2180_v27  ;;  %2609 = vmatpush1.bf16.msra.mxu1 %v2182_v8  ;;  %v1778_v27 = vld [vmem:[#allocation3 + $0xb0] sm:$0xff]  ;;  %v1785_v8 = vld [vmem:[#allocation3 + $0xe8] sm:$0xff] }
 0xa2f   :  { %2446 = vmatprep.subr.bf16.mxu0 %v2189_v32  ;;  %2610 = vmatprep.subr.bf16.mxu1 %v2191_v33  ;;  %v1787_v32 = vld [vmem:[#allocation3 + $0xf8] sm:$0xff]  ;;  %v1784_v33 = vld [vmem:[#allocation3 + $0xe0] sm:$0xff] }
 0xa32   :  { %2447 = vmatpush1.bf16.msra.mxu0 %v2188_v34  ;;  %2611 = vmatpush1.bf16.msra.mxu1 %v2190_v35  ;;  %v1786_v34 = vld [vmem:[#allocation3 + $0xf0] sm:$0xff]  ;;  %v1793_v35 = vld [vmem:[#allocation3 + $0x128] sm:$0xff] }
 0xa33   :  { %2448 = vmatprep.subr.bf16.mxu0 %v2197_v0  ;;  %2612 = vmatprep.subr.bf16.mxu1 %v2199_v36  ;;  %v1795_v0 = vld [vmem:[#allocation3 + $0x138] sm:$0xff]  ;;  %v1794_v36 = vld [vmem:[#allocation3 + $0x130] sm:$0xff] }
 0xa36   :  { %2449 = vmatpush1.bf16.msra.mxu0 %v2196_v37  ;;  %2613 = vmatpush1.bf16.msra.mxu1 %v2198_v6  ;;  %v1801_v37 = vld [vmem:[#allocation3 + $0x168] sm:$0xff]  ;;  %v1803_v6 = vld [vmem:[#allocation3 + $0x178] sm:$0xff] }
 0xa37   :  { %2450 = vmatprep.subr.bf16.mxu0 %v2205_v38  ;;  %2614 = vmatprep.subr.bf16.mxu1 %v2207_v39  ;;  %v1800_v38 = vld [vmem:[#allocation3 + $0x160] sm:$0xff]  ;;  %v1802_v39 = vld [vmem:[#allocation3 + $0x170] sm:$0xff] }
 0xa3a   :  { %2451 = vmatpush1.bf16.msra.mxu0 %v2204_v40  ;;  %2615 = vmatpush1.bf16.msra.mxu1 %v2206_v41  ;;  %v1809_v40 = vld [vmem:[#allocation3 + $0x1a8] sm:$0xff]  ;;  %v1811_v41 = vld [vmem:[#allocation3 + $0x1b8] sm:$0xff] }
 0xa3b   :  { %2452 = vmatprep.subr.bf16.mxu0 %v2213_v42  ;;  %2616 = vmatprep.subr.bf16.mxu1 %v2215_v43  ;;  %v1808_v42 = vld [vmem:[#allocation3 + $0x1a0] sm:$0xff]  ;;  %v1810_v43 = vld [vmem:[#allocation3 + $0x1b0] sm:$0xff] }
 0xa3e   :  { %2453 = vmatpush1.bf16.msra.mxu0 %v2212_v44  ;;  %2617 = vmatpush1.bf16.msra.mxu1 %v2214_v45  ;;  %v1817_v44 = vld [vmem:[#allocation3 + $0x1e8] sm:$0xff]  ;;  %v1819_v45 = vld [vmem:[#allocation3 + $0x1f8] sm:$0xff] }
 0xa3f   :  { %2454 = vmatprep.subr.bf16.mxu0 %v2221_v47  ;;  %2618 = vmatprep.subr.bf16.mxu1 %v2223_v48  ;;  %v1816_v47 = vld [vmem:[#allocation3 + $0x1e0] sm:$0xff]  ;;  %v1818_v48 = vld [vmem:[#allocation3 + $0x1f0] sm:$0xff] }
 0xa42   :  { %2455 = vmatpush1.bf16.msra.mxu0 %v2220_v49  ;;  %2619 = vmatpush1.bf16.msra.mxu1 %v2222_v51  ;;  %v1825_v49 = vld [vmem:[#allocation3 + $0x228] sm:$0xff]  ;;  %v1827_v51 = vld [vmem:[#allocation3 + $0x238] sm:$0xff] }
 0xa43   :  { %2456 = vmatprep.subr.bf16.mxu0 %v2229_v53  ;;  %2620 = vmatprep.subr.bf16.mxu1 %v2231_v54  ;;  %v1824_v53 = vld [vmem:[#allocation3 + $0x220] sm:$0xff]  ;;  %v1826_v54 = vld [vmem:[#allocation3 + $0x230] sm:$0xff] }
 0xa46   :  { %2457 = vmatpush1.bf16.msra.mxu0 %v2228_v55  ;;  %2621 = vmatpush1.bf16.msra.mxu1 %v2230_v56  ;;  %v1833_v55 = vld [vmem:[#allocation3 + $0x268] sm:$0xff]  ;;  %v1835_v56 = vld [vmem:[#allocation3 + $0x278] sm:$0xff] }
 0xa47   :  { %2458 = vmatprep.subr.bf16.mxu0 %v2237_v57  ;;  %2622 = vmatprep.subr.bf16.mxu1 %v2239_v58  ;;  %v1832_v57 = vld [vmem:[#allocation3 + $0x260] sm:$0xff]  ;;  %v1834_v58 = vld [vmem:[#allocation3 + $0x270] sm:$0xff] }
 0xa4a   :  { %2459 = vmatpush1.bf16.msra.mxu0 %v2236_v59  ;;  %2623 = vmatpush1.bf16.msra.mxu1 %v2238_v60  ;;  %v1841_v59 = vld [vmem:[#allocation3 + $0x2a8] sm:$0xff]  ;;  %v1843_v60 = vld [vmem:[#allocation3 + $0x2b8] sm:$0xff] }
 0xa4b   :  { %2460 = vmatprep.subr.bf16.mxu0 %v2245_v61  ;;  %2624 = vmatprep.subr.bf16.mxu1 %v2247_v62  ;;  %v1840_v61 = vld [vmem:[#allocation3 + $0x2a0] sm:$0xff]  ;;  %v1842_v62 = vld [vmem:[#allocation3 + $0x2b0] sm:$0xff] }
 0xa4e   :  { %2461 = vmatpush1.bf16.msra.mxu0 %v2244_v63  ;;  %2625 = vmatpush1.bf16.msra.mxu1 %v2246_v23  ;;  %v1849_v63 = vld [vmem:[#allocation3 + $0x2e8] sm:$0xff]  ;;  %v1851_v23 = vld [vmem:[#allocation3 + $0x2f8] sm:$0xff] }
 0xa4f   :  { %2462 = vmatprep.subr.bf16.mxu0 %v2253_v30  ;;  %2626 = vmatprep.subr.bf16.mxu1 %v2255_v1  ;;  %v1848_v30 = vld [vmem:[#allocation3 + $0x2e0] sm:$0xff]  ;;  %v1850_v1 = vld [vmem:[#allocation3 + $0x2f0] sm:$0xff] }
 0xa52   :  { %2463 = vmatpush1.bf16.msra.mxu0 %v2252_v2  ;;  %2627 = vmatpush1.bf16.msra.mxu1 %v2254_v4  ;;  %v1857_v2 = vld [vmem:[#allocation3 + $0x328] sm:$0xff]  ;;  %v1859_v4 = vld [vmem:[#allocation3 + $0x338] sm:$0xff] }
 0xa53   :  { %2464 = vmatprep.subr.bf16.mxu0 %v2261_v7  ;;  %2628 = vmatprep.subr.bf16.mxu1 %v2263_v9  ;;  %v1856_v7 = vld [vmem:[#allocation3 + $0x320] sm:$0xff]  ;;  %v1858_v9 = vld [vmem:[#allocation3 + $0x330] sm:$0xff] }
 0xa56   :  { %2465 = vmatpush1.bf16.msra.mxu0 %v2260_v21  ;;  %2629 = vmatpush1.bf16.msra.mxu1 %v2262_v25  ;;  %v1865_v21 = vld [vmem:[#allocation3 + $0x368] sm:$0xff]  ;;  %v1867_v25 = vld [vmem:[#allocation3 + $0x378] sm:$0xff] }
 0xa57   :  { %2639 = vmatprep.subr.bf16.mxu0 %v1761_v10  ;;  %2803 = vmatprep.subr.bf16.mxu1 %v1763_v11  ;;  %v1864_v10 = vld [vmem:[#allocation3 + $0x360] sm:$0xff]  ;;  %v1866_v11 = vld [vmem:[#allocation3 + $0x370] sm:$0xff] }
 0xa59   :  { %2467 = vmatmul.mubr.bf16.vlgmr.msra.gmra.mrb[20].mxu0 %v3959_v31  ;;  %2631 = vmatmul.mubr.bf16.vlgmr.msra.gmra.mrb[12].mxu1 %v3959_v31 }
 0xa5a   :  { %2640 = vmatpush1.bf16.msra.mxu0 %v1760_v12  ;;  %2804 = vmatpush1.bf16.msra.mxu1 %v1762_v15  ;;  %v1873_v12 = vld [vmem:[#allocation3 + $0x3a8] sm:$0xff]  ;;  %v1875_v15 = vld [vmem:[#allocation3 + $0x3b8] sm:$0xff] }
 0xa5b   :  { %2641 = vmatprep.subr.bf16.mxu0 %v1769_v16  ;;  %2805 = vmatprep.subr.bf16.mxu1 %v1771_v18  ;;  %v1872_v16 = vld [vmem:[#allocation3 + $0x3a0] sm:$0xff]  ;;  %v1874_v18 = vld [vmem:[#allocation3 + $0x3b0] sm:$0xff] }
 0xa5c   :  { %2671 = vmatprep.mubr.bf16.mxu0 %v3941_v29  ;;  %2835 = vmatprep.mubr.bf16.mxu1 %v3941_v29  ;;  %v1792_v29 = vld [vmem:[#allocation3 + $0x120] sm:$0xff] }
 0xa5e   :  { %2642 = vmatpush1.bf16.msra.mxu0 %v1768_v19  ;;  %2806 = vmatpush1.bf16.msra.mxu1 %v1770_v17  ;;  %v1881_v19 = vld [vmem:[#allocation3 + $0x3e8] sm:$0xff]  ;;  %v1883_v17 = vld [vmem:[#allocation3 + $0x3f8] sm:$0xff] }
 0xa5f   :  { %2643 = vmatprep.subr.bf16.mxu0 %v1777_v3  ;;  %2807 = vmatprep.subr.bf16.mxu1 %v1779_v22  ;;  %v1880_v3 = vld [vmem:[#allocation3 + $0x3e0] sm:$0xff]  ;;  %v1882_v22 = vld [vmem:[#allocation3 + $0x3f0] sm:$0xff] }
 0xa62   :  { %2644 = vmatpush1.bf16.msra.mxu0 %v1776_v26  ;;  %2808 = vmatpush1.bf16.msra.mxu1 %v1778_v27  ;;  %v1889_v26 = vld [vmem:[#allocation3 + $0x428] sm:$0xff]  ;;  %v1891_v27 = vld [vmem:[#allocation3 + $0x438] sm:$0xff] }
 0xa63   :  { %2645 = vmatprep.subr.bf16.mxu0 %v1785_v8  ;;  %2809 = vmatprep.subr.bf16.mxu1 %v1787_v32  ;;  %v1888_v8 = vld [vmem:[#allocation3 + $0x420] sm:$0xff]  ;;  %v1890_v32 = vld [vmem:[#allocation3 + $0x430] sm:$0xff] }
 0xa66   :  { %2646 = vmatpush1.bf16.msra.mxu0 %v1784_v33  ;;  %2810 = vmatpush1.bf16.msra.mxu1 %v1786_v34  ;;  %v1897_v33 = vld [vmem:[#allocation3 + $0x468] sm:$0xff]  ;;  %v1899_v34 = vld [vmem:[#allocation3 + $0x478] sm:$0xff] }
 0xa67   :  { %2647 = vmatprep.subr.bf16.mxu0 %v1793_v35  ;;  %2811 = vmatprep.subr.bf16.mxu1 %v1795_v0  ;;  %v1896_v35 = vld [vmem:[#allocation3 + $0x460] sm:$0xff]  ;;  %v1898_v0 = vld [vmem:[#allocation3 + $0x470] sm:$0xff] }
 0xa6a   :  { %2648 = vmatpush1.bf16.msra.mxu0 %v1792_v29  ;;  %2812 = vmatpush1.bf16.msra.mxu1 %v1794_v36  ;;  %v1905_v29 = vld [vmem:[#allocation3 + $0x4a8] sm:$0xff]  ;;  %v1907_v36 = vld [vmem:[#allocation3 + $0x4b8] sm:$0xff] }
 0xa6b   :  { %2649 = vmatprep.subr.bf16.mxu0 %v1801_v37  ;;  %2813 = vmatprep.subr.bf16.mxu1 %v1803_v6  ;;  %v1904_v37 = vld [vmem:[#allocation3 + $0x4a0] sm:$0xff]  ;;  %v1906_v6 = vld [vmem:[#allocation3 + $0x4b0] sm:$0xff] }
 0xa6e   :  { %2650 = vmatpush1.bf16.msra.mxu0 %v1800_v38  ;;  %2814 = vmatpush1.bf16.msra.mxu1 %v1802_v39  ;;  %v1913_v38 = vld [vmem:[#allocation3 + $0x4e8] sm:$0xff]  ;;  %v1912_v39 = vld [vmem:[#allocation3 + $0x4e0] sm:$0xff] }
 0xa6f   :  { %2651 = vmatprep.subr.bf16.mxu0 %v1809_v40  ;;  %2815 = vmatprep.subr.bf16.mxu1 %v1811_v41  ;;  %v1914_v40 = vld [vmem:[#allocation3 + $0x4f0] sm:$0xff]  ;;  %v1921_v41 = vld [vmem:[#allocation3 + $0x528] sm:$0xff] }
 0xa72   :  { %2652 = vmatpush1.bf16.msra.mxu0 %v1808_v42  ;;  %2816 = vmatpush1.bf16.msra.mxu1 %v1810_v43  ;;  %v1923_v42 = vld [vmem:[#allocation3 + $0x538] sm:$0xff]  ;;  %v1922_v43 = vld [vmem:[#allocation3 + $0x530] sm:$0xff] }
 0xa73   :  { %2653 = vmatprep.subr.bf16.mxu0 %v1817_v44  ;;  %2817 = vmatprep.subr.bf16.mxu1 %v1819_v45  ;;  %v1929_v44 = vld [vmem:[#allocation3 + $0x568] sm:$0xff]  ;;  %v1931_v45 = vld [vmem:[#allocation3 + $0x578] sm:$0xff] }
 0xa76   :  { %2654 = vmatpush1.bf16.msra.mxu0 %v1816_v47  ;;  %2818 = vmatpush1.bf16.msra.mxu1 %v1818_v48  ;;  %v1928_v47 = vld [vmem:[#allocation3 + $0x560] sm:$0xff]  ;;  %v1930_v48 = vld [vmem:[#allocation3 + $0x570] sm:$0xff] }
 0xa77   :  { %2655 = vmatprep.subr.bf16.mxu0 %v1825_v49  ;;  %2819 = vmatprep.subr.bf16.mxu1 %v1827_v51  ;;  %v1937_v49 = vld [vmem:[#allocation3 + $0x5a8] sm:$0xff]  ;;  %v1939_v51 = vld [vmem:[#allocation3 + $0x5b8] sm:$0xff] }
 0xa7a   :  { %2656 = vmatpush1.bf16.msra.mxu0 %v1824_v53  ;;  %2820 = vmatpush1.bf16.msra.mxu1 %v1826_v54  ;;  %v1936_v53 = vld [vmem:[#allocation3 + $0x5a0] sm:$0xff]  ;;  %v1938_v54 = vld [vmem:[#allocation3 + $0x5b0] sm:$0xff] }
 0xa7b   :  { %2657 = vmatprep.subr.bf16.mxu0 %v1833_v55  ;;  %2821 = vmatprep.subr.bf16.mxu1 %v1835_v56  ;;  %v1945_v55 = vld [vmem:[#allocation3 + $0x5e8] sm:$0xff]  ;;  %v1947_v56 = vld [vmem:[#allocation3 + $0x5f8] sm:$0xff] }
 0xa7e   :  { %2658 = vmatpush1.bf16.msra.mxu0 %v1832_v57  ;;  %2822 = vmatpush1.bf16.msra.mxu1 %v1834_v58  ;;  %v1944_v57 = vld [vmem:[#allocation3 + $0x5e0] sm:$0xff]  ;;  %v1946_v58 = vld [vmem:[#allocation3 + $0x5f0] sm:$0xff] }
 0xa7f   :  { %2659 = vmatprep.subr.bf16.mxu0 %v1841_v59  ;;  %2823 = vmatprep.subr.bf16.mxu1 %v1843_v60  ;;  %v1953_v59 = vld [vmem:[#allocation3 + $0x628] sm:$0xff]  ;;  %v1955_v60 = vld [vmem:[#allocation3 + $0x638] sm:$0xff] }
 0xa82   :  { %2660 = vmatpush1.bf16.msra.mxu0 %v1840_v61  ;;  %2824 = vmatpush1.bf16.msra.mxu1 %v1842_v62  ;;  %v1952_v61 = vld [vmem:[#allocation3 + $0x620] sm:$0xff]  ;;  %v1954_v62 = vld [vmem:[#allocation3 + $0x630] sm:$0xff] }
 0xa83   :  { %2661 = vmatprep.subr.bf16.mxu0 %v1849_v63  ;;  %2825 = vmatprep.subr.bf16.mxu1 %v1851_v23  ;;  %v1961_v63 = vld [vmem:[#allocation3 + $0x668] sm:$0xff]  ;;  %v1963_v23 = vld [vmem:[#allocation3 + $0x678] sm:$0xff] }
 0xa86   :  { %2662 = vmatpush1.bf16.msra.mxu0 %v1848_v30  ;;  %2826 = vmatpush1.bf16.msra.mxu1 %v1850_v1  ;;  %v1960_v30 = vld [vmem:[#allocation3 + $0x660] sm:$0xff]  ;;  %v1962_v1 = vld [vmem:[#allocation3 + $0x670] sm:$0xff] }
 0xa87   :  { %2663 = vmatprep.subr.bf16.mxu0 %v1857_v2  ;;  %2827 = vmatprep.subr.bf16.mxu1 %v1859_v4  ;;  %v1969_v2 = vld [vmem:[#allocation3 + $0x6a8] sm:$0xff]  ;;  %v1971_v4 = vld [vmem:[#allocation3 + $0x6b8] sm:$0xff] }
 0xa8a   :  { %2664 = vmatpush1.bf16.msra.mxu0 %v1856_v7  ;;  %2828 = vmatpush1.bf16.msra.mxu1 %v1858_v9  ;;  %v1968_v7 = vld [vmem:[#allocation3 + $0x6a0] sm:$0xff]  ;;  %v1970_v9 = vld [vmem:[#allocation3 + $0x6b0] sm:$0xff] }
 0xa8b   :  { %2665 = vmatprep.subr.bf16.mxu0 %v1865_v21  ;;  %2829 = vmatprep.subr.bf16.mxu1 %v1867_v25  ;;  %v1977_v21 = vld [vmem:[#allocation3 + $0x6e8] sm:$0xff]  ;;  %v1979_v25 = vld [vmem:[#allocation3 + $0x6f8] sm:$0xff] }
 0xa8e   :  { %2666 = vmatpush1.bf16.msra.mxu0 %v1864_v10  ;;  %2830 = vmatpush1.bf16.msra.mxu1 %v1866_v11  ;;  %v1976_v10 = vld [vmem:[#allocation3 + $0x6e0] sm:$0xff]  ;;  %v1978_v11 = vld [vmem:[#allocation3 + $0x6f0] sm:$0xff] }
 0xa8f   :  { %2667 = vmatprep.subr.bf16.mxu0 %v1873_v12  ;;  %2831 = vmatprep.subr.bf16.mxu1 %v1875_v15  ;;  %v1985_v12 = vld [vmem:[#allocation3 + $0x728] sm:$0xff]  ;;  %v1987_v15 = vld [vmem:[#allocation3 + $0x738] sm:$0xff] }
 0xa92   :  { %2668 = vmatpush1.bf16.msra.mxu0 %v1872_v16  ;;  %2832 = vmatpush1.bf16.msra.mxu1 %v1874_v18  ;;  %v1984_v16 = vld [vmem:[#allocation3 + $0x720] sm:$0xff]  ;;  %v1986_v18 = vld [vmem:[#allocation3 + $0x730] sm:$0xff] }
 0xa93   :  { %2669 = vmatprep.subr.bf16.mxu0 %v1881_v19  ;;  %2833 = vmatprep.subr.bf16.mxu1 %v1883_v17  ;;  %v1993_v19 = vld [vmem:[#allocation3 + $0x768] sm:$0xff]  ;;  %v1995_v17 = vld [vmem:[#allocation3 + $0x778] sm:$0xff] }
 0xa96   :  { %2670 = vmatpush1.bf16.msra.mxu0 %v1880_v3  ;;  %2834 = vmatpush1.bf16.msra.mxu1 %v1882_v22  ;;  %v1992_v3 = vld [vmem:[#allocation3 + $0x760] sm:$0xff]  ;;  %v1994_v22 = vld [vmem:[#allocation3 + $0x770] sm:$0xff] }
 0xa97   :  { %2680 = vmatprep.subr.bf16.mxu0 %v1889_v26  ;;  %2844 = vmatprep.subr.bf16.mxu1 %v1891_v27  ;;  %v2001_v26 = vld [vmem:[#allocation3 + $0x7a8] sm:$0xff]  ;;  %v2003_v27 = vld [vmem:[#allocation3 + $0x7b8] sm:$0xff] }
 0xa99   :  { %2672 = vmatmul.mubr.bf16.vlgmr.msra.gmra.mrb[24].mxu0 %v3939_v28  ;;  %2836 = vmatmul.mubr.bf16.vlgmr.msra.gmra.mrb[16].mxu1 %v3939_v28  ;;  %v1915_v28 = vld [vmem:[#allocation3 + $0x4f8] sm:$0xff] }
 0xa9a   :  { %2681 = vmatpush1.bf16.msra.mxu0 %v1888_v8  ;;  %2845 = vmatpush1.bf16.msra.mxu1 %v1890_v32  ;;  %v2000_v8 = vld [vmem:[#allocation3 + $0x7a0] sm:$0xff]  ;;  %v2002_v32 = vld [vmem:[#allocation3 + $0x7b0] sm:$0xff] }
 0xa9b   :  { %2682 = vmatprep.subr.bf16.mxu0 %v1897_v33  ;;  %2846 = vmatprep.subr.bf16.mxu1 %v1899_v34  ;;  %v2009_v33 = vld [vmem:[#allocation3 + $0x7e8] sm:$0xff]  ;;  %v2011_v34 = vld [vmem:[#allocation3 + $0x7f8] sm:$0xff] }
 0xa9c   :  { %2712 = vmatprep.mubr.bf16.mxu0 %v3937_v5  ;;  %2876 = vmatprep.mubr.bf16.mxu1 %v3937_v5  ;;  %v1920_v5 = vld [vmem:[#allocation3 + $0x520] sm:$0xff] }
 0xa9e   :  { %2683 = vmatpush1.bf16.msra.mxu0 %v1896_v35  ;;  %2847 = vmatpush1.bf16.msra.mxu1 %v1898_v0  ;;  %v2008_v35 = vld [vmem:[#allocation3 + $0x7e0] sm:$0xff]  ;;  %v2010_v0 = vld [vmem:[#allocation3 + $0x7f0] sm:$0xff] }
 0xa9f   :  { %2684 = vmatprep.subr.bf16.mxu0 %v1905_v29  ;;  %2848 = vmatprep.subr.bf16.mxu1 %v1907_v36  ;;  %v2017_v29 = vld [vmem:[#allocation3 + $0x828] sm:$0xff]  ;;  %v2019_v36 = vld [vmem:[#allocation3 + $0x838] sm:$0xff] }
 0xaa2   :  { %2685 = vmatpush1.bf16.msra.mxu0 %v1904_v37  ;;  %2849 = vmatpush1.bf16.msra.mxu1 %v1906_v6  ;;  %v2016_v37 = vld [vmem:[#allocation3 + $0x820] sm:$0xff]  ;;  %v2018_v6 = vld [vmem:[#allocation3 + $0x830] sm:$0xff] }
 0xaa3   :  { %2686 = vmatprep.subr.bf16.mxu0 %v1913_v38  ;;  %2850 = vmatprep.subr.bf16.mxu1 %v1915_v28  ;;  %v2025_v38 = vld [vmem:[#allocation3 + $0x868] sm:$0xff]  ;;  %v2027_v28 = vld [vmem:[#allocation3 + $0x878] sm:$0xff] }
 0xaa6   :  { %2687 = vmatpush1.bf16.msra.mxu0 %v1912_v39  ;;  %2851 = vmatpush1.bf16.msra.mxu1 %v1914_v40  ;;  %v2024_v39 = vld [vmem:[#allocation3 + $0x860] sm:$0xff]  ;;  %v2026_v40 = vld [vmem:[#allocation3 + $0x870] sm:$0xff] }
 0xaa7   :  { %2688 = vmatprep.subr.bf16.mxu0 %v1921_v41  ;;  %2852 = vmatprep.subr.bf16.mxu1 %v1923_v42  ;;  %v2033_v41 = vld [vmem:[#allocation3 + $0x8a8] sm:$0xff]  ;;  %v2035_v42 = vld [vmem:[#allocation3 + $0x8b8] sm:$0xff] }
 0xaaa   :  { %2689 = vmatpush1.bf16.msra.mxu0 %v1920_v5  ;;  %2853 = vmatpush1.bf16.msra.mxu1 %v1922_v43  ;;  %v2032_v5 = vld [vmem:[#allocation3 + $0x8a0] sm:$0xff]  ;;  %v2034_v43 = vld [vmem:[#allocation3 + $0x8b0] sm:$0xff] }
 0xaab   :  { %2690 = vmatprep.subr.bf16.mxu0 %v1929_v44  ;;  %2854 = vmatprep.subr.bf16.mxu1 %v1931_v45  ;;  %v2041_v44 = vld [vmem:[#allocation3 + $0x8e8] sm:$0xff]  ;;  %v2040_v45 = vld [vmem:[#allocation3 + $0x8e0] sm:$0xff] }
 0xaae   :  { %2691 = vmatpush1.bf16.msra.mxu0 %v1928_v47  ;;  %2855 = vmatpush1.bf16.msra.mxu1 %v1930_v48  ;;  %v2042_v47 = vld [vmem:[#allocation3 + $0x8f0] sm:$0xff]  ;;  %v2049_v48 = vld [vmem:[#allocation3 + $0x928] sm:$0xff] }
 0xaaf   :  { %2692 = vmatprep.subr.bf16.mxu0 %v1937_v49  ;;  %2856 = vmatprep.subr.bf16.mxu1 %v1939_v51  ;;  %v2051_v49 = vld [vmem:[#allocation3 + $0x938] sm:$0xff]  ;;  %v2050_v51 = vld [vmem:[#allocation3 + $0x930] sm:$0xff] }
 0xab2   :  { %2693 = vmatpush1.bf16.msra.mxu0 %v1936_v53  ;;  %2857 = vmatpush1.bf16.msra.mxu1 %v1938_v54  ;;  %v2057_v53 = vld [vmem:[#allocation3 + $0x968] sm:$0xff]  ;;  %v2059_v54 = vld [vmem:[#allocation3 + $0x978] sm:$0xff] }
 0xab3   :  { %2694 = vmatprep.subr.bf16.mxu0 %v1945_v55  ;;  %2858 = vmatprep.subr.bf16.mxu1 %v1947_v56  ;;  %v2056_v55 = vld [vmem:[#allocation3 + $0x960] sm:$0xff]  ;;  %v2058_v56 = vld [vmem:[#allocation3 + $0x970] sm:$0xff] }
 0xab6   :  { %2695 = vmatpush1.bf16.msra.mxu0 %v1944_v57  ;;  %2859 = vmatpush1.bf16.msra.mxu1 %v1946_v58  ;;  %v2065_v57 = vld [vmem:[#allocation3 + $0x9a8] sm:$0xff]  ;;  %v2067_v58 = vld [vmem:[#allocation3 + $0x9b8] sm:$0xff] }
 0xab7   :  { %2696 = vmatprep.subr.bf16.mxu0 %v1953_v59  ;;  %2860 = vmatprep.subr.bf16.mxu1 %v1955_v60  ;;  %v2064_v59 = vld [vmem:[#allocation3 + $0x9a0] sm:$0xff]  ;;  %v2066_v60 = vld [vmem:[#allocation3 + $0x9b0] sm:$0xff] }
 0xaba   :  { %2697 = vmatpush1.bf16.msra.mxu0 %v1952_v61  ;;  %2861 = vmatpush1.bf16.msra.mxu1 %v1954_v62  ;;  %v2073_v61 = vld [vmem:[#allocation3 + $0x9e8] sm:$0xff]  ;;  %v2075_v62 = vld [vmem:[#allocation3 + $0x9f8] sm:$0xff] }
 0xabb   :  { %2698 = vmatprep.subr.bf16.mxu0 %v1961_v63  ;;  %2862 = vmatprep.subr.bf16.mxu1 %v1963_v23  ;;  %v2072_v63 = vld [vmem:[#allocation3 + $0x9e0] sm:$0xff]  ;;  %v2074_v23 = vld [vmem:[#allocation3 + $0x9f0] sm:$0xff] }
 0xabe   :  { %2699 = vmatpush1.bf16.msra.mxu0 %v1960_v30  ;;  %2863 = vmatpush1.bf16.msra.mxu1 %v1962_v1  ;;  %v2081_v30 = vld [vmem:[#allocation3 + $0xa28] sm:$0xff]  ;;  %v2083_v1 = vld [vmem:[#allocation3 + $0xa38] sm:$0xff] }
 0xabf   :  { %2700 = vmatprep.subr.bf16.mxu0 %v1969_v2  ;;  %2864 = vmatprep.subr.bf16.mxu1 %v1971_v4  ;;  %v2080_v2 = vld [vmem:[#allocation3 + $0xa20] sm:$0xff]  ;;  %v2082_v4 = vld [vmem:[#allocation3 + $0xa30] sm:$0xff] }
 0xac2   :  { %2701 = vmatpush1.bf16.msra.mxu0 %v1968_v7  ;;  %2865 = vmatpush1.bf16.msra.mxu1 %v1970_v9  ;;  %v2089_v7 = vld [vmem:[#allocation3 + $0xa68] sm:$0xff]  ;;  %v2091_v9 = vld [vmem:[#allocation3 + $0xa78] sm:$0xff] }
 0xac3   :  { %2702 = vmatprep.subr.bf16.mxu0 %v1977_v21  ;;  %2866 = vmatprep.subr.bf16.mxu1 %v1979_v25  ;;  %v2088_v21 = vld [vmem:[#allocation3 + $0xa60] sm:$0xff]  ;;  %v2090_v25 = vld [vmem:[#allocation3 + $0xa70] sm:$0xff] }
 0xac6   :  { %2703 = vmatpush1.bf16.msra.mxu0 %v1976_v10  ;;  %2867 = vmatpush1.bf16.msra.mxu1 %v1978_v11  ;;  %v2097_v10 = vld [vmem:[#allocation3 + $0xaa8] sm:$0xff]  ;;  %v2099_v11 = vld [vmem:[#allocation3 + $0xab8] sm:$0xff] }
 0xac7   :  { %2704 = vmatprep.subr.bf16.mxu0 %v1985_v12  ;;  %2868 = vmatprep.subr.bf16.mxu1 %v1987_v15  ;;  %v2096_v12 = vld [vmem:[#allocation3 + $0xaa0] sm:$0xff]  ;;  %v2098_v15 = vld [vmem:[#allocation3 + $0xab0] sm:$0xff] }
 0xaca   :  { %2705 = vmatpush1.bf16.msra.mxu0 %v1984_v16  ;;  %2869 = vmatpush1.bf16.msra.mxu1 %v1986_v18  ;;  %v2105_v16 = vld [vmem:[#allocation3 + $0xae8] sm:$0xff]  ;;  %v2107_v18 = vld [vmem:[#allocation3 + $0xaf8] sm:$0xff] }
 0xacb   :  { %2706 = vmatprep.subr.bf16.mxu0 %v1993_v19  ;;  %2870 = vmatprep.subr.bf16.mxu1 %v1995_v17  ;;  %v2104_v19 = vld [vmem:[#allocation3 + $0xae0] sm:$0xff]  ;;  %v2106_v17 = vld [vmem:[#allocation3 + $0xaf0] sm:$0xff] }
 0xace   :  { %2707 = vmatpush1.bf16.msra.mxu0 %v1992_v3  ;;  %2871 = vmatpush1.bf16.msra.mxu1 %v1994_v22  ;;  %v2113_v3 = vld [vmem:[#allocation3 + $0xb28] sm:$0xff]  ;;  %v2115_v22 = vld [vmem:[#allocation3 + $0xb38] sm:$0xff] }
 0xacf   :  { %2708 = vmatprep.subr.bf16.mxu0 %v2001_v26  ;;  %2872 = vmatprep.subr.bf16.mxu1 %v2003_v27  ;;  %v2112_v26 = vld [vmem:[#allocation3 + $0xb20] sm:$0xff]  ;;  %v2114_v27 = vld [vmem:[#allocation3 + $0xb30] sm:$0xff] }
 0xad2   :  { %2709 = vmatpush1.bf16.msra.mxu0 %v2000_v8  ;;  %2873 = vmatpush1.bf16.msra.mxu1 %v2002_v32  ;;  %v2121_v8 = vld [vmem:[#allocation3 + $0xb68] sm:$0xff]  ;;  %v2123_v32 = vld [vmem:[#allocation3 + $0xb78] sm:$0xff] }
 0xad3   :  { %2710 = vmatprep.subr.bf16.mxu0 %v2009_v33  ;;  %2874 = vmatprep.subr.bf16.mxu1 %v2011_v34  ;;  %v2120_v33 = vld [vmem:[#allocation3 + $0xb60] sm:$0xff]  ;;  %v2122_v34 = vld [vmem:[#allocation3 + $0xb70] sm:$0xff] }
 0xad6   :  { %2711 = vmatpush1.bf16.msra.mxu0 %v2008_v35  ;;  %2875 = vmatpush1.bf16.msra.mxu1 %v2010_v0  ;;  %v2129_v35 = vld [vmem:[#allocation3 + $0xba8] sm:$0xff]  ;;  %v2131_v0 = vld [vmem:[#allocation3 + $0xbb8] sm:$0xff] }
 0xad7   :  { %2721 = vmatprep.subr.bf16.mxu0 %v2017_v29  ;;  %2885 = vmatprep.subr.bf16.mxu1 %v2019_v36  ;;  %v2128_v29 = vld [vmem:[#allocation3 + $0xba0] sm:$0xff]  ;;  %v2130_v36 = vld [vmem:[#allocation3 + $0xbb0] sm:$0xff] }
 0xad9   :  { %2713 = vmatmul.mubr.bf16.vlgmr.msra.gmra.mrb[24].mxu0 %v3935_v24  ;;  %2877 = vmatmul.mubr.bf16.vlgmr.msra.gmra.mrb[16].mxu1 %v3935_v24  ;;  %v2043_v24 = vld [vmem:[#allocation3 + $0x8f8] sm:$0xff] }
 0xada   :  { %2722 = vmatpush1.bf16.msra.mxu0 %v2016_v37  ;;  %2886 = vmatpush1.bf16.msra.mxu1 %v2018_v6  ;;  %v2137_v37 = vld [vmem:[#allocation3 + $0xbe8] sm:$0xff]  ;;  %v2139_v6 = vld [vmem:[#allocation3 + $0xbf8] sm:$0xff] }
 0xadb   :  { %2723 = vmatprep.subr.bf16.mxu0 %v2025_v38  ;;  %2887 = vmatprep.subr.bf16.mxu1 %v2027_v28  ;;  %v2136_v38 = vld [vmem:[#allocation3 + $0xbe0] sm:$0xff]  ;;  %v2138_v28 = vld [vmem:[#allocation3 + $0xbf0] sm:$0xff] }
 0xadc   :  { %2753 = vmatprep.mubr.bf16.mxu0 %v3957_v14  ;;  %2917 = vmatprep.mubr.bf16.mxu1 %v3957_v14  ;;  %v2048_v14 = vld [vmem:[#allocation3 + $0x920] sm:$0xff] }
 0xade   :  { %2724 = vmatpush1.bf16.msra.mxu0 %v2024_v39  ;;  %2888 = vmatpush1.bf16.msra.mxu1 %v2026_v40  ;;  %v2145_v39 = vld [vmem:[#allocation3 + $0xc28] sm:$0xff]  ;;  %v2147_v40 = vld [vmem:[#allocation3 + $0xc38] sm:$0xff] }
 0xadf   :  { %2725 = vmatprep.subr.bf16.mxu0 %v2033_v41  ;;  %2889 = vmatprep.subr.bf16.mxu1 %v2035_v42  ;;  %v2144_v41 = vld [vmem:[#allocation3 + $0xc20] sm:$0xff]  ;;  %v2146_v42 = vld [vmem:[#allocation3 + $0xc30] sm:$0xff] }
 0xae2   :  { %2726 = vmatpush1.bf16.msra.mxu0 %v2032_v5  ;;  %2890 = vmatpush1.bf16.msra.mxu1 %v2034_v43  ;;  %v2153_v5 = vld [vmem:[#allocation3 + $0xc68] sm:$0xff]  ;;  %v2155_v43 = vld [vmem:[#allocation3 + $0xc78] sm:$0xff] }
 0xae3   :  { %2727 = vmatprep.subr.bf16.mxu0 %v2041_v44  ;;  %2891 = vmatprep.subr.bf16.mxu1 %v2043_v24  ;;  %v2152_v44 = vld [vmem:[#allocation3 + $0xc60] sm:$0xff]  ;;  %v2154_v24 = vld [vmem:[#allocation3 + $0xc70] sm:$0xff] }
 0xae6   :  { %2728 = vmatpush1.bf16.msra.mxu0 %v2040_v45  ;;  %2892 = vmatpush1.bf16.msra.mxu1 %v2042_v47  ;;  %v2161_v45 = vld [vmem:[#allocation3 + $0xca8] sm:$0xff]  ;;  %v2163_v47 = vld [vmem:[#allocation3 + $0xcb8] sm:$0xff] }
 0xae7   :  { %2729 = vmatprep.subr.bf16.mxu0 %v2049_v48  ;;  %2893 = vmatprep.subr.bf16.mxu1 %v2051_v49  ;;  %v2160_v48 = vld [vmem:[#allocation3 + $0xca0] sm:$0xff]  ;;  %v2162_v49 = vld [vmem:[#allocation3 + $0xcb0] sm:$0xff] }
 0xaea   :  { %2730 = vmatpush1.bf16.msra.mxu0 %v2048_v14  ;;  %2894 = vmatpush1.bf16.msra.mxu1 %v2050_v51  ;;  %v2169_v14 = vld [vmem:[#allocation3 + $0xce8] sm:$0xff]  ;;  %v2168_v51 = vld [vmem:[#allocation3 + $0xce0] sm:$0xff] }
 0xaeb   :  { %2731 = vmatprep.subr.bf16.mxu0 %v2057_v53  ;;  %2895 = vmatprep.subr.bf16.mxu1 %v2059_v54  ;;  %v2170_v53 = vld [vmem:[#allocation3 + $0xcf0] sm:$0xff]  ;;  %v2177_v54 = vld [vmem:[#allocation3 + $0xd28] sm:$0xff] }
 0xaee   :  { %2732 = vmatpush1.bf16.msra.mxu0 %v2056_v55  ;;  %2896 = vmatpush1.bf16.msra.mxu1 %v2058_v56  ;;  %v2179_v55 = vld [vmem:[#allocation3 + $0xd38] sm:$0xff]  ;;  %v2281_v56 = vsub.s32 2, %v3845_v46 }
 0xaef   :  { %2733 = vmatprep.subr.bf16.mxu0 %v2065_v57  ;;  %2897 = vmatprep.subr.bf16.mxu1 %v2067_v58  ;;  %v2285_v57 = vsub.s32 3, %v3845_v46  ;;  %v2176_v58 = vld [vmem:[#allocation3 + $0xd20] sm:$0xff] }
 0xaf2   :  { %2734 = vmatpush1.bf16.msra.mxu0 %v2064_v59  ;;  %2898 = vmatpush1.bf16.msra.mxu1 %v2066_v60  ;;  %v2178_v59 = vld [vmem:[#allocation3 + $0xd30] sm:$0xff]  ;;  %v2185_v60 = vld [vmem:[#allocation3 + $0xd68] sm:$0xff] }
 0xaf3   :  { %2735 = vmatprep.subr.bf16.mxu0 %v2073_v61  ;;  %2899 = vmatprep.subr.bf16.mxu1 %v2075_v62  ;;  %v2187_v61 = vld [vmem:[#allocation3 + $0xd78] sm:$0xff] }
 0xaf6   :  { %2736 = vmatpush1.bf16.msra.mxu0 %v2072_v63  ;;  %2900 = vmatpush1.bf16.msra.mxu1 %v2074_v23 }
 0xaf7   :  { %2737 = vmatprep.subr.bf16.mxu0 %v2081_v30  ;;  %2901 = vmatprep.subr.bf16.mxu1 %v2083_v1  ;;  %v2184_v1 = vld [vmem:[#allocation3 + $0xd60] sm:$0xff] }
 0xafa   :  { %2738 = vmatpush1.bf16.msra.mxu0 %v2080_v2  ;;  %2902 = vmatpush1.bf16.msra.mxu1 %v2082_v4  ;;  %v2186_v2 = vld [vmem:[#allocation3 + $0xd70] sm:$0xff] }
 0xafb   :  { %2739 = vmatprep.subr.bf16.mxu0 %v2089_v7  ;;  %2903 = vmatprep.subr.bf16.mxu1 %v2091_v9  ;;  %v2193_v9 = vld [vmem:[#allocation3 + $0xda8] sm:$0xff] }
 0xafe   :  { %2740 = vmatpush1.bf16.msra.mxu0 %v2088_v21  ;;  %2904 = vmatpush1.bf16.msra.mxu1 %v2090_v25  ;;  %v2195_v21 = vld [vmem:[#allocation3 + $0xdb8] sm:$0xff] }
 0xaff   :  { %2741 = vmatprep.subr.bf16.mxu0 %v2097_v10  ;;  %2905 = vmatprep.subr.bf16.mxu1 %v2099_v11 }
 0xb02   :  { %2742 = vmatpush1.bf16.msra.mxu0 %v2096_v12  ;;  %2906 = vmatpush1.bf16.msra.mxu1 %v2098_v15 }
 0xb03   :  { %2743 = vmatprep.subr.bf16.mxu0 %v2105_v16  ;;  %2907 = vmatprep.subr.bf16.mxu1 %v2107_v18 }
 0xb06   :  { %2744 = vmatpush1.bf16.msra.mxu0 %v2104_v19  ;;  %2908 = vmatpush1.bf16.msra.mxu1 %v2106_v17  ;;  %v2194_v19 = vld [vmem:[#allocation3 + $0xdb0] sm:$0xff] }
 0xb07   :  { %2745 = vmatprep.subr.bf16.mxu0 %v2113_v3  ;;  %2909 = vmatprep.subr.bf16.mxu1 %v2115_v22 }
 0xb0a   :  { %2746 = vmatpush1.bf16.msra.mxu0 %v2112_v26  ;;  %2910 = vmatpush1.bf16.msra.mxu1 %v2114_v27 }
 0xb0b   :  { %2747 = vmatprep.subr.bf16.mxu0 %v2121_v8  ;;  %2911 = vmatprep.subr.bf16.mxu1 %v2123_v32  ;;  %v2201_v32 = vld [vmem:[#allocation3 + $0xde8] sm:$0xff] }
 0xb0e   :  { %2748 = vmatpush1.bf16.msra.mxu0 %v2120_v33  ;;  %2912 = vmatpush1.bf16.msra.mxu1 %v2122_v34  ;;  %v2203_v33 = vld [vmem:[#allocation3 + $0xdf8] sm:$0xff]  ;;  %v2200_v34 = vld [vmem:[#allocation3 + $0xde0] sm:$0xff] }
 0xb0f   :  { %2749 = vmatprep.subr.bf16.mxu0 %v2129_v35  ;;  %2913 = vmatprep.subr.bf16.mxu1 %v2131_v0  ;;  %v2202_v35 = vld [vmem:[#allocation3 + $0xdf0] sm:$0xff]  ;;  %v2209_v0 = vld [vmem:[#allocation3 + $0xe28] sm:$0xff] }
 0xb12   :  { %2750 = vmatpush1.bf16.msra.mxu0 %v2128_v29  ;;  %2914 = vmatpush1.bf16.msra.mxu1 %v2130_v36  ;;  %v2211_v29 = vld [vmem:[#allocation3 + $0xe38] sm:$0xff]  ;;  %v2208_v36 = vld [vmem:[#allocation3 + $0xe20] sm:$0xff] }
 0xb13   :  { %2751 = vmatprep.subr.bf16.mxu0 %v2137_v37  ;;  %2915 = vmatprep.subr.bf16.mxu1 %v2139_v6  ;;  %v2210_v37 = vld [vmem:[#allocation3 + $0xe30] sm:$0xff]  ;;  %v2217_v6 = vld [vmem:[#allocation3 + $0xe68] sm:$0xff] }
 0xb16   :  { %2752 = vmatpush1.bf16.msra.mxu0 %v2136_v38  ;;  %2916 = vmatpush1.bf16.msra.mxu1 %v2138_v28  ;;  %v2219_v38 = vld [vmem:[#allocation3 + $0xe78] sm:$0xff] }
 0xb17   :  { %2762 = vmatprep.subr.bf16.mxu0 %v2145_v39  ;;  %2926 = vmatprep.subr.bf16.mxu1 %v2147_v40  ;;  %v2216_v39 = vld [vmem:[#allocation3 + $0xe60] sm:$0xff]  ;;  %v2218_v40 = vld [vmem:[#allocation3 + $0xe70] sm:$0xff] }
 0xb19   :  { %2754 = vmatmul.mubr.bf16.vlgmr.msra.gmra.mrb[24].mxu0 %v3955_v13  ;;  %2918 = vmatmul.mubr.bf16.vlgmr.msra.gmra.mrb[16].mxu1 %v3955_v13  ;;  %v2171_v13 = vld [vmem:[#allocation3 + $0xcf8] sm:$0xff] }
 0xb1a   :  { %2763 = vmatpush1.bf16.msra.mxu0 %v2144_v41  ;;  %2927 = vmatpush1.bf16.msra.mxu1 %v2146_v42 }
 0xb1b   :  { %2764 = vmatprep.subr.bf16.mxu0 %v2153_v5  ;;  %2928 = vmatprep.subr.bf16.mxu1 %v2155_v43  ;;  %v2225_v5 = vld [vmem:[#allocation3 + $0xea8] sm:$0xff]  ;;  %v2227_v43 = vld [vmem:[#allocation3 + $0xeb8] sm:$0xff] }
 0xb1c   :  { %2794 = vmatprep.mubr.bf16.mxu0 %v3961_v20  ;;  %2958 = vmatprep.mubr.bf16.mxu1 %v3961_v20  ;;  %v3994_v20 = vld [vmem:[#allocation17 + $0x2] ss:$4 sm:$0xff] }
 0xb1d   :  { %v2274_v62 = vrot.slane %v3994_v20, %v3848_v50  ;;  %v2282_v63 = vrot.slane %v3994_v20, %v2281_v56  ;;  %v2278_v23 = vrot.slane %v3994_v20, %v3851_v52  ;;  %v2286_v30 = vrot.slane %v3994_v20, %v2285_v57  ;;  %v2192_v52 = vld [vmem:[#allocation3 + $0xda0] sm:$0xff]  ;;  %v2243_v56 = vld [vmem:[#allocation3 + $0xf38] sm:$0xff] }
 0xb1e   :  { %2765 = vmatpush1.bf16.msra.mxu0 %v2152_v44  ;;  %2929 = vmatpush1.bf16.msra.mxu1 %v2154_v24  ;;  %v2240_v57 = vld [vmem:[#allocation3 + $0xf20] sm:$0xff] }
 0xb1f   :  { %2766 = vmatprep.subr.bf16.mxu0 %v2161_v45  ;;  %2930 = vmatprep.subr.bf16.mxu1 %v2163_v47 }
 0xb22   :  { %2767 = vmatpush1.bf16.msra.mxu0 %v2160_v48  ;;  %2931 = vmatpush1.bf16.msra.mxu1 %v2162_v49  ;;  %v2224_v49 = vld [vmem:[#allocation3 + $0xea0] sm:$0xff] }
 0xb23   :  { %2768 = vmatprep.subr.bf16.mxu0 %v2169_v14  ;;  %2932 = vmatprep.subr.bf16.mxu1 %v2171_v13  ;;  %v2226_v14 = vld [vmem:[#allocation3 + $0xeb0] sm:$0xff]  ;;  %v2233_v13 = vld [vmem:[#allocation3 + $0xee8] sm:$0xff] }
 0xb26   :  { %2769 = vmatpush1.bf16.msra.mxu0 %v2168_v51  ;;  %2933 = vmatpush1.bf16.msra.mxu1 %v2170_v53  ;;  %v2235_v51 = vld [vmem:[#allocation3 + $0xef8] sm:$0xff]  ;;  %v2232_v53 = vld [vmem:[#allocation3 + $0xee0] sm:$0xff] }
 0xb27   :  { %2770 = vmatprep.subr.bf16.mxu0 %v2177_v54  ;;  %2934 = vmatprep.subr.bf16.mxu1 %v2179_v55  ;;  %v2234_v54 = vld [vmem:[#allocation3 + $0xef0] sm:$0xff]  ;;  %v2241_v55 = vld [vmem:[#allocation3 + $0xf28] sm:$0xff] }
 0xb2a   :  { %2771 = vmatpush1.bf16.msra.mxu0 %v2176_v58  ;;  %2935 = vmatpush1.bf16.msra.mxu1 %v2178_v59  ;;  %v2242_v58 = vld [vmem:[#allocation3 + $0xf30] sm:$0xff] }
 0xb2b   :  { %2772 = vmatprep.subr.bf16.mxu0 %v2185_v60  ;;  %2936 = vmatprep.subr.bf16.mxu1 %v2187_v61  ;;  %v2249_v60 = vld [vmem:[#allocation3 + $0xf68] sm:$0xff]  ;;  %v2251_v61 = vld [vmem:[#allocation3 + $0xf78] sm:$0xff] }
 0xb2c   :  { %v2468_v4 = vpop.f32.mrb[20].mxu0  ;;  %v2632_v7 = vpop.f32.mrb[12].mxu1 }
 0xb2d   :  { %v3244_v25 = vadd.f32 %v2468_v4, %v2274_v62  ;;  %v3246_v10 = vadd.f32 %v2632_v7, %v2282_v63  ;;  %v2470_v50 = vpop.f32.mrb[21].mxu0  ;;  %v2634_v11 = vpop.f32.mrb[13].mxu1  ;;  %v2259_v4 = vld [vmem:[#allocation3 + $0xfb8] sm:$0xff]  ;;  %v2256_v7 = vld [vmem:[#allocation3 + $0xfa0] sm:$0xff] }
 0xb2e   :  { %v3245_v12 = vadd.f32 %v2470_v50, %v2278_v23  ;;  %v3247_v15 = vadd.f32 %v2634_v11, %v2286_v30  ;;  %v2472_v16 = vpop.f32.mrb[22].mxu0  ;;  %v2636_v18 = vpop.f32.mrb[14].mxu1  ;;  %2773 = vmatpush1.bf16.msra.mxu0 %v2184_v1  ;;  %2937 = vmatpush1.bf16.msra.mxu1 %v2186_v2  ;;  %v2248_v30 = vld [vmem:[#allocation3 + $0xf60] sm:$0xff]  ;;  %v2250_v1 = vld [vmem:[#allocation3 + $0xf70] sm:$0xff]  ;;  %v2257_v2 = vld [vmem:[#allocation3 + $0xfa8] sm:$0xff]  ;;  %v2289_v11 = vsub.s32 4, %v3845_v46 }
 0xb2f   :  { %v3079_v17 = vmul.f32 -1.442695, %v3244_v25  ;;  %v3081_v3 = vmul.f32 -1.442695, %v3246_v10  ;;  %v2473_v22 = vpop.f32.mrb[23].mxu0  ;;  %v2637_v26 = vpop.f32.mrb[15].mxu1  ;;  %2774 = vmatprep.subr.bf16.mxu0 %v2193_v9  ;;  %2938 = vmatprep.subr.bf16.mxu1 %v2195_v21 }
 0xb30   :  { %v3080_v27 = vmul.f32 -1.442695, %v3245_v12  ;;  %v3082_v8 = vmul.f32 -1.442695, %v3247_v15  ;;  %v2258_v9 = vld [vmem:[#allocation3 + $0xfb0] sm:$0xff]  ;;  %v2265_v21 = vld [vmem:[#allocation3 + $0xfe8] sm:$0xff]  ;;  %v2290_v18 = vrot.slane %v3994_v20, %v2289_v11 }
 0xb31   :  { %3352 = vpow2.f32 %v3079_v17  ;;  %v2267_v25 = vld [vmem:[#allocation3 + $0xff8] sm:$0xff]  ;;  %v2264_v10 = vld [vmem:[#allocation3 + $0xfe0] sm:$0xff]  ;;  %v2266_v50 = vld [vmem:[#allocation3 + $0xff0] sm:$0xff]  ;;  %v2297_v12 = vsub.s32 6, %v3845_v46  ;;  %v2293_v15 = vsub.s32 5, %v3845_v46  ;;  %v2301_v16 = vsub.s32 7, %v3845_v46 }
 0xb32   :  { %3354 = vpow2.f32 %v3081_v3  ;;  %2775 = vmatpush1.bf16.msra.mxu0 %v2192_v52  ;;  %2939 = vmatpush1.bf16.msra.mxu1 %v2194_v19 }
 0xb33   :  { %3356 = vpow2.f32 %v3080_v27  ;;  %2776 = vmatprep.subr.bf16.mxu0 %v2201_v32  ;;  %2940 = vmatprep.subr.bf16.mxu1 %v2203_v33  ;;  %v2298_v52 = vrot.slane %v3994_v20, %v2297_v12  ;;  %v2294_v19 = vrot.slane %v3994_v20, %v2293_v15  ;;  %v2302_v17 = vrot.slane %v3994_v20, %v2301_v16 }
 0xb34   :  { %3358 = vpow2.f32 %v3082_v8 }
 0xb36   :  { %2777 = vmatpush1.bf16.msra.mxu0 %v2200_v34  ;;  %2941 = vmatpush1.bf16.msra.mxu1 %v2202_v35 }
 0xb37   :  { %2778 = vmatprep.subr.bf16.mxu0 %v2209_v0  ;;  %2942 = vmatprep.subr.bf16.mxu1 %v2211_v29 }
 0xb3a   :  { %2779 = vmatpush1.bf16.msra.mxu0 %v2208_v36  ;;  %2943 = vmatpush1.bf16.msra.mxu1 %v2210_v37 }
 0xb3b   :  { %v3353_v28 = vpop.eup %3352  ;;  %2780 = vmatprep.subr.bf16.mxu0 %v2217_v6  ;;  %2944 = vmatprep.subr.bf16.mxu1 %v2219_v38 }
 0xb3c   :  { %v3355_v41 = vpop.eup %3354  ;;  %v2991_v42 = vadd.f32 1.0, %v3353_v28 }
 0xb3d   :  { %v3357_v44 = vpop.eup %3356  ;;  %v2993_v24 = vadd.f32 1.0, %v3355_v41 }
 0xb3e   :  { %v3359_v45 = vpop.eup %3358  ;;  %3360 = vrcp.f32 %v2991_v42  ;;  %v2992_v47 = vadd.f32 1.0, %v3357_v44  ;;  %2781 = vmatpush1.bf16.msra.mxu0 %v2216_v39  ;;  %2945 = vmatpush1.bf16.msra.mxu1 %v2218_v40 }
 0xb3f   :  { %3362 = vrcp.f32 %v2993_v24  ;;  %v2994_v48 = vadd.f32 1.0, %v3359_v45  ;;  %2782 = vmatprep.subr.bf16.mxu0 %v2225_v5  ;;  %2946 = vmatprep.subr.bf16.mxu1 %v2227_v43 }
 0xb40   :  { %3364 = vrcp.f32 %v2992_v47 }
 0xb41   :  { %3366 = vrcp.f32 %v2994_v48 }
 0xb42   :  { %2783 = vmatpush1.bf16.msra.mxu0 %v2224_v49  ;;  %2947 = vmatpush1.bf16.msra.mxu1 %v2226_v14 }
 0xb43   :  { %2784 = vmatprep.subr.bf16.mxu0 %v2233_v13  ;;  %2948 = vmatprep.subr.bf16.mxu1 %v2235_v51 }
 0xb46   :  { %2785 = vmatpush1.bf16.msra.mxu0 %v2232_v53  ;;  %2949 = vmatpush1.bf16.msra.mxu1 %v2234_v54 }
 0xb47   :  { %2786 = vmatprep.subr.bf16.mxu0 %v2241_v55  ;;  %2950 = vmatprep.subr.bf16.mxu1 %v2243_v56 }
 0xb48   :  { %v3361_v59 = vpop.eup %3360 }
 0xb49   :  { %v3363_v62 = vpop.eup %3362  ;;  %3015 = vst [vmem:[#allocation19] sm:$0xff] %v3361_v59 }
 0xb4a   :  { %v3365_v63 = vpop.eup %3364  ;;  %3017 = vst [vmem:[#allocation19 + $0x10] sm:$0xff] %v3363_v62  ;;  %2787 = vmatpush1.bf16.msra.mxu0 %v2240_v57  ;;  %2951 = vmatpush1.bf16.msra.mxu1 %v2242_v58 }
 0xb4b   :  { %v3367_v23 = vpop.eup %3366  ;;  %3016 = vst [vmem:[#allocation19 + $0x8] sm:$0xff] %v3365_v63  ;;  %2788 = vmatprep.subr.bf16.mxu0 %v2249_v60  ;;  %2952 = vmatprep.subr.bf16.mxu1 %v2251_v61 }
 0xb4c   :  { %3018 = vst [vmem:[#allocation19 + $0x18] sm:$0xff] %v3367_v23 }
 0xb4e   :  { %2789 = vmatpush1.bf16.msra.mxu0 %v2248_v30  ;;  %2953 = vmatpush1.bf16.msra.mxu1 %v2250_v1 }
 0xb4f   :  { %2790 = vmatprep.subr.bf16.mxu0 %v2257_v2  ;;  %2954 = vmatprep.subr.bf16.mxu1 %v2259_v4 }
 0xb52   :  { %2791 = vmatpush1.bf16.msra.mxu0 %v2256_v7  ;;  %2955 = vmatpush1.bf16.msra.mxu1 %v2258_v9 }
 0xb53   :  { %2792 = vmatprep.subr.bf16.mxu0 %v2265_v21  ;;  %2956 = vmatprep.subr.bf16.mxu1 %v2267_v25 }
 0xb56   :  { %2793 = vmatpush1.bf16.msra.mxu0 %v2264_v10  ;;  %2957 = vmatpush1.bf16.msra.mxu1 %v2266_v50 }
 0xb59   :  { %2795 = vmatmul.mubr.bf16.vlgmr.msra.gmra.mrb[24].mxu0 %v3959_v31  ;;  %2959 = vmatmul.mubr.bf16.vlgmr.msra.gmra.mrb[16].mxu1 %v3959_v31 }
 0xc2c   :  { %v2796_v3 = vpop.f32.mrb[24].mxu0  ;;  %v2960_v22 = vpop.f32.mrb[16].mxu1 }
 0xc2d   :  { %v3248_v26 = vadd.f32 %v2796_v3, %v2290_v18  ;;  %v3250_v31 = vadd.f32 %v2960_v22, %v2298_v52  ;;  %v2798_v27 = vpop.f32.mrb[25].mxu0  ;;  %v2962_v8 = vpop.f32.mrb[17].mxu1 }
 0xc2e   :  { %v3249_v32 = vadd.f32 %v2798_v27, %v2294_v19  ;;  %v3251_v33 = vadd.f32 %v2962_v8, %v2302_v17  ;;  %v2800_v34 = vpop.f32.mrb[26].mxu0  ;;  %v2964_v35 = vpop.f32.mrb[18].mxu1 }
 0xc2f   :  { %v3083_v0 = vmul.f32 -1.442695, %v3248_v26  ;;  %v3085_v46 = vmul.f32 -1.442695, %v3250_v31  ;;  %v2801_v29 = vpop.f32.mrb[27].mxu0  ;;  %v2965_v36 = vpop.f32.mrb[19].mxu1 }
 0xc30   :  { %v3084_v37 = vmul.f32 -1.442695, %v3249_v32  ;;  %v3086_v6 = vmul.f32 -1.442695, %v3251_v33 }
 0xc31   :  { %3368 = vpow2.f32 %v3083_v0 }
 0xc32   :  { %3370 = vpow2.f32 %v3085_v46 }
 0xc33   :  { %3372 = vpow2.f32 %v3084_v37 }
 0xc34   :  { %3374 = vpow2.f32 %v3086_v6 }
 0xc3b   :  { %v3369_v20 = vpop.eup %3368 }
 0xc3c   :  { %v3371_v38 = vpop.eup %3370  ;;  %v2995_v28 = vadd.f32 1.0, %v3369_v20 }
 0xc3d   :  { %v3373_v39 = vpop.eup %3372  ;;  %v2997_v40 = vadd.f32 1.0, %v3371_v38 }
 0xc3e   :  { %v3375_v41 = vpop.eup %3374  ;;  %3376 = vrcp.f32 %v2995_v28  ;;  %v2996_v42 = vadd.f32 1.0, %v3373_v39 }
 0xc3f   :  { %3378 = vrcp.f32 %v2997_v40  ;;  %v2998_v5 = vadd.f32 1.0, %v3375_v41 }
 0xc40   :  { %3380 = vrcp.f32 %v2996_v42 }
 0xc41   :  { %3382 = vrcp.f32 %v2998_v5 }
 0xc48   :  { %v3377_v43 = vpop.eup %3376 }
 0xc49   :  { %v3379_v44 = vpop.eup %3378  ;;  %3019 = vst [vmem:[#allocation19 + $0x20] sm:$0xff] %v3377_v43 }
 0xc4a   :  { %v3381_v24 = vpop.eup %3380  ;;  %3021 = vst [vmem:[#allocation19 + $0x30] sm:$0xff] %v3379_v44 }
 0xc4b   :  { %v3383_v45 = vpop.eup %3382  ;;  %3020 = vst [vmem:[#allocation19 + $0x28] sm:$0xff] %v3381_v24 }
 0xc4c   :  { %3022 = vst [vmem:[#allocation19 + $0x38] sm:$0xff] %v3383_v45 }
 0xc4d   :  { %3571 = shalt.err (!%p3568_p12)
}
 0xc4e   :  { %s3572_s20 = scalar_lea.hbm %s4035_s10, 1024 }
 0xc4f   :  { %p3573_p13 = scmp.ne.s32.totalorder %s4035_s10, %s3572_s20  ;;  %p3576_p0 = scmp.lt.u32.totalorder %s3572_s20, %s4035_s10 }
 0xc51   :  { %p3578_p1 = pnand %p3576_p0, %p3573_p13 }
 0xc53   :  { %3581 = shalt.err (!%p3578_p1)
}
 0xc54   :  { %3032 = dma.vmem_to_hbm [thread:$0]  %s3030_s14, 1024, %s4035_s10, [#allocation7]  }
 0xc55   :  { %3596 = dma.done.wait [#allocation7], 1024  }
 0xc56   :  { %3597 = vsyncadd [#allocation7], 4294966272 }
 0xc57   :  { %3036 = vsyncpa [#allocation6], 1 }
 0xc58   :  { %3037 = vsyncpa [#allocation9], 1 }
 0xc59   :  { %3038 = vsyncpa [#allocation12], 1 }
 0xc5a   :  { %3039 = vsyncpa [#allocation15], 1 }
 0xc5b   :  { %3040 = vsyncpa [#allocation18], 1 }
 0xc5c   :  { %3041 = vsyncpa [#allocation7], 1 }
 0xc5d   :  { %3042 = vsyncmov [#allocation4] }
 0xc60   :  { %s3043_s26 = vpop.sfrf %3042 }
 0xc61   :  { %p3087_p2 = scmp.ne.s32.totalorder %s3043_s26, 0 }
 0xc63   :  { %3047 = shalt.err (%p3087_p2)  }
 0xc64   :  { %3049 = vsyncmov [#allocation4 + $0x1] }
 0xc67   :  { %s3050_s27 = vpop.sfrf %3049 }
 0xc68   :  { %p3088_p3 = scmp.ne.s32.totalorder %s3050_s27, 0 }
 0xc6a   :  { %3054 = shalt.err (%p3088_p3)  }

</bundles_post_ra>
